<compile_context>
chip_gen: v5e
topology: v5e:2x2
jax: 0.10.0
libtpu: 0.0.40
codegen_flags: <defaults>
</compile_context>

<pallas_src>
import functools

import jax
import jax.numpy as jnp
from jax.experimental import pallas as pl
from jax.experimental.pallas import tpu as pltpu

_LANE = 128                 # Cout padded to the 128-lane vreg width
_GEMM_DTYPE = jnp.bfloat16  # MXU-native operands; accumulation stays f32
_MAX_TM = 512               # M-tile cap (keeps v5e's 16 MiB scoped VMEM happy)
_FUSED_OUT_BYTES = 4 << 20  # use the fully fused block kernel while the whole
                            # f32 conv output fits comfortably in VMEM
_BN_EPS = 1e-5
_SLOPE = 0.2


def _round_up(x, m):
    return (x + m - 1) // m * m


def _m_tiling(m, *, cap=_MAX_TM, min_grid=1):
    """Pick (tm, Mp): tm multiple of 8, tm <= cap, Mp a multiple of tm >= m.
    min_grid=2 splits M so a 'parallel' grid has >= 2 steps (v7x megacore)."""
    mp = _round_up(m, 8)
    tm = min(mp, cap)
    if min_grid > 1 and mp >= 16 * min_grid:
        tm = min(tm, _round_up(-(-mp // min_grid), 8))
    mp = _round_up(mp, tm)
    return tm, mp


# ---------------------------------------------------------------------------
# Pallas kernels
# ---------------------------------------------------------------------------
def _gemm_bias_act_kernel(x_ref, w_ref, b_ref, o_ref, *, neg_slope):
    """o = [leakyrelu](x @ w + b) on one M-tile (layer 1)."""
    acc = jnp.dot(x_ref[...], w_ref[...], preferred_element_type=jnp.float32)
    acc = acc + b_ref[...]                                # (tm, Cp) + (1, Cp)
    if neg_slope is not None:
        acc = jnp.where(acc >= 0, acc, neg_slope * acc)
    o_ref[...] = acc.astype(o_ref.dtype)


def _block_fused_kernel(x_ref, w_ref, g_ref, b_ref, o_ref, sum_sc, ssq_sc,
                        *, neg_slope, eps, inv_m):
    """Whole _block() in one kernel: conv GEMM tile -> resident output block,
    per-channel sum/sumsq accumulated in scratch, BN + LeakyReLU applied to
    the resident block on the last grid step (single HBM writeback)."""
    i = pl.program_id(0)
    nt = pl.num_programs(0)
    tm = x_ref.shape[0]

    acc = jnp.dot(x_ref[...], w_ref[...], preferred_element_type=jnp.float32)
    off = pl.multiple_of(i * tm, tm)
    o_ref[pl.ds(off, tm), :] = acc            # raw conv parked in the output block

    psum = jnp.sum(acc, axis=0, keepdims=True)
    psq = jnp.sum(acc * acc, axis=0, keepdims=True)

    @pl.when(i == 0)
    def _():
        sum_sc[...] = psum
        ssq_sc[...] = psq

    @pl.when(i != 0)
    def _():
        sum_sc[...] = sum_sc[...] + psum
        ssq_sc[...] = ssq_sc[...] + psq

    @pl.when(i == nt - 1)
    def _():
        # Training-mode BatchNorm: biased variance over the real row count M.
        # NOTE: E[x^2]-E[x]^2 in f32 -- fine at DCGAN activation scales.
        mean = sum_sc[...] * inv_m
        var = jnp.maximum(ssq_sc[...] * inv_m - mean * mean, 0.0)
        scale = g_ref[...] * jax.lax.rsqrt(var + eps)
        shift = b_ref[...] - mean * scale
        y = o_ref[...] * scale + shift
        o_ref[...] = jnp.where(y >= 0, y, neg_slope * y)


def _gemm_partial_stats_kernel(x_ref, w_ref, o_ref, stats_ref):
    """Fallback (large shapes): o = x @ w plus per-tile partial sum / sumsq as
    independent outputs -> the M grid axis stays safely 'parallel' (v7x)."""
    acc = jnp.dot(x_ref[...], w_ref[...], preferred_element_type=jnp.float32)
    o_ref[...] = acc.astype(o_ref.dtype)
    psum = jnp.sum(acc, axis=0, keepdims=True)
    psq = jnp.sum(acc * acc, axis=0, keepdims=True)
    pad = jnp.zeros((6, acc.shape[-1]), jnp.float32)
    stats_ref[...] = jnp.concatenate([psum, psq, pad], axis=0)[None]


def _bn_lrelu_kernel(x_ref, scale_ref, shift_ref, o_ref, *, neg_slope):
    y = x_ref[...] * scale_ref[...] + shift_ref[...]
    o_ref[...] = jnp.where(y >= 0, y, neg_slope * y).astype(o_ref.dtype)


# ---------------------------------------------------------------------------
# Pallas wrappers
# ---------------------------------------------------------------------------
def conv_gemm_bias_act(patches, w_mat, bias, *, neg_slope):
    """patches: (M, K), w_mat: (K, Cp), bias: (Cp,) -> (M, Cp) f32."""
    M, K = patches.shape
    _, Cp = w_mat.shape
    tm, Mp = _m_tiling(M, min_grid=2)
    x = patches.astype(_GEMM_DTYPE)
    if Mp != M:
        x = jnp.pad(x, ((0, Mp - M), (0, 0)))
    out = pl.pallas_call(
        functools.partial(_gemm_bias_act_kernel, neg_slope=neg_slope),
        out_shape=jax.ShapeDtypeStruct((Mp, Cp), jnp.float32),
        grid_spec=pltpu.PrefetchScalarGridSpec(
            num_scalar_prefetch=0,
            grid=(Mp // tm,),
            in_specs=[
                pl.BlockSpec((tm, K), lambda i: (i, 0)),
                pl.BlockSpec((K, Cp), lambda i: (0, 0)),
                pl.BlockSpec((1, Cp), lambda i: (0, 0)),
            ],
            out_specs=pl.BlockSpec((tm, Cp), lambda i: (i, 0)),
        ),
        compiler_params=pltpu.CompilerParams(dimension_semantics=("parallel",)),
    )(x, w_mat.astype(_GEMM_DTYPE), bias.reshape(1, Cp).astype(jnp.float32))
    return out if Mp == M else out[:M]


def conv_block_fused(patches, w_mat, gamma, beta, *, m_real):
    """One pallas_call for conv(no bias) + BatchNorm(batch stats) + LeakyReLU."""
    M, K = patches.shape
    _, Cp = w_mat.shape
    tm, Mp = _m_tiling(M)
    x = patches.astype(_GEMM_DTYPE)
    if Mp != M:
        x = jnp.pad(x, ((0, Mp - M), (0, 0)))   # zero rows: contribute 0 to sums
    out = pl.pallas_call(
        functools.partial(_block_fused_kernel, neg_slope=_SLOPE, eps=_BN_EPS,
                          inv_m=1.0 / float(m_real)),
        out_shape=jax.ShapeDtypeStruct((Mp, Cp), jnp.float32),
        grid_spec=pltpu.PrefetchScalarGridSpec(
            num_scalar_prefetch=0,
            grid=(Mp // tm,),
            in_specs=[
                pl.BlockSpec((tm, K), lambda i: (i, 0)),
                pl.BlockSpec((K, Cp), lambda i: (0, 0)),
                pl.BlockSpec((1, Cp), lambda i: (0, 0)),
                pl.BlockSpec((1, Cp), lambda i: (0, 0)),
            ],
            # Constant block index -> output stays resident in VMEM across the
            # M grid axis; written back to HBM exactly once.
            out_specs=pl.BlockSpec((Mp, Cp), lambda i: (0, 0)),
            scratch_shapes=[pltpu.VMEM((1, Cp), jnp.float32),
                            pltpu.VMEM((1, Cp), jnp.float32)],
        ),
        compiler_params=pltpu.CompilerParams(dimension_semantics=("arbitrary",)),
    )(x, w_mat.astype(_GEMM_DTYPE),
      gamma.reshape(1, Cp).astype(jnp.float32),
      beta.reshape(1, Cp).astype(jnp.float32))
    return out if Mp == M else out[:M]


def conv_gemm_partial_stats(patches, w_mat):
    """Fallback path for large shapes: conv GEMM + per-tile partial stats,
    M axis 'parallel' (megacore-shardable on v7x). Returns (conv, sum, sumsq)."""
    M, K = patches.shape
    _, Cp = w_mat.shape
    tm, Mp = _m_tiling(M, min_grid=2)
    nt = Mp // tm
    x = patches.astype(_GEMM_DTYPE)
    if Mp != M:
        x = jnp.pad(x, ((0, Mp - M), (0, 0)))
    conv, stats = pl.pallas_call(
        _gemm_partial_stats_kernel,
        out_shape=(jax.ShapeDtypeStruct((Mp, Cp), jnp.float32),
                   jax.ShapeDtypeStruct((nt, 8, Cp), jnp.float32)),
        grid_spec=pltpu.PrefetchScalarGridSpec(
            num_scalar_prefetch=0,
            grid=(nt,),
            in_specs=[pl.BlockSpec((tm, K), lambda i: (i, 0)),
                      pl.BlockSpec((K, Cp), lambda i: (0, 0))],
            out_specs=[pl.BlockSpec((tm, Cp), lambda i: (i, 0)),
                       pl.BlockSpec((1, 8, Cp), lambda i: (i, 0, 0))],
        ),
        compiler_params=pltpu.CompilerParams(dimension_semantics=("parallel",)),
    )(x, w_mat.astype(_GEMM_DTYPE))
    if Mp != M:
        conv = conv[:M]
    red = jnp.sum(stats, axis=0)                 # (8, Cp): row0 = sum, row1 = sumsq
    return conv, red[0], red[1]


def bn_leakyrelu(x, scale, shift, *, neg_slope):
    """Fallback BN+LeakyReLU kernel; x: (M, Cp), scale/shift: (Cp,)."""
    M, C = x.shape
    tm, Mp = _m_tiling(M, cap=2048)
    x_p = x if Mp == M else jnp.pad(x, ((0, Mp - M), (0, 0)))
    out = pl.pallas_call(
        functools.partial(_bn_lrelu_kernel, neg_slope=neg_slope),
        out_shape=jax.ShapeDtypeStruct((Mp, C), jnp.float32),
        grid_spec=pltpu.PrefetchScalarGridSpec(
            num_scalar_prefetch=0,
            grid=(Mp // tm,),
            in_specs=[
                pl.BlockSpec((tm, C), lambda i: (i, 0)),
                pl.BlockSpec((1, C), lambda i: (0, 0)),
                pl.BlockSpec((1, C), lambda i: (0, 0)),
            ],
            out_specs=pl.BlockSpec((tm, C), lambda i: (i, 0)),
        ),
        compiler_params=pltpu.CompilerParams(dimension_semantics=("parallel",)),
    )(x_p, scale.reshape(1, C), shift.reshape(1, C))
    return out if Mp == M else out[:M]


# ---------------------------------------------------------------------------
# Glue: im2col + parameter construction + forward orchestration
# ---------------------------------------------------------------------------
def im2col(x_nhwc, kh, kw, stride, padding):
    """(N,H,W,C) -> ((N*OH*OW, kh*kw*C), OH, OW); inner index order (kh,kw,ci)."""
    # TODO(synk): fold this into the GEMM kernel (shifted index_map / strided DMA)
    # to avoid materializing the ~4x-duplicated patch tensor in HBM.
    N, H, W, C = x_nhwc.shape
    xp = jnp.pad(x_nhwc, ((0, 0), (padding, padding), (padding, padding), (0, 0)))
    OH = (H + 2 * padding - kh) // stride + 1
    OW = (W + 2 * padding - kw) // stride + 1
    cols = []
    for i in range(kh):
        for j in range(kw):
            cols.append(
                xp[:, i:i + (OH - 1) * stride + 1:stride,
                      j:j + (OW - 1) * stride + 1:stride, :])
    patches = jnp.stack(cols, axis=3)                # (N, OH, OW, kh*kw, C)
    return patches.reshape(N * OH * OW, kh * kw * C), OH, OW


def torch_weight_to_mat(w_oihw, cout_pad, k_pad=None):
    """(Cout, Cin, KH, KW) -> (k_pad or KH*KW*Cin, cout_pad); rows ordered
    (kh, kw, ci) to match im2col; zero padding only on extra rows / Cout lanes."""
    cout, cin, kh, kw = w_oihw.shape
    k = kh * kw * cin
    w = jnp.transpose(w_oihw, (2, 3, 1, 0)).reshape(k, cout)
    return jnp.pad(w, ((0, (k_pad or k) - k), (0, cout_pad - cout)))


def init_params(key, channel_img, feature_d):
    """Deterministic synthetic params; conv weights ~ N(0, 0.02), BN gamma=1, beta=0."""
    keys = jax.random.split(key, 8)
    fd = feature_d

    def conv_w(k, cout, cin):
        return 0.02 * jax.random.normal(k, (cout, cin, 4, 4), jnp.float32)

    return {
        # layer 1: Conv2d(channel_img, fd, 4, 2, 1) with bias, then LeakyReLU(0.2)
        "w1": conv_w(keys[0], fd, channel_img),
        "b1": 0.02 * jax.random.normal(keys[1], (fd,), jnp.float32),
        # blocks: Conv2d(no bias) + BatchNorm2d + LeakyReLU(0.2)
        "w2": conv_w(keys[2], fd * 2, fd),
        "g2": jnp.ones((fd * 2,), jnp.float32), "be2": jnp.zeros((fd * 2,), jnp.float32),
        "w3": conv_w(keys[3], fd * 4, fd * 2),
        "g3": jnp.ones((fd * 4,), jnp.float32), "be3": jnp.zeros((fd * 4,), jnp.float32),
        "w4": conv_w(keys[4], fd * 8, fd * 4),
        "g4": jnp.ones((fd * 8,), jnp.float32), "be4": jnp.zeros((fd * 8,), jnp.float32),
        # final: Conv2d(fd*8, 1, 4, 2, 0) with bias, no activation
        "w5": conv_w(keys[5], 1, fd * 8),
        "b5": 0.02 * jax.random.normal(keys[6], (1,), jnp.float32),
    }


def _conv_block_bn(x_nhwc, w_oihw, gamma, beta):
    """Conv(k4,s2,p1,no bias) + training-mode BatchNorm + LeakyReLU(0.2).
    Output channels padded to 128 (lane-dense); K uses only real input channels."""
    N = x_nhwc.shape[0]
    cout, cin = w_oihw.shape[0], w_oihw.shape[1]
    cout_pad = _round_up(cout, _LANE)

    # Slice off the previous layer's lane padding BEFORE im2col so the GEMM K
    # dimension carries no zeros (K = 16*cin = 128/256/512 here, lane-aligned).
    patches, OH, OW = im2col(x_nhwc[..., :cin], 4, 4, 2, 1)
    M = patches.shape[0]
    w_mat = torch_weight_to_mat(w_oihw, cout_pad)
    g = jnp.pad(gamma, (0, cout_pad - cout))     # zero-padded -> padded chans stay 0
    b = jnp.pad(beta, (0, cout_pad - cout))

    if _round_up(M, 8) * cout_pad * 4 <= _FUSED_OUT_BYTES:
        out = conv_block_fused(patches, w_mat, g, b, m_real=M)
    else:
        conv, s, ssq = conv_gemm_partial_stats(patches, w_mat)
        mean = s / M
        var = jnp.maximum(ssq / M - mean * mean, 0.0)
        scale = g * jax.lax.rsqrt(var + _BN_EPS)
        shift = b - mean * scale
        out = bn_leakyrelu(conv, scale, shift, neg_slope=_SLOPE)
    return out.reshape(N, OH, OW, cout_pad)


def critic_forward(params, x_nchw):
    """nn.Sequential(conv+lrelu, block, block, block, conv) in training mode."""
    x = jnp.transpose(x_nchw, (0, 2, 3, 1)).astype(jnp.float32)   # NCHW -> NHWC
    N, _, _, c_img = x.shape
    fd = params["w1"].shape[0]

    # layer 1: Conv2d(c_img, fd, 4, 2, 1) + bias + LeakyReLU(0.2), fused GEMM.
    patches, OH, OW = im2col(x, 4, 4, 2, 1)
    k1 = patches.shape[1]                          # 16 * c_img
    k1_pad = _round_up(k1, _LANE)                  # pad K 48 -> 128: full-lane loads
    patches = jnp.pad(patches, ((0, 0), (0, k1_pad - k1)))
    cout_pad = _round_up(fd, _LANE)
    w1 = torch_weight_to_mat(params["w1"], cout_pad, k_pad=k1_pad)
    b1 = jnp.pad(params["b1"], (0, cout_pad - fd))
    x = conv_gemm_bias_act(patches, w1, b1, neg_slope=_SLOPE
                           ).reshape(N, OH, OW, cout_pad)

    # three _block()s: conv(no bias) + BatchNorm + LeakyReLU, fully fused each.
    x = _conv_block_bn(x, params["w2"], params["g2"], params["be2"])
    x = _conv_block_bn(x, params["w3"], params["g3"], params["be3"])
    x = _conv_block_bn(x, params["w4"], params["g4"], params["be4"])

    # final: Conv2d(fd*8, 1, 4, 2, 0) + bias.  M = N*OH5*OW5 (=2) and Cout = 1:
    # a pallas_call here is pure launch/pad overhead, so it stays a jnp.dot.
    cin5 = params["w5"].shape[1]
    w5_mat = jnp.transpose(params["w5"], (2, 3, 1, 0)).reshape(16 * cin5, 1)
    patches5, OH5, OW5 = im2col(x[..., :cin5], 4, 4, 2, 0)
    out = patches5 @ w5_mat + params["b5"]                        # (N*OH5*OW5, 1)
    out = out.reshape(N, OH5, OW5, 1)
    return jnp.transpose(out, (0, 3, 1, 2))                       # NHWC -> NCHW


# ---------------------------------------------------------------------------
if __name__ == "__main__":
    key = jax.random.PRNGKey(0)
    k_param, k_x = jax.random.split(key)

    channel_img, feature_d = 3, 8
    batch, H, W = 2, 64, 64        # 64 -> 32 -> 16 -> 8 -> 4 -> 1 (DCGAN geometry)

    params = init_params(k_param, channel_img, feature_d)
    x = jax.random.normal(k_x, (batch, channel_img, H, W), jnp.float32)

    y = jax.jit(critic_forward)(params, x)
    y = jax.block_until_ready(y)

    assert y.shape == (batch, 1, 1, 1), y.shape
    assert jnp.all(jnp.isfinite(y))
    print("KERNEL_OK")
</pallas_src>

<mosaic_0001>
module attributes {stable_mosaic.version = 11 : i64} {
  func.func @_gemm_bias_act_kernel(%arg0: i32, %arg1: memref<512x128xbf16, #tpu.memory_space<vmem>>, %arg2: memref<128x128xbf16, #tpu.memory_space<vmem>>, %arg3: memref<1x128xf32, #tpu.memory_space<vmem>>, %arg4: memref<512x128xf32, #tpu.memory_space<vmem>>) attributes {dimension_semantics = [#tpu.dimension_semantics<parallel>], iteration_bounds = array<i64: 4>, scalar_prefetch = 0 : i64, scratch_operands = 0 : i64, tpu.core_type = #tpu.core_type<tc>, window_params = [{transform_indices = @transform_0, window_bounds = array<i64: 512, 128>}, {pipeline_mode = #tpu.pipeline_mode<synchronous>, transform_indices = @transform_1, window_bounds = array<i64: 128, 128>}, {pipeline_mode = #tpu.pipeline_mode<synchronous>, transform_indices = @transform_2, window_bounds = array<i64: 1, 128>}, {transform_indices = @transform_3, window_bounds = array<i64: 512, 128>}]} {
    %c0 = arith.constant 0 : index
    %c0_0 = arith.constant 0 : index
    %0 = vector.load %arg1[%c0, %c0_0] : memref<512x128xbf16, #tpu.memory_space<vmem>>, vector<512x128xbf16>
    %c0_1 = arith.constant 0 : index
    %c0_2 = arith.constant 0 : index
    %1 = vector.load %arg2[%c0_1, %c0_2] : memref<128x128xbf16, #tpu.memory_space<vmem>>, vector<128x128xbf16>
    %cst = arith.constant dense<0.000000e+00> : vector<512x128xf32>
    %2 = tpu.matmul %0, %1, %cst {dimension_numbers = #tpu.dot_dimension_numbers<[1], [0], [0], [1], [0, 0, 1, 1], [], []>} : vector<512x128xbf16>, vector<128x128xbf16>, vector<512x128xf32> -> vector<512x128xf32>
    %c0_3 = arith.constant 0 : index
    %c0_4 = arith.constant 0 : index
    %3 = vector.load %arg3[%c0_3, %c0_4] : memref<1x128xf32, #tpu.memory_space<vmem>>, vector<1x128xf32>
    %4 = vector.broadcast %3 : vector<1x128xf32> to vector<512x128xf32>
    %5 = arith.addf %2, %4 : vector<512x128xf32>
    %cst_5 = arith.constant 0.000000e+00 : f32
    %6 = vector.broadcast %cst_5 : f32 to vector<512x128xf32>
    %7 = arith.cmpf oge, %5, %6 : vector<512x128xf32>
    %cst_6 = arith.constant 2.000000e-01 : f32
    %8 = vector.broadcast %cst_6 : f32 to vector<512x128xf32>
    %9 = arith.mulf %8, %5 : vector<512x128xf32>
    %10 = arith.select %7, %5, %9 : vector<512x128xi1>, vector<512x128xf32>
    %c0_7 = arith.constant 0 : index
    %c0_8 = arith.constant 0 : index
    %11 = vector.load %arg4[%c0_7, %c0_8] : memref<512x128xf32, #tpu.memory_space<vmem>>, vector<512x128xf32>
    tpu.vector_store %arg4[%c0_7, %c0_8], %10 {strides = array<i32>} : memref<512x128xf32, #tpu.memory_space<vmem>>, vector<512x128xf32>,
    return
  }
  func.func @transform_0(%arg0: i32) -> (i32, i32) {
    %c0_i32 = arith.constant 0 : i32
    %c0_i32_0 = arith.constant 0 : i32
    return %arg0, %c0_i32 : i32, i32
  }
  func.func @transform_1(%arg0: i32) -> (i32, i32) {
    %c0_i32 = arith.constant 0 : i32
    %c0_i32_0 = arith.constant 0 : i32
    %c0_i32_1 = arith.constant 0 : i32
    return %c0_i32, %c0_i32_0 : i32, i32
  }
  func.func @transform_2(%arg0: i32) -> (i32, i32) {
    %c0_i32 = arith.constant 0 : i32
    %c0_i32_0 = arith.constant 0 : i32
    %c0_i32_1 = arith.constant 0 : i32
    return %c0_i32, %c0_i32_0 : i32, i32
  }
  func.func @transform_3(%arg0: i32) -> (i32, i32) {
    %c0_i32 = arith.constant 0 : i32
    %c0_i32_0 = arith.constant 0 : i32
    return %arg0, %c0_i32 : i32, i32
  }
}

module attributes {stable_mosaic.version = 11 : i64} {
  func.func @_block_fused_kernel(%arg0: i32, %arg1: memref<512x128xbf16, #tpu.memory_space<vmem>>, %arg2: memref<128x128xbf16, #tpu.memory_space<vmem>>, %arg3: memref<1x128xf32, #tpu.memory_space<vmem>>, %arg4: memref<1x128xf32, #tpu.memory_space<vmem>>, %arg5: memref<512x128xf32, #tpu.memory_space<vmem>>, %arg6: memref<1x128xf32, #tpu.memory_space<vmem>>, %arg7: memref<1x128xf32, #tpu.memory_space<vmem>>) attributes {dimension_semantics = [#tpu.dimension_semantics<arbitrary>], iteration_bounds = array<i64: 1>, scalar_prefetch = 0 : i64, scratch_operands = 2 : i64, tpu.core_type = #tpu.core_type<tc>, window_params = [{transform_indices = @transform_0, window_bounds = array<i64: 512, 128>}, {pipeline_mode = #tpu.pipeline_mode<synchronous>, transform_indices = @transform_1, window_bounds = array<i64: 128, 128>}, {pipeline_mode = #tpu.pipeline_mode<synchronous>, transform_indices = @transform_2, window_bounds = array<i64: 1, 128>}, {pipeline_mode = #tpu.pipeline_mode<synchronous>, transform_indices = @transform_3, window_bounds = array<i64: 1, 128>}, {pipeline_mode = #tpu.pipeline_mode<synchronous>, transform_indices = @transform_4, window_bounds = array<i64: 512, 128>}]} {
    %c0 = arith.constant 0 : index
    %c0_0 = arith.constant 0 : index
    %0 = vector.load %arg1[%c0, %c0_0] : memref<512x128xbf16, #tpu.memory_space<vmem>>, vector<512x128xbf16>
    %c0_1 = arith.constant 0 : index
    %c0_2 = arith.constant 0 : index
    %1 = vector.load %arg2[%c0_1, %c0_2] : memref<128x128xbf16, #tpu.memory_space<vmem>>, vector<128x128xbf16>
    %cst = arith.constant dense<0.000000e+00> : vector<512x128xf32>
    %2 = tpu.matmul %0, %1, %cst {dimension_numbers = #tpu.dot_dimension_numbers<[1], [0], [0], [1], [0, 0, 1, 1], [], []>} : vector<512x128xbf16>, vector<128x128xbf16>, vector<512x128xf32> -> vector<512x128xf32>
    %c512_i32 = arith.constant 512 : i32
    %3 = arith.muli %arg0, %c512_i32 : i32
    %4 = tpu.assume_multiple %3, 512 : i32
    %5 = arith.index_cast %4 : i32 to index
    %c0_3 = arith.constant 0 : index
    %6 = vector.load %arg5[%5, %c0_3] : memref<512x128xf32, #tpu.memory_space<vmem>>, vector<512x128xf32>
    tpu.vector_store %arg5[%5, %c0_3], %2 {strides = array<i32>} : memref<512x128xf32, #tpu.memory_space<vmem>>, vector<512x128xf32>,
    %cst_4 = arith.constant dense<0.000000e+00> : vector<128xf32>
    %7 = vector.multi_reduction <add>, %2, %cst_4 [0] : vector<512x128xf32> to vector<128xf32>
    %8 = vector.shape_cast %7 : vector<128xf32> to vector<1x128xf32>
    %9 = arith.mulf %2, %2 : vector<512x128xf32>
    %cst_5 = arith.constant dense<0.000000e+00> : vector<128xf32>
    %10 = vector.multi_reduction <add>, %9, %cst_5 [0] : vector<512x128xf32> to vector<128xf32>
    %11 = vector.shape_cast %10 : vector<128xf32> to vector<1x128xf32>
    %c0_i32 = arith.constant 0 : i32
    %12 = arith.cmpi eq, %arg0, %c0_i32 : i32
    %13 = arith.extui %12 : i1 to i32
    %c0_i32_6 = arith.constant 0 : i32
    %14 = arith.cmpi ne, %13, %c0_i32_6 : i32
    scf.if %14 {
      %c0_11 = arith.constant 0 : index
      %c0_12 = arith.constant 0 : index
      %21 = vector.load %arg6[%c0_11, %c0_12] : memref<1x128xf32, #tpu.memory_space<vmem>>, vector<1x128xf32>
      tpu.vector_store %arg6[%c0_11, %c0_12], %8 {strides = array<i32>} : memref<1x128xf32, #tpu.memory_space<vmem>>, vector<1x128xf32>,
      %c0_13 = arith.constant 0 : index
      %c0_14 = arith.constant 0 : index
      %22 = vector.load %arg7[%c0_13, %c0_14] : memref<1x128xf32, #tpu.memory_space<vmem>>, vector<1x128xf32>
      tpu.vector_store %arg7[%c0_13, %c0_14], %11 {strides = array<i32>} : memref<1x128xf32, #tpu.memory_space<vmem>>, vector<1x128xf32>,
    } else {
    }
    %c0_i32_7 = arith.constant 0 : i32
    %15 = arith.cmpi ne, %arg0, %c0_i32_7 : i32
    %16 = arith.extui %15 : i1 to i32
    %c0_i32_8 = arith.constant 0 : i32
    %17 = arith.cmpi ne, %16, %c0_i32_8 : i32
    scf.if %17 {
      %c0_11 = arith.constant 0 : index
      %c0_12 = arith.constant 0 : index
      %21 = vector.load %arg6[%c0_11, %c0_12] : memref<1x128xf32, #tpu.memory_space<vmem>>, vector<1x128xf32>
      %22 = arith.addf %21, %8 : vector<1x128xf32>
      %c0_13 = arith.constant 0 : index
      %c0_14 = arith.constant 0 : index
      %23 = vector.load %arg6[%c0_13, %c0_14] : memref<1x128xf32, #tpu.memory_space<vmem>>, vector<1x128xf32>
      tpu.vector_store %arg6[%c0_13, %c0_14], %22 {strides = array<i32>} : memref<1x128xf32, #tpu.memory_space<vmem>>, vector<1x128xf32>,
      %c0_15 = arith.constant 0 : index
      %c0_16 = arith.constant 0 : index
      %24 = vector.load %arg7[%c0_15, %c0_16] : memref<1x128xf32, #tpu.memory_space<vmem>>, vector<1x128xf32>
      %25 = arith.addf %24, %11 : vector<1x128xf32>
      %c0_17 = arith.constant 0 : index
      %c0_18 = arith.constant 0 : index
      %26 = vector.load %arg7[%c0_17, %c0_18] : memref<1x128xf32, #tpu.memory_space<vmem>>, vector<1x128xf32>
      tpu.vector_store %arg7[%c0_17, %c0_18], %25 {strides = array<i32>} : memref<1x128xf32, #tpu.memory_space<vmem>>, vector<1x128xf32>,
    } else {
    }
    %c0_i32_9 = arith.constant 0 : i32
    %18 = arith.cmpi eq, %arg0, %c0_i32_9 : i32
    %19 = arith.extui %18 : i1 to i32
    %c0_i32_10 = arith.constant 0 : i32
    %20 = arith.cmpi ne, %19, %c0_i32_10 : i32
    scf.if %20 {
      %c0_11 = arith.constant 0 : index
      %c0_12 = arith.constant 0 : index
      %21 = vector.load %arg6[%c0_11, %c0_12] : memref<1x128xf32, #tpu.memory_space<vmem>>, vector<1x128xf32>
      %cst_13 = arith.constant 0.001953125 : f32
      %22 = vector.broadcast %cst_13 : f32 to vector<1x128xf32>
      %23 = arith.mulf %21, %22 : vector<1x128xf32>
      %c0_14 = arith.constant 0 : index
      %c0_15 = arith.constant 0 : index
      %24 = vector.load %arg7[%c0_14, %c0_15] : memref<1x128xf32, #tpu.memory_space<vmem>>, vector<1x128xf32>
      %cst_16 = arith.constant 0.001953125 : f32
      %25 = vector.broadcast %cst_16 : f32 to vector<1x128xf32>
      %26 = arith.mulf %24, %25 : vector<1x128xf32>
      %27 = arith.mulf %23, %23 : vector<1x128xf32>
      %28 = arith.subf %26, %27 : vector<1x128xf32>
      %cst_17 = arith.constant 0.000000e+00 : f32
      %29 = vector.broadcast %cst_17 : f32 to vector<1x128xf32>
      %30 = arith.maximumf %28, %29 : vector<1x128xf32>
      %c0_18 = arith.constant 0 : index
      %c0_19 = arith.constant 0 : index
      %31 = vector.load %arg3[%c0_18, %c0_19] : memref<1x128xf32, #tpu.memory_space<vmem>>, vector<1x128xf32>
      %cst_20 = arith.constant 9.99999974E-6 : f32
      %32 = vector.broadcast %cst_20 : f32 to vector<1x128xf32>
      %33 = arith.addf %30, %32 : vector<1x128xf32>
      %34 = math.rsqrt %33 : vector<1x128xf32>
      %35 = arith.mulf %31, %34 : vector<1x128xf32>
      %c0_21 = arith.constant 0 : index
      %c0_22 = arith.constant 0 : index
      %36 = vector.load %arg4[%c0_21, %c0_22] : memref<1x128xf32, #tpu.memory_space<vmem>>, vector<1x128xf32>
      %37 = arith.mulf %23, %35 : vector<1x128xf32>
      %38 = arith.subf %36, %37 : vector<1x128xf32>
      %c0_23 = arith.constant 0 : index
      %c0_24 = arith.constant 0 : index
      %39 = vector.load %arg5[%c0_23, %c0_24] : memref<512x128xf32, #tpu.memory_space<vmem>>, vector<512x128xf32>
      %40 = vector.broadcast %35 : vector<1x128xf32> to vector<512x128xf32>
      %41 = arith.mulf %39, %40 : vector<512x128xf32>
      %42 = vector.broadcast %38 : vector<1x128xf32> to vector<512x128xf32>
      %43 = arith.addf %41, %42 : vector<512x128xf32>
      %cst_25 = arith.constant 0.000000e+00 : f32
      %44 = vector.broadcast %cst_25 : f32 to vector<512x128xf32>
      %45 = arith.cmpf oge, %43, %44 : vector<512x128xf32>
      %cst_26 = arith.constant 2.000000e-01 : f32
      %46 = vector.broadcast %cst_26 : f32 to vector<512x128xf32>
      %47 = arith.mulf %46, %43 : vector<512x128xf32>
      %48 = arith.select %45, %43, %47 : vector<512x128xi1>, vector<512x128xf32>
      %c0_27 = arith.constant 0 : index
      %c0_28 = arith.constant 0 : index
      %49 = vector.load %arg5[%c0_27, %c0_28] : memref<512x128xf32, #tpu.memory_space<vmem>>, vector<512x128xf32>
      tpu.vector_store %arg5[%c0_27, %c0_28], %48 {strides = array<i32>} : memref<512x128xf32, #tpu.memory_space<vmem>>, vector<512x128xf32>,
    } else {
    }
    return
  }
  func.func @transform_0(%arg0: i32) -> (i32, i32) {
    %c0_i32 = arith.constant 0 : i32
    %c0_i32_0 = arith.constant 0 : i32
    return %arg0, %c0_i32 : i32, i32
  }
  func.func @transform_1(%arg0: i32) -> (i32, i32) {
    %c0_i32 = arith.constant 0 : i32
    %c0_i32_0 = arith.constant 0 : i32
    %c0_i32_1 = arith.constant 0 : i32
    return %c0_i32, %c0_i32_0 : i32, i32
  }
  func.func @transform_2(%arg0: i32) -> (i32, i32) {
    %c0_i32 = arith.constant 0 : i32
    %c0_i32_0 = arith.constant 0 : i32
    %c0_i32_1 = arith.constant 0 : i32
    return %c0_i32, %c0_i32_0 : i32, i32
  }
  func.func @transform_3(%arg0: i32) -> (i32, i32) {
    %c0_i32 = arith.constant 0 : i32
    %c0_i32_0 = arith.constant 0 : i32
    %c0_i32_1 = arith.constant 0 : i32
    return %c0_i32, %c0_i32_0 : i32, i32
  }
  func.func @transform_4(%arg0: i32) -> (i32, i32) {
    %c0_i32 = arith.constant 0 : i32
    %c0_i32_0 = arith.constant 0 : i32
    %c0_i32_1 = arith.constant 0 : i32
    return %c0_i32, %c0_i32_0 : i32, i32
  }
}

module attributes {stable_mosaic.version = 11 : i64} {
  func.func @_block_fused_kernel(%arg0: i32, %arg1: memref<128x256xbf16, #tpu.memory_space<vmem>>, %arg2: memref<256x128xbf16, #tpu.memory_space<vmem>>, %arg3: memref<1x128xf32, #tpu.memory_space<vmem>>, %arg4: memref<1x128xf32, #tpu.memory_space<vmem>>, %arg5: memref<128x128xf32, #tpu.memory_space<vmem>>, %arg6: memref<1x128xf32, #tpu.memory_space<vmem>>, %arg7: memref<1x128xf32, #tpu.memory_space<vmem>>) attributes {dimension_semantics = [#tpu.dimension_semantics<arbitrary>], iteration_bounds = array<i64: 1>, scalar_prefetch = 0 : i64, scratch_operands = 2 : i64, tpu.core_type = #tpu.core_type<tc>, window_params = [{transform_indices = @transform_0, window_bounds = array<i64: 128, 256>}, {pipeline_mode = #tpu.pipeline_mode<synchronous>, transform_indices = @transform_1, window_bounds = array<i64: 256, 128>}, {pipeline_mode = #tpu.pipeline_mode<synchronous>, transform_indices = @transform_2, window_bounds = array<i64: 1, 128>}, {pipeline_mode = #tpu.pipeline_mode<synchronous>, transform_indices = @transform_3, window_bounds = array<i64: 1, 128>}, {pipeline_mode = #tpu.pipeline_mode<synchronous>, transform_indices = @transform_4, window_bounds = array<i64: 128, 128>}]} {
    %c0 = arith.constant 0 : index
    %c0_0 = arith.constant 0 : index
    %0 = vector.load %arg1[%c0, %c0_0] : memref<128x256xbf16, #tpu.memory_space<vmem>>, vector<128x256xbf16>
    %c0_1 = arith.constant 0 : index
    %c0_2 = arith.constant 0 : index
    %1 = vector.load %arg2[%c0_1, %c0_2] : memref<256x128xbf16, #tpu.memory_space<vmem>>, vector<256x128xbf16>
    %cst = arith.constant dense<0.000000e+00> : vector<128x128xf32>
    %2 = tpu.matmul %0, %1, %cst {dimension_numbers = #tpu.dot_dimension_numbers<[1], [0], [0], [1], [0, 0, 1, 1], [], []>} : vector<128x256xbf16>, vector<256x128xbf16>, vector<128x128xf32> -> vector<128x128xf32>
    %c128_i32 = arith.constant 128 : i32
    %3 = arith.muli %arg0, %c128_i32 : i32
    %4 = tpu.assume_multiple %3, 128 : i32
    %5 = arith.index_cast %4 : i32 to index
    %c0_3 = arith.constant 0 : index
    %6 = vector.load %arg5[%5, %c0_3] : memref<128x128xf32, #tpu.memory_space<vmem>>, vector<128x128xf32>
    tpu.vector_store %arg5[%5, %c0_3], %2 {strides = array<i32>} : memref<128x128xf32, #tpu.memory_space<vmem>>, vector<128x128xf32>,
    %cst_4 = arith.constant dense<0.000000e+00> : vector<128xf32>
    %7 = vector.multi_reduction <add>, %2, %cst_4 [0] : vector<128x128xf32> to vector<128xf32>
    %8 = vector.shape_cast %7 : vector<128xf32> to vector<1x128xf32>
    %9 = arith.mulf %2, %2 : vector<128x128xf32>
    %cst_5 = arith.constant dense<0.000000e+00> : vector<128xf32>
    %10 = vector.multi_reduction <add>, %9, %cst_5 [0] : vector<128x128xf32> to vector<128xf32>
    %11 = vector.shape_cast %10 : vector<128xf32> to vector<1x128xf32>
    %c0_i32 = arith.constant 0 : i32
    %12 = arith.cmpi eq, %arg0, %c0_i32 : i32
    %13 = arith.extui %12 : i1 to i32
    %c0_i32_6 = arith.constant 0 : i32
    %14 = arith.cmpi ne, %13, %c0_i32_6 : i32
    scf.if %14 {
      %c0_11 = arith.constant 0 : index
      %c0_12 = arith.constant 0 : index
      %21 = vector.load %arg6[%c0_11, %c0_12] : memref<1x128xf32, #tpu.memory_space<vmem>>, vector<1x128xf32>
      tpu.vector_store %arg6[%c0_11, %c0_12], %8 {strides = array<i32>} : memref<1x128xf32, #tpu.memory_space<vmem>>, vector<1x128xf32>,
      %c0_13 = arith.constant 0 : index
      %c0_14 = arith.constant 0 : index
      %22 = vector.load %arg7[%c0_13, %c0_14] : memref<1x128xf32, #tpu.memory_space<vmem>>, vector<1x128xf32>
      tpu.vector_store %arg7[%c0_13, %c0_14], %11 {strides = array<i32>} : memref<1x128xf32, #tpu.memory_space<vmem>>, vector<1x128xf32>,
    } else {
    }
    %c0_i32_7 = arith.constant 0 : i32
    %15 = arith.cmpi ne, %arg0, %c0_i32_7 : i32
    %16 = arith.extui %15 : i1 to i32
    %c0_i32_8 = arith.constant 0 : i32
    %17 = arith.cmpi ne, %16, %c0_i32_8 : i32
    scf.if %17 {
      %c0_11 = arith.constant 0 : index
      %c0_12 = arith.constant 0 : index
      %21 = vector.load %arg6[%c0_11, %c0_12] : memref<1x128xf32, #tpu.memory_space<vmem>>, vector<1x128xf32>
      %22 = arith.addf %21, %8 : vector<1x128xf32>
      %c0_13 = arith.constant 0 : index
      %c0_14 = arith.constant 0 : index
      %23 = vector.load %arg6[%c0_13, %c0_14] : memref<1x128xf32, #tpu.memory_space<vmem>>, vector<1x128xf32>
      tpu.vector_store %arg6[%c0_13, %c0_14], %22 {strides = array<i32>} : memref<1x128xf32, #tpu.memory_space<vmem>>, vector<1x128xf32>,
      %c0_15 = arith.constant 0 : index
      %c0_16 = arith.constant 0 : index
      %24 = vector.load %arg7[%c0_15, %c0_16] : memref<1x128xf32, #tpu.memory_space<vmem>>, vector<1x128xf32>
      %25 = arith.addf %24, %11 : vector<1x128xf32>
      %c0_17 = arith.constant 0 : index
      %c0_18 = arith.constant 0 : index
      %26 = vector.load %arg7[%c0_17, %c0_18] : memref<1x128xf32, #tpu.memory_space<vmem>>, vector<1x128xf32>
      tpu.vector_store %arg7[%c0_17, %c0_18], %25 {strides = array<i32>} : memref<1x128xf32, #tpu.memory_space<vmem>>, vector<1x128xf32>,
    } else {
    }
    %c0_i32_9 = arith.constant 0 : i32
    %18 = arith.cmpi eq, %arg0, %c0_i32_9 : i32
    %19 = arith.extui %18 : i1 to i32
    %c0_i32_10 = arith.constant 0 : i32
    %20 = arith.cmpi ne, %19, %c0_i32_10 : i32
    scf.if %20 {
      %c0_11 = arith.constant 0 : index
      %c0_12 = arith.constant 0 : index
      %21 = vector.load %arg6[%c0_11, %c0_12] : memref<1x128xf32, #tpu.memory_space<vmem>>, vector<1x128xf32>
      %cst_13 = arith.constant 7.812500e-03 : f32
      %22 = vector.broadcast %cst_13 : f32 to vector<1x128xf32>
      %23 = arith.mulf %21, %22 : vector<1x128xf32>
      %c0_14 = arith.constant 0 : index
      %c0_15 = arith.constant 0 : index
      %24 = vector.load %arg7[%c0_14, %c0_15] : memref<1x128xf32, #tpu.memory_space<vmem>>, vector<1x128xf32>
      %cst_16 = arith.constant 7.812500e-03 : f32
      %25 = vector.broadcast %cst_16 : f32 to vector<1x128xf32>
      %26 = arith.mulf %24, %25 : vector<1x128xf32>
      %27 = arith.mulf %23, %23 : vector<1x128xf32>
      %28 = arith.subf %26, %27 : vector<1x128xf32>
      %cst_17 = arith.constant 0.000000e+00 : f32
      %29 = vector.broadcast %cst_17 : f32 to vector<1x128xf32>
      %30 = arith.maximumf %28, %29 : vector<1x128xf32>
      %c0_18 = arith.constant 0 : index
      %c0_19 = arith.constant 0 : index
      %31 = vector.load %arg3[%c0_18, %c0_19] : memref<1x128xf32, #tpu.memory_space<vmem>>, vector<1x128xf32>
      %cst_20 = arith.constant 9.99999974E-6 : f32
      %32 = vector.broadcast %cst_20 : f32 to vector<1x128xf32>
      %33 = arith.addf %30, %32 : vector<1x128xf32>
      %34 = math.rsqrt %33 : vector<1x128xf32>
      %35 = arith.mulf %31, %34 : vector<1x128xf32>
      %c0_21 = arith.constant 0 : index
      %c0_22 = arith.constant 0 : index
      %36 = vector.load %arg4[%c0_21, %c0_22] : memref<1x128xf32, #tpu.memory_space<vmem>>, vector<1x128xf32>
      %37 = arith.mulf %23, %35 : vector<1x128xf32>
      %38 = arith.subf %36, %37 : vector<1x128xf32>
      %c0_23 = arith.constant 0 : index
      %c0_24 = arith.constant 0 : index
      %39 = vector.load %arg5[%c0_23, %c0_24] : memref<128x128xf32, #tpu.memory_space<vmem>>, vector<128x128xf32>
      %40 = vector.broadcast %35 : vector<1x128xf32> to vector<128x128xf32>
      %41 = arith.mulf %39, %40 : vector<128x128xf32>
      %42 = vector.broadcast %38 : vector<1x128xf32> to vector<128x128xf32>
      %43 = arith.addf %41, %42 : vector<128x128xf32>
      %cst_25 = arith.constant 0.000000e+00 : f32
      %44 = vector.broadcast %cst_25 : f32 to vector<128x128xf32>
      %45 = arith.cmpf oge, %43, %44 : vector<128x128xf32>
      %cst_26 = arith.constant 2.000000e-01 : f32
      %46 = vector.broadcast %cst_26 : f32 to vector<128x128xf32>
      %47 = arith.mulf %46, %43 : vector<128x128xf32>
      %48 = arith.select %45, %43, %47 : vector<128x128xi1>, vector<128x128xf32>
      %c0_27 = arith.constant 0 : index
      %c0_28 = arith.constant 0 : index
      %49 = vector.load %arg5[%c0_27, %c0_28] : memref<128x128xf32, #tpu.memory_space<vmem>>, vector<128x128xf32>
      tpu.vector_store %arg5[%c0_27, %c0_28], %48 {strides = array<i32>} : memref<128x128xf32, #tpu.memory_space<vmem>>, vector<128x128xf32>,
    } else {
    }
    return
  }
  func.func @transform_0(%arg0: i32) -> (i32, i32) {
    %c0_i32 = arith.constant 0 : i32
    %c0_i32_0 = arith.constant 0 : i32
    return %arg0, %c0_i32 : i32, i32
  }
  func.func @transform_1(%arg0: i32) -> (i32, i32) {
    %c0_i32 = arith.constant 0 : i32
    %c0_i32_0 = arith.constant 0 : i32
    %c0_i32_1 = arith.constant 0 : i32
    return %c0_i32, %c0_i32_0 : i32, i32
  }
  func.func @transform_2(%arg0: i32) -> (i32, i32) {
    %c0_i32 = arith.constant 0 : i32
    %c0_i32_0 = arith.constant 0 : i32
    %c0_i32_1 = arith.constant 0 : i32
    return %c0_i32, %c0_i32_0 : i32, i32
  }
  func.func @transform_3(%arg0: i32) -> (i32, i32) {
    %c0_i32 = arith.constant 0 : i32
    %c0_i32_0 = arith.constant 0 : i32
    %c0_i32_1 = arith.constant 0 : i32
    return %c0_i32, %c0_i32_0 : i32, i32
  }
  func.func @transform_4(%arg0: i32) -> (i32, i32) {
    %c0_i32 = arith.constant 0 : i32
    %c0_i32_0 = arith.constant 0 : i32
    %c0_i32_1 = arith.constant 0 : i32
    return %c0_i32, %c0_i32_0 : i32, i32
  }
}

module attributes {stable_mosaic.version = 11 : i64} {
  func.func @_block_fused_kernel(%arg0: i32, %arg1: memref<32x512xbf16, #tpu.memory_space<vmem>>, %arg2: memref<512x128xbf16, #tpu.memory_space<vmem>>, %arg3: memref<1x128xf32, #tpu.memory_space<vmem>>, %arg4: memref<1x128xf32, #tpu.memory_space<vmem>>, %arg5: memref<32x128xf32, #tpu.memory_space<vmem>>, %arg6: memref<1x128xf32, #tpu.memory_space<vmem>>, %arg7: memref<1x128xf32, #tpu.memory_space<vmem>>) attributes {dimension_semantics = [#tpu.dimension_semantics<arbitrary>], iteration_bounds = array<i64: 1>, scalar_prefetch = 0 : i64, scratch_operands = 2 : i64, tpu.core_type = #tpu.core_type<tc>, window_params = [{transform_indices = @transform_0, window_bounds = array<i64: 32, 512>}, {pipeline_mode = #tpu.pipeline_mode<synchronous>, transform_indices = @transform_1, window_bounds = array<i64: 512, 128>}, {pipeline_mode = #tpu.pipeline_mode<synchronous>, transform_indices = @transform_2, window_bounds = array<i64: 1, 128>}, {pipeline_mode = #tpu.pipeline_mode<synchronous>, transform_indices = @transform_3, window_bounds = array<i64: 1, 128>}, {pipeline_mode = #tpu.pipeline_mode<synchronous>, transform_indices = @transform_4, window_bounds = array<i64: 32, 128>}]} {
    %c0 = arith.constant 0 : index
    %c0_0 = arith.constant 0 : index
    %0 = vector.load %arg1[%c0, %c0_0] : memref<32x512xbf16, #tpu.memory_space<vmem>>, vector<32x512xbf16>
    %c0_1 = arith.constant 0 : index
    %c0_2 = arith.constant 0 : index
    %1 = vector.load %arg2[%c0_1, %c0_2] : memref<512x128xbf16, #tpu.memory_space<vmem>>, vector<512x128xbf16>
    %cst = arith.constant dense<0.000000e+00> : vector<32x128xf32>
    %2 = tpu.matmul %0, %1, %cst {dimension_numbers = #tpu.dot_dimension_numbers<[1], [0], [0], [1], [0, 0, 1, 1], [], []>} : vector<32x512xbf16>, vector<512x128xbf16>, vector<32x128xf32> -> vector<32x128xf32>
    %c32_i32 = arith.constant 32 : i32
    %3 = arith.muli %arg0, %c32_i32 : i32
    %4 = tpu.assume_multiple %3, 32 : i32
    %5 = arith.index_cast %4 : i32 to index
    %c0_3 = arith.constant 0 : index
    %6 = vector.load %arg5[%5, %c0_3] : memref<32x128xf32, #tpu.memory_space<vmem>>, vector<32x128xf32>
    tpu.vector_store %arg5[%5, %c0_3], %2 {strides = array<i32>} : memref<32x128xf32, #tpu.memory_space<vmem>>, vector<32x128xf32>,
    %cst_4 = arith.constant dense<0.000000e+00> : vector<128xf32>
    %7 = vector.multi_reduction <add>, %2, %cst_4 [0] : vector<32x128xf32> to vector<128xf32>
    %8 = vector.shape_cast %7 : vector<128xf32> to vector<1x128xf32>
    %9 = arith.mulf %2, %2 : vector<32x128xf32>
    %cst_5 = arith.constant dense<0.000000e+00> : vector<128xf32>
    %10 = vector.multi_reduction <add>, %9, %cst_5 [0] : vector<32x128xf32> to vector<128xf32>
    %11 = vector.shape_cast %10 : vector<128xf32> to vector<1x128xf32>
    %c0_i32 = arith.constant 0 : i32
    %12 = arith.cmpi eq, %arg0, %c0_i32 : i32
    %13 = arith.extui %12 : i1 to i32
    %c0_i32_6 = arith.constant 0 : i32
    %14 = arith.cmpi ne, %13, %c0_i32_6 : i32
    scf.if %14 {
      %c0_11 = arith.constant 0 : index
      %c0_12 = arith.constant 0 : index
      %21 = vector.load %arg6[%c0_11, %c0_12] : memref<1x128xf32, #tpu.memory_space<vmem>>, vector<1x128xf32>
      tpu.vector_store %arg6[%c0_11, %c0_12], %8 {strides = array<i32>} : memref<1x128xf32, #tpu.memory_space<vmem>>, vector<1x128xf32>,
      %c0_13 = arith.constant 0 : index
      %c0_14 = arith.constant 0 : index
      %22 = vector.load %arg7[%c0_13, %c0_14] : memref<1x128xf32, #tpu.memory_space<vmem>>, vector<1x128xf32>
      tpu.vector_store %arg7[%c0_13, %c0_14], %11 {strides = array<i32>} : memref<1x128xf32, #tpu.memory_space<vmem>>, vector<1x128xf32>,
    } else {
    }
    %c0_i32_7 = arith.constant 0 : i32
    %15 = arith.cmpi ne, %arg0, %c0_i32_7 : i32
    %16 = arith.extui %15 : i1 to i32
    %c0_i32_8 = arith.constant 0 : i32
    %17 = arith.cmpi ne, %16, %c0_i32_8 : i32
    scf.if %17 {
      %c0_11 = arith.constant 0 : index
      %c0_12 = arith.constant 0 : index
      %21 = vector.load %arg6[%c0_11, %c0_12] : memref<1x128xf32, #tpu.memory_space<vmem>>, vector<1x128xf32>
      %22 = arith.addf %21, %8 : vector<1x128xf32>
      %c0_13 = arith.constant 0 : index
      %c0_14 = arith.constant 0 : index
      %23 = vector.load %arg6[%c0_13, %c0_14] : memref<1x128xf32, #tpu.memory_space<vmem>>, vector<1x128xf32>
      tpu.vector_store %arg6[%c0_13, %c0_14], %22 {strides = array<i32>} : memref<1x128xf32, #tpu.memory_space<vmem>>, vector<1x128xf32>,
      %c0_15 = arith.constant 0 : index
      %c0_16 = arith.constant 0 : index
      %24 = vector.load %arg7[%c0_15, %c0_16] : memref<1x128xf32, #tpu.memory_space<vmem>>, vector<1x128xf32>
      %25 = arith.addf %24, %11 : vector<1x128xf32>
      %c0_17 = arith.constant 0 : index
      %c0_18 = arith.constant 0 : index
      %26 = vector.load %arg7[%c0_17, %c0_18] : memref<1x128xf32, #tpu.memory_space<vmem>>, vector<1x128xf32>
      tpu.vector_store %arg7[%c0_17, %c0_18], %25 {strides = array<i32>} : memref<1x128xf32, #tpu.memory_space<vmem>>, vector<1x128xf32>,
    } else {
    }
    %c0_i32_9 = arith.constant 0 : i32
    %18 = arith.cmpi eq, %arg0, %c0_i32_9 : i32
    %19 = arith.extui %18 : i1 to i32
    %c0_i32_10 = arith.constant 0 : i32
    %20 = arith.cmpi ne, %19, %c0_i32_10 : i32
    scf.if %20 {
      %c0_11 = arith.constant 0 : index
      %c0_12 = arith.constant 0 : index
      %21 = vector.load %arg6[%c0_11, %c0_12] : memref<1x128xf32, #tpu.memory_space<vmem>>, vector<1x128xf32>
      %cst_13 = arith.constant 3.125000e-02 : f32
      %22 = vector.broadcast %cst_13 : f32 to vector<1x128xf32>
      %23 = arith.mulf %21, %22 : vector<1x128xf32>
      %c0_14 = arith.constant 0 : index
      %c0_15 = arith.constant 0 : index
      %24 = vector.load %arg7[%c0_14, %c0_15] : memref<1x128xf32, #tpu.memory_space<vmem>>, vector<1x128xf32>
      %cst_16 = arith.constant 3.125000e-02 : f32
      %25 = vector.broadcast %cst_16 : f32 to vector<1x128xf32>
      %26 = arith.mulf %24, %25 : vector<1x128xf32>
      %27 = arith.mulf %23, %23 : vector<1x128xf32>
      %28 = arith.subf %26, %27 : vector<1x128xf32>
      %cst_17 = arith.constant 0.000000e+00 : f32
      %29 = vector.broadcast %cst_17 : f32 to vector<1x128xf32>
      %30 = arith.maximumf %28, %29 : vector<1x128xf32>
      %c0_18 = arith.constant 0 : index
      %c0_19 = arith.constant 0 : index
      %31 = vector.load %arg3[%c0_18, %c0_19] : memref<1x128xf32, #tpu.memory_space<vmem>>, vector<1x128xf32>
      %cst_20 = arith.constant 9.99999974E-6 : f32
      %32 = vector.broadcast %cst_20 : f32 to vector<1x128xf32>
      %33 = arith.addf %30, %32 : vector<1x128xf32>
      %34 = math.rsqrt %33 : vector<1x128xf32>
      %35 = arith.mulf %31, %34 : vector<1x128xf32>
      %c0_21 = arith.constant 0 : index
      %c0_22 = arith.constant 0 : index
      %36 = vector.load %arg4[%c0_21, %c0_22] : memref<1x128xf32, #tpu.memory_space<vmem>>, vector<1x128xf32>
      %37 = arith.mulf %23, %35 : vector<1x128xf32>
      %38 = arith.subf %36, %37 : vector<1x128xf32>
      %c0_23 = arith.constant 0 : index
      %c0_24 = arith.constant 0 : index
      %39 = vector.load %arg5[%c0_23, %c0_24] : memref<32x128xf32, #tpu.memory_space<vmem>>, vector<32x128xf32>
      %40 = vector.broadcast %35 : vector<1x128xf32> to vector<32x128xf32>
      %41 = arith.mulf %39, %40 : vector<32x128xf32>
      %42 = vector.broadcast %38 : vector<1x128xf32> to vector<32x128xf32>
      %43 = arith.addf %41, %42 : vector<32x128xf32>
      %cst_25 = arith.constant 0.000000e+00 : f32
      %44 = vector.broadcast %cst_25 : f32 to vector<32x128xf32>
      %45 = arith.cmpf oge, %43, %44 : vector<32x128xf32>
      %cst_26 = arith.constant 2.000000e-01 : f32
      %46 = vector.broadcast %cst_26 : f32 to vector<32x128xf32>
      %47 = arith.mulf %46, %43 : vector<32x128xf32>
      %48 = arith.select %45, %43, %47 : vector<32x128xi1>, vector<32x128xf32>
      %c0_27 = arith.constant 0 : index
      %c0_28 = arith.constant 0 : index
      %49 = vector.load %arg5[%c0_27, %c0_28] : memref<32x128xf32, #tpu.memory_space<vmem>>, vector<32x128xf32>
      tpu.vector_store %arg5[%c0_27, %c0_28], %48 {strides = array<i32>} : memref<32x128xf32, #tpu.memory_space<vmem>>, vector<32x128xf32>,
    } else {
    }
    return
  }
  func.func @transform_0(%arg0: i32) -> (i32, i32) {
    %c0_i32 = arith.constant 0 : i32
    %c0_i32_0 = arith.constant 0 : i32
    return %arg0, %c0_i32 : i32, i32
  }
  func.func @transform_1(%arg0: i32) -> (i32, i32) {
    %c0_i32 = arith.constant 0 : i32
    %c0_i32_0 = arith.constant 0 : i32
    %c0_i32_1 = arith.constant 0 : i32
    return %c0_i32, %c0_i32_0 : i32, i32
  }
  func.func @transform_2(%arg0: i32) -> (i32, i32) {
    %c0_i32 = arith.constant 0 : i32
    %c0_i32_0 = arith.constant 0 : i32
    %c0_i32_1 = arith.constant 0 : i32
    return %c0_i32, %c0_i32_0 : i32, i32
  }
  func.func @transform_3(%arg0: i32) -> (i32, i32) {
    %c0_i32 = arith.constant 0 : i32
    %c0_i32_0 = arith.constant 0 : i32
    %c0_i32_1 = arith.constant 0 : i32
    return %c0_i32, %c0_i32_0 : i32, i32
  }
  func.func @transform_4(%arg0: i32) -> (i32, i32) {
    %c0_i32 = arith.constant 0 : i32
    %c0_i32_0 = arith.constant 0 : i32
    %c0_i32_1 = arith.constant 0 : i32
    return %c0_i32, %c0_i32_0 : i32, i32
  }
}

</mosaic_0001>

<bundles_post_ra>
// kernel: critic_forward.4
= control target key start
LH: loop header
LB: loop body
LE: loop exit
PB: predicated region body
PF: predicated region fallthrough
CT: control target
= control target key end

     0   :  { %s1251_s12 = smov 0   ;;  %s1465_s0 = inlined_call_operand.vmem [shape: bf16[2048,128], index: 0, kind: input, shape index: {}]   ;;  %s1466_s1 = inlined_call_operand.vmem [shape: bf16[128,128], index: 1, kind: input, shape index: {}]   ;;  %s1467_s2 = inlined_call_operand.vmem [shape: f32[1,128], index: 2, kind: input, shape index: {}]   ;;  %s1468_s3 = inlined_call_operand.vmem [shape: f32[2048,128], index: 3, kind: output, shape index: {}]  }
   0x1 LB: > { %s979_s13 = sadd.s32 4294967295, %s1229_s12   ;;  %p983_p0 = scmp.ge.s32.totalorder %s1229_s12, 1  ;;  %s1229_s12 = sphi %s1251_s12, %s13_s12  }
   0x2   : > { %p138_p1 = scmp.lt.s32.totalorder %s1229_s12, 5 }
   0x4   : > { %p139_p2 = pnand %p983_p0, %p138_p1 }
   0x5   : > { %s984_s22 = sshll.u32 (!%p139_p2), %s979_s13, 6 }
   0x6   : > { %142 = sbr.rel (%p139_p2) target bundleno = 303 (0x12f), region = 32  ;;  %p163_p3 = scmp.lt.s32.totalorder (!%p139_p2), %s984_s22, 255 }
   0xb   : > { %v1189_v0 = vld [vmem:[%s1466_s1 + $0x38] sm:$0xff]  ;;  %v1188_v1 = vld [vmem:[%s1466_s1 + $0x30] sm:$0xff]  ;;  %v1187_v2 = vld [vmem:[%s1466_s1 + $0x28] sm:$0xff]  ;;  %s1470_s22 = smov (!%p163_p3, %s984_s22), 255 }
   0xc   : > { %498 = vmatpush.bf16.msra.mxu0 %v1189_v0  ;;  %1190 = vmatpush.bf16.msra.mxu1 %v1189_v0  ;;  %v1186_v3 = vld [vmem:[%s1466_s1 + $0x20] sm:$0xff]  ;;  %v1185_v4 = vld [vmem:[%s1466_s1 + $0x18] sm:$0xff]  ;;  %v1184_v5 = vld [vmem:[%s1466_s1 + $0x10] sm:$0xff]  ;;  %s985_s29 = sshll.u32 %s1470_s22, 2  ;;  %s987_s10 = sshll.u32 %s1470_s22, 3 }
   0xd   : > { %1191 = vmatpush.bf16.msra.mxu2 %v1189_v0  ;;  %1192 = vmatpush.bf16.msra.mxu3 %v1189_v0  ;;  %v1183_v6 = vld [vmem:[%s1466_s1 + $0x8] sm:$0xff]  ;;  %v1182_v7 = vld [vmem:[%s1466_s1] sm:$0xff]  ;;  %s1289_s7 = scalar_lea.vmem %s1465_s0, %s985_s29  ;;  %s1334_s14 = scalar_lea.vmem %s1468_s3, %s987_s10 }
   0xe   : > { %v1150_v8 = vld [vmem:[%s1289_s7] sm:$0xff]  ;;  %v1151_v12 = vld [vmem:[%s1289_s7 + $0x8] sm:$0xff]  ;;  %v1152_v16 = vld [vmem:[%s1289_s7 + $0x10] sm:$0xff] }
   0xf   : > { %v1158_v9 = vld [vmem:[%s1289_s7 + $0x40] sm:$0xff]  ;;  %v1159_v13 = vld [vmem:[%s1289_s7 + $0x48] sm:$0xff]  ;;  %v1160_v17 = vld [vmem:[%s1289_s7 + $0x50] sm:$0xff] }
  0x10   : > { %499 = vmatpush.bf16.msra.mxu0 %v1188_v1  ;;  %1193 = vmatpush.bf16.msra.mxu1 %v1188_v1  ;;  %v1166_v10 = vld [vmem:[%s1289_s7 + $0x80] sm:$0xff]  ;;  %v1167_v14 = vld [vmem:[%s1289_s7 + $0x88] sm:$0xff]  ;;  %v1168_v18 = vld [vmem:[%s1289_s7 + $0x90] sm:$0xff] }
  0x11   : > { %1194 = vmatpush.bf16.msra.mxu2 %v1188_v1  ;;  %1195 = vmatpush.bf16.msra.mxu3 %v1188_v1  ;;  %v1174_v11 = vld [vmem:[%s1289_s7 + $0xc0] sm:$0xff]  ;;  %v1175_v15 = vld [vmem:[%s1289_s7 + $0xc8] sm:$0xff]  ;;  %v1176_v19 = vld [vmem:[%s1289_s7 + $0xd0] sm:$0xff] }
  0x12   : > { %v1153_v20 = vld [vmem:[%s1289_s7 + $0x18] sm:$0xff]  ;;  %v1154_v24 = vld [vmem:[%s1289_s7 + $0x20] sm:$0xff]  ;;  %v1155_v28 = vld [vmem:[%s1289_s7 + $0x28] sm:$0xff] }
  0x13   : > { %v1161_v21 = vld [vmem:[%s1289_s7 + $0x58] sm:$0xff]  ;;  %v1162_v25 = vld [vmem:[%s1289_s7 + $0x60] sm:$0xff]  ;;  %v1163_v29 = vld [vmem:[%s1289_s7 + $0x68] sm:$0xff] }
  0x14   : > { %500 = vmatpush.bf16.msra.mxu0 %v1187_v2  ;;  %1196 = vmatpush.bf16.msra.mxu1 %v1187_v2  ;;  %v1169_v22 = vld [vmem:[%s1289_s7 + $0x98] sm:$0xff]  ;;  %v1170_v26 = vld [vmem:[%s1289_s7 + $0xa0] sm:$0xff]  ;;  %v1171_v30 = vld [vmem:[%s1289_s7 + $0xa8] sm:$0xff] }
  0x15   : > { %1197 = vmatpush.bf16.msra.mxu2 %v1187_v2  ;;  %1198 = vmatpush.bf16.msra.mxu3 %v1187_v2  ;;  %v1177_v23 = vld [vmem:[%s1289_s7 + $0xd8] sm:$0xff]  ;;  %v1178_v27 = vld [vmem:[%s1289_s7 + $0xe0] sm:$0xff]  ;;  %v1179_v31 = vld [vmem:[%s1289_s7 + $0xe8] sm:$0xff] }
  0x16   : > { %v1156_v32 = vld [vmem:[%s1289_s7 + $0x30] sm:$0xff]  ;;  %v1157_v36 = vld [vmem:[%s1289_s7 + $0x38] sm:$0xff]  ;;  %v1326_v40 = vld [vmem:[%s1467_s2] ss:$0 sm:$0xff] }
  0x17   : > { %v1164_v33 = vld [vmem:[%s1289_s7 + $0x70] sm:$0xff]  ;;  %v1165_v37 = vld [vmem:[%s1289_s7 + $0x78] sm:$0xff] }
  0x18   : > { %501 = vmatpush.bf16.msra.mxu0 %v1186_v3  ;;  %1199 = vmatpush.bf16.msra.mxu1 %v1186_v3  ;;  %v1172_v34 = vld [vmem:[%s1289_s7 + $0xb0] sm:$0xff]  ;;  %v1173_v38 = vld [vmem:[%s1289_s7 + $0xb8] sm:$0xff] }
  0x19   : > { %1200 = vmatpush.bf16.msra.mxu2 %v1186_v3  ;;  %1201 = vmatpush.bf16.msra.mxu3 %v1186_v3  ;;  %v1180_v35 = vld [vmem:[%s1289_s7 + $0xf0] sm:$0xff]  ;;  %v1181_v39 = vld [vmem:[%s1289_s7 + $0xf8] sm:$0xff] }
  0x1c   : > { %502 = vmatpush.bf16.msra.mxu0 %v1185_v4  ;;  %1202 = vmatpush.bf16.msra.mxu1 %v1185_v4 }
  0x1d   : > { %1203 = vmatpush.bf16.msra.mxu2 %v1185_v4  ;;  %1204 = vmatpush.bf16.msra.mxu3 %v1185_v4 }
  0x20   : > { %503 = vmatpush.bf16.msra.mxu0 %v1184_v5  ;;  %1205 = vmatpush.bf16.msra.mxu1 %v1184_v5 }
  0x21   : > { %1206 = vmatpush.bf16.msra.mxu2 %v1184_v5  ;;  %1207 = vmatpush.bf16.msra.mxu3 %v1184_v5 }
  0x24   : > { %504 = vmatpush.bf16.msra.mxu0 %v1183_v6  ;;  %1208 = vmatpush.bf16.msra.mxu1 %v1183_v6 }
  0x25   : > { %1209 = vmatpush.bf16.msra.mxu2 %v1183_v6  ;;  %1210 = vmatpush.bf16.msra.mxu3 %v1183_v6 }
  0x28   : > { %505 = vmatpush.bf16.msra.mxu0 %v1182_v7  ;;  %1211 = vmatpush.bf16.msra.mxu1 %v1182_v7 }
  0x29   : > { %1212 = vmatpush.bf16.msra.mxu2 %v1182_v7  ;;  %1213 = vmatpush.bf16.msra.mxu3 %v1182_v7 }
  0x2b   : > { %506 = vmatmul.bf16.vlgmr.msra.gmra.mxu0 %v1150_v8  ;;  %546 = vmatmul.bf16.vlgmr.msra.gmra.mxu1 %v1158_v9 }
  0x2c   : > { %586 = vmatmul.bf16.vlgmr.msra.gmra.mxu2 %v1166_v10  ;;  %626 = vmatmul.bf16.vlgmr.msra.gmra.mxu3 %v1174_v11 }
  0x3b   : > { %511 = vmatmul.bf16.gmra.mxu0 %v1151_v12  ;;  %551 = vmatmul.bf16.gmra.mxu1 %v1159_v13 }
  0x3c   : > { %591 = vmatmul.bf16.gmra.mxu2 %v1167_v14  ;;  %631 = vmatmul.bf16.gmra.mxu3 %v1175_v15 }
  0x4b   : > { %516 = vmatmul.bf16.gmra.mxu0 %v1152_v16  ;;  %556 = vmatmul.bf16.gmra.mxu1 %v1160_v17 }
  0x4c   : > { %596 = vmatmul.bf16.gmra.mxu2 %v1168_v18  ;;  %636 = vmatmul.bf16.gmra.mxu3 %v1176_v19 }
  0x5b   : > { %521 = vmatmul.bf16.gmra.mxu0 %v1153_v20  ;;  %561 = vmatmul.bf16.gmra.mxu1 %v1161_v21 }
  0x5c   : > { %601 = vmatmul.bf16.gmra.mxu2 %v1169_v22  ;;  %641 = vmatmul.bf16.gmra.mxu3 %v1177_v23 }
  0x6b   : > { %526 = vmatmul.bf16.gmra.mxu0 %v1154_v24  ;;  %566 = vmatmul.bf16.gmra.mxu1 %v1162_v25 }
  0x6c   : > { %606 = vmatmul.bf16.gmra.mxu2 %v1170_v26  ;;  %646 = vmatmul.bf16.gmra.mxu3 %v1178_v27 }
  0x7b   : > { %531 = vmatmul.bf16.gmra.mxu0 %v1155_v28  ;;  %571 = vmatmul.bf16.gmra.mxu1 %v1163_v29 }
  0x7c   : > { %611 = vmatmul.bf16.gmra.mxu2 %v1171_v30  ;;  %651 = vmatmul.bf16.gmra.mxu3 %v1179_v31 }
  0x8b   : > { %536 = vmatmul.bf16.gmra.mxu0 %v1156_v32  ;;  %576 = vmatmul.bf16.gmra.mxu1 %v1164_v33 }
  0x8c   : > { %616 = vmatmul.bf16.gmra.mxu2 %v1172_v34  ;;  %656 = vmatmul.bf16.gmra.mxu3 %v1180_v35 }
  0x9b   : > { %541 = vmatmul.bf16.gmra.mxu0 %v1157_v36  ;;  %581 = vmatmul.bf16.gmra.mxu1 %v1165_v37 }
  0x9c   : > { %621 = vmatmul.bf16.gmra.mxu2 %v1173_v38  ;;  %661 = vmatmul.bf16.gmra.mxu3 %v1181_v39 }
  0xa8   : > { %v507_v41 = vpop.f32.mrf.mxu0  ;;  %v547_v42 = vpop.f32.mrf.mxu1 }
  0xa9   : > { %v508_v43 = vadd.f32 %v1326_v40, %v507_v41  ;;  %v548_v44 = vadd.f32 %v1326_v40, %v547_v42 }
  0xab   : > { %vm667_vm0 = vcmp.ge.f32.partialorder %v508_v43, 0.0  ;;  %v731_v45 = vmul.f32 0.2, %v508_v43  ;;  %vm683_vm1 = vcmp.ge.f32.partialorder %v548_v44, 0.0  ;;  %v747_v46 = vmul.f32 0.2, %v548_v44 }
  0xad   : > { %v795_v47 = vsel %vm667_vm0, %v508_v43, %v731_v45  ;;  %v811_v48 = vsel %vm683_vm1, %v548_v44, %v747_v46 }
  0xae   : > { %859 = vst [vmem:[%s1334_s14] sm:$0xff] %v795_v47 }
  0xaf   : > { %875 = vst [vmem:[%s1334_s14 + $0x80] sm:$0xff] %v811_v48  ;;  %v587_v49 = vpop.f32.mrf.mxu2  ;;  %v627_v50 = vpop.f32.mrf.mxu3 }
  0xb0   : > { %v588_v51 = vadd.f32 %v1326_v40, %v587_v49  ;;  %v628_v52 = vadd.f32 %v1326_v40, %v627_v50  ;;  %v509_v53 = vpop.f32.mrf.mxu0  ;;  %v549_v54 = vpop.f32.mrf.mxu1 }
  0xb1   : > { %v510_v55 = vadd.f32 %v1326_v40, %v509_v53  ;;  %v550_v56 = vadd.f32 %v1326_v40, %v549_v54 }
  0xb2   : > { %vm699_vm2 = vcmp.ge.f32.partialorder %v588_v51, 0.0  ;;  %v763_v57 = vmul.f32 0.2, %v588_v51  ;;  %vm715_vm3 = vcmp.ge.f32.partialorder %v628_v52, 0.0  ;;  %v779_v58 = vmul.f32 0.2, %v628_v52 }
  0xb3   : > { %vm668_vm4 = vcmp.ge.f32.partialorder %v510_v55, 0.0  ;;  %v732_v59 = vmul.f32 0.2, %v510_v55  ;;  %vm684_vm5 = vcmp.ge.f32.partialorder %v550_v56, 0.0  ;;  %v748_v60 = vmul.f32 0.2, %v550_v56 }
  0xb4   : > { %v827_v61 = vsel %vm699_vm2, %v588_v51, %v763_v57  ;;  %v843_v62 = vsel %vm715_vm3, %v628_v52, %v779_v58 }
  0xb5   : > { %891 = vst [vmem:[%s1334_s14 + $0x100] sm:$0xff] %v827_v61  ;;  %v796_v63 = vsel %vm668_vm4, %v510_v55, %v732_v59  ;;  %v812_v0 = vsel %vm684_vm5, %v550_v56, %v748_v60 }
  0xb6   : > { %907 = vst [vmem:[%s1334_s14 + $0x180] sm:$0xff] %v843_v62 }
  0xb7   : > { %860 = vst [vmem:[%s1334_s14 + $0x8] sm:$0xff] %v796_v63  ;;  %v589_v1 = vpop.f32.mrf.mxu2  ;;  %v629_v2 = vpop.f32.mrf.mxu3 }
  0xb8   : > { %876 = vst [vmem:[%s1334_s14 + $0x88] sm:$0xff] %v812_v0  ;;  %v590_v3 = vadd.f32 %v1326_v40, %v589_v1  ;;  %v630_v4 = vadd.f32 %v1326_v40, %v629_v2  ;;  %v512_v5 = vpop.f32.mrf.mxu0  ;;  %v552_v6 = vpop.f32.mrf.mxu1 }
  0xb9   : > { %v513_v7 = vadd.f32 %v1326_v40, %v512_v5  ;;  %v553_v8 = vadd.f32 %v1326_v40, %v552_v6 }
  0xba   : > { %vm700_vm6 = vcmp.ge.f32.partialorder %v590_v3, 0.0  ;;  %v764_v9 = vmul.f32 0.2, %v590_v3  ;;  %vm716_vm7 = vcmp.ge.f32.partialorder %v630_v4, 0.0  ;;  %v780_v10 = vmul.f32 0.2, %v630_v4 }
  0xbb   : > { %vm669_vm8 = vcmp.ge.f32.partialorder %v513_v7, 0.0  ;;  %v733_v11 = vmul.f32 0.2, %v513_v7  ;;  %vm685_vm9 = vcmp.ge.f32.partialorder %v553_v8, 0.0  ;;  %v749_v12 = vmul.f32 0.2, %v553_v8 }
  0xbc   : > { %v828_v13 = vsel %vm700_vm6, %v590_v3, %v764_v9  ;;  %v844_v14 = vsel %vm716_vm7, %v630_v4, %v780_v10 }
  0xbd   : > { %892 = vst [vmem:[%s1334_s14 + $0x108] sm:$0xff] %v828_v13  ;;  %v797_v15 = vsel %vm669_vm8, %v513_v7, %v733_v11  ;;  %v813_v16 = vsel %vm685_vm9, %v553_v8, %v749_v12 }
  0xbe   : > { %908 = vst [vmem:[%s1334_s14 + $0x188] sm:$0xff] %v844_v14 }
  0xbf   : > { %861 = vst [vmem:[%s1334_s14 + $0x10] sm:$0xff] %v797_v15  ;;  %v592_v17 = vpop.f32.mrf.mxu2  ;;  %v632_v18 = vpop.f32.mrf.mxu3 }
  0xc0   : > { %877 = vst [vmem:[%s1334_s14 + $0x90] sm:$0xff] %v813_v16  ;;  %v593_v19 = vadd.f32 %v1326_v40, %v592_v17  ;;  %v633_v20 = vadd.f32 %v1326_v40, %v632_v18  ;;  %v514_v21 = vpop.f32.mrf.mxu0  ;;  %v554_v22 = vpop.f32.mrf.mxu1 }
  0xc1   : > { %v515_v23 = vadd.f32 %v1326_v40, %v514_v21  ;;  %v555_v24 = vadd.f32 %v1326_v40, %v554_v22 }
  0xc2   : > { %vm701_vm10 = vcmp.ge.f32.partialorder %v593_v19, 0.0  ;;  %v765_v25 = vmul.f32 0.2, %v593_v19  ;;  %vm717_vm11 = vcmp.ge.f32.partialorder %v633_v20, 0.0  ;;  %v781_v26 = vmul.f32 0.2, %v633_v20 }
  0xc3   : > { %vm670_vm12 = vcmp.ge.f32.partialorder %v515_v23, 0.0  ;;  %v734_v27 = vmul.f32 0.2, %v515_v23  ;;  %vm686_vm13 = vcmp.ge.f32.partialorder %v555_v24, 0.0  ;;  %v750_v28 = vmul.f32 0.2, %v555_v24 }
  0xc4   : > { %v829_v29 = vsel %vm701_vm10, %v593_v19, %v765_v25  ;;  %v845_v30 = vsel %vm717_vm11, %v633_v20, %v781_v26 }
  0xc5   : > { %893 = vst [vmem:[%s1334_s14 + $0x110] sm:$0xff] %v829_v29  ;;  %v798_v31 = vsel %vm670_vm12, %v515_v23, %v734_v27  ;;  %v814_v32 = vsel %vm686_vm13, %v555_v24, %v750_v28 }
  0xc6   : > { %909 = vst [vmem:[%s1334_s14 + $0x190] sm:$0xff] %v845_v30 }
  0xc7   : > { %862 = vst [vmem:[%s1334_s14 + $0x18] sm:$0xff] %v798_v31  ;;  %v594_v33 = vpop.f32.mrf.mxu2  ;;  %v634_v34 = vpop.f32.mrf.mxu3 }
  0xc8   : > { %878 = vst [vmem:[%s1334_s14 + $0x98] sm:$0xff] %v814_v32  ;;  %v595_v35 = vadd.f32 %v1326_v40, %v594_v33  ;;  %v635_v36 = vadd.f32 %v1326_v40, %v634_v34  ;;  %v517_v37 = vpop.f32.mrf.mxu0  ;;  %v557_v38 = vpop.f32.mrf.mxu1 }
  0xc9   : > { %v518_v39 = vadd.f32 %v1326_v40, %v517_v37  ;;  %v558_v41 = vadd.f32 %v1326_v40, %v557_v38 }
  0xca   : > { %vm702_vm14 = vcmp.ge.f32.partialorder %v595_v35, 0.0  ;;  %v766_v42 = vmul.f32 0.2, %v595_v35  ;;  %vm718_vm15 = vcmp.ge.f32.partialorder %v635_v36, 0.0  ;;  %v782_v43 = vmul.f32 0.2, %v635_v36 }
  0xcb   : > { %vm671_vm0 = vcmp.ge.f32.partialorder %v518_v39, 0.0  ;;  %v735_v44 = vmul.f32 0.2, %v518_v39  ;;  %vm687_vm1 = vcmp.ge.f32.partialorder %v558_v41, 0.0  ;;  %v751_v45 = vmul.f32 0.2, %v558_v41 }
  0xcc   : > { %v830_v46 = vsel %vm702_vm14, %v595_v35, %v766_v42  ;;  %v846_v47 = vsel %vm718_vm15, %v635_v36, %v782_v43 }
  0xcd   : > { %894 = vst [vmem:[%s1334_s14 + $0x118] sm:$0xff] %v830_v46  ;;  %v799_v48 = vsel %vm671_vm0, %v518_v39, %v735_v44  ;;  %v815_v49 = vsel %vm687_vm1, %v558_v41, %v751_v45 }
  0xce   : > { %910 = vst [vmem:[%s1334_s14 + $0x198] sm:$0xff] %v846_v47 }
  0xcf   : > { %863 = vst [vmem:[%s1334_s14 + $0x20] sm:$0xff] %v799_v48  ;;  %v597_v50 = vpop.f32.mrf.mxu2  ;;  %v637_v51 = vpop.f32.mrf.mxu3 }
  0xd0   : > { %879 = vst [vmem:[%s1334_s14 + $0xa0] sm:$0xff] %v815_v49  ;;  %v598_v52 = vadd.f32 %v1326_v40, %v597_v50  ;;  %v638_v53 = vadd.f32 %v1326_v40, %v637_v51  ;;  %v519_v54 = vpop.f32.mrf.mxu0  ;;  %v559_v55 = vpop.f32.mrf.mxu1 }
  0xd1   : > { %v520_v56 = vadd.f32 %v1326_v40, %v519_v54  ;;  %v560_v57 = vadd.f32 %v1326_v40, %v559_v55 }
  0xd2   : > { %vm703_vm2 = vcmp.ge.f32.partialorder %v598_v52, 0.0  ;;  %v767_v58 = vmul.f32 0.2, %v598_v52  ;;  %vm719_vm3 = vcmp.ge.f32.partialorder %v638_v53, 0.0  ;;  %v783_v59 = vmul.f32 0.2, %v638_v53 }
  0xd3   : > { %vm672_vm4 = vcmp.ge.f32.partialorder %v520_v56, 0.0  ;;  %v736_v60 = vmul.f32 0.2, %v520_v56  ;;  %vm688_vm5 = vcmp.ge.f32.partialorder %v560_v57, 0.0  ;;  %v752_v61 = vmul.f32 0.2, %v560_v57 }
  0xd4   : > { %v831_v62 = vsel %vm703_vm2, %v598_v52, %v767_v58  ;;  %v847_v63 = vsel %vm719_vm3, %v638_v53, %v783_v59 }
  0xd5   : > { %895 = vst [vmem:[%s1334_s14 + $0x120] sm:$0xff] %v831_v62  ;;  %v800_v0 = vsel %vm672_vm4, %v520_v56, %v736_v60  ;;  %v816_v1 = vsel %vm688_vm5, %v560_v57, %v752_v61 }
  0xd6   : > { %911 = vst [vmem:[%s1334_s14 + $0x1a0] sm:$0xff] %v847_v63 }
  0xd7   : > { %864 = vst [vmem:[%s1334_s14 + $0x28] sm:$0xff] %v800_v0  ;;  %v599_v2 = vpop.f32.mrf.mxu2  ;;  %v639_v3 = vpop.f32.mrf.mxu3 }
  0xd8   : > { %880 = vst [vmem:[%s1334_s14 + $0xa8] sm:$0xff] %v816_v1  ;;  %v600_v4 = vadd.f32 %v1326_v40, %v599_v2  ;;  %v640_v5 = vadd.f32 %v1326_v40, %v639_v3  ;;  %v522_v6 = vpop.f32.mrf.mxu0  ;;  %v562_v7 = vpop.f32.mrf.mxu1 }
  0xd9   : > { %v523_v8 = vadd.f32 %v1326_v40, %v522_v6  ;;  %v563_v9 = vadd.f32 %v1326_v40, %v562_v7 }
  0xda   : > { %vm704_vm6 = vcmp.ge.f32.partialorder %v600_v4, 0.0  ;;  %v768_v10 = vmul.f32 0.2, %v600_v4  ;;  %vm720_vm7 = vcmp.ge.f32.partialorder %v640_v5, 0.0  ;;  %v784_v11 = vmul.f32 0.2, %v640_v5 }
  0xdb   : > { %vm673_vm8 = vcmp.ge.f32.partialorder %v523_v8, 0.0  ;;  %v737_v12 = vmul.f32 0.2, %v523_v8  ;;  %vm689_vm9 = vcmp.ge.f32.partialorder %v563_v9, 0.0  ;;  %v753_v13 = vmul.f32 0.2, %v563_v9 }
  0xdc   : > { %v832_v14 = vsel %vm704_vm6, %v600_v4, %v768_v10  ;;  %v848_v15 = vsel %vm720_vm7, %v640_v5, %v784_v11 }
  0xdd   : > { %896 = vst [vmem:[%s1334_s14 + $0x128] sm:$0xff] %v832_v14  ;;  %v801_v16 = vsel %vm673_vm8, %v523_v8, %v737_v12  ;;  %v817_v17 = vsel %vm689_vm9, %v563_v9, %v753_v13 }
  0xde   : > { %912 = vst [vmem:[%s1334_s14 + $0x1a8] sm:$0xff] %v848_v15 }
  0xdf   : > { %865 = vst [vmem:[%s1334_s14 + $0x30] sm:$0xff] %v801_v16  ;;  %v602_v18 = vpop.f32.mrf.mxu2  ;;  %v642_v19 = vpop.f32.mrf.mxu3 }
  0xe0   : > { %881 = vst [vmem:[%s1334_s14 + $0xb0] sm:$0xff] %v817_v17  ;;  %v603_v20 = vadd.f32 %v1326_v40, %v602_v18  ;;  %v643_v21 = vadd.f32 %v1326_v40, %v642_v19  ;;  %v524_v22 = vpop.f32.mrf.mxu0  ;;  %v564_v23 = vpop.f32.mrf.mxu1 }
  0xe1   : > { %v525_v24 = vadd.f32 %v1326_v40, %v524_v22  ;;  %v565_v25 = vadd.f32 %v1326_v40, %v564_v23 }
  0xe2   : > { %vm705_vm10 = vcmp.ge.f32.partialorder %v603_v20, 0.0  ;;  %v769_v26 = vmul.f32 0.2, %v603_v20  ;;  %vm721_vm11 = vcmp.ge.f32.partialorder %v643_v21, 0.0  ;;  %v785_v27 = vmul.f32 0.2, %v643_v21 }
  0xe3   : > { %vm674_vm12 = vcmp.ge.f32.partialorder %v525_v24, 0.0  ;;  %v738_v28 = vmul.f32 0.2, %v525_v24  ;;  %vm690_vm13 = vcmp.ge.f32.partialorder %v565_v25, 0.0  ;;  %v754_v29 = vmul.f32 0.2, %v565_v25 }
  0xe4   : > { %v833_v30 = vsel %vm705_vm10, %v603_v20, %v769_v26  ;;  %v849_v31 = vsel %vm721_vm11, %v643_v21, %v785_v27 }
  0xe5   : > { %897 = vst [vmem:[%s1334_s14 + $0x130] sm:$0xff] %v833_v30  ;;  %v802_v32 = vsel %vm674_vm12, %v525_v24, %v738_v28  ;;  %v818_v33 = vsel %vm690_vm13, %v565_v25, %v754_v29 }
  0xe6   : > { %913 = vst [vmem:[%s1334_s14 + $0x1b0] sm:$0xff] %v849_v31 }
  0xe7   : > { %866 = vst [vmem:[%s1334_s14 + $0x38] sm:$0xff] %v802_v32  ;;  %v604_v34 = vpop.f32.mrf.mxu2  ;;  %v644_v35 = vpop.f32.mrf.mxu3 }
  0xe8   : > { %882 = vst [vmem:[%s1334_s14 + $0xb8] sm:$0xff] %v818_v33  ;;  %v605_v36 = vadd.f32 %v1326_v40, %v604_v34  ;;  %v645_v37 = vadd.f32 %v1326_v40, %v644_v35  ;;  %v527_v38 = vpop.f32.mrf.mxu0  ;;  %v567_v39 = vpop.f32.mrf.mxu1 }
  0xe9   : > { %v528_v41 = vadd.f32 %v1326_v40, %v527_v38  ;;  %v568_v42 = vadd.f32 %v1326_v40, %v567_v39 }
  0xea   : > { %vm706_vm14 = vcmp.ge.f32.partialorder %v605_v36, 0.0  ;;  %v770_v43 = vmul.f32 0.2, %v605_v36  ;;  %vm722_vm15 = vcmp.ge.f32.partialorder %v645_v37, 0.0  ;;  %v786_v44 = vmul.f32 0.2, %v645_v37 }
  0xeb   : > { %vm675_vm0 = vcmp.ge.f32.partialorder %v528_v41, 0.0  ;;  %v739_v45 = vmul.f32 0.2, %v528_v41  ;;  %vm691_vm1 = vcmp.ge.f32.partialorder %v568_v42, 0.0  ;;  %v755_v46 = vmul.f32 0.2, %v568_v42 }
  0xec   : > { %v834_v47 = vsel %vm706_vm14, %v605_v36, %v770_v43  ;;  %v850_v48 = vsel %vm722_vm15, %v645_v37, %v786_v44 }
  0xed   : > { %898 = vst [vmem:[%s1334_s14 + $0x138] sm:$0xff] %v834_v47  ;;  %v803_v49 = vsel %vm675_vm0, %v528_v41, %v739_v45  ;;  %v819_v50 = vsel %vm691_vm1, %v568_v42, %v755_v46 }
  0xee   : > { %914 = vst [vmem:[%s1334_s14 + $0x1b8] sm:$0xff] %v850_v48 }
  0xef   : > { %867 = vst [vmem:[%s1334_s14 + $0x40] sm:$0xff] %v803_v49  ;;  %v607_v51 = vpop.f32.mrf.mxu2  ;;  %v647_v52 = vpop.f32.mrf.mxu3 }
  0xf0   : > { %883 = vst [vmem:[%s1334_s14 + $0xc0] sm:$0xff] %v819_v50  ;;  %v608_v53 = vadd.f32 %v1326_v40, %v607_v51  ;;  %v648_v54 = vadd.f32 %v1326_v40, %v647_v52  ;;  %v529_v55 = vpop.f32.mrf.mxu0  ;;  %v569_v56 = vpop.f32.mrf.mxu1 }
  0xf1   : > { %v530_v57 = vadd.f32 %v1326_v40, %v529_v55  ;;  %v570_v58 = vadd.f32 %v1326_v40, %v569_v56 }
  0xf2   : > { %vm707_vm2 = vcmp.ge.f32.partialorder %v608_v53, 0.0  ;;  %v771_v59 = vmul.f32 0.2, %v608_v53  ;;  %vm723_vm3 = vcmp.ge.f32.partialorder %v648_v54, 0.0  ;;  %v787_v60 = vmul.f32 0.2, %v648_v54 }
  0xf3   : > { %vm676_vm4 = vcmp.ge.f32.partialorder %v530_v57, 0.0  ;;  %v740_v61 = vmul.f32 0.2, %v530_v57  ;;  %vm692_vm5 = vcmp.ge.f32.partialorder %v570_v58, 0.0  ;;  %v756_v62 = vmul.f32 0.2, %v570_v58 }
  0xf4   : > { %v835_v63 = vsel %vm707_vm2, %v608_v53, %v771_v59  ;;  %v851_v0 = vsel %vm723_vm3, %v648_v54, %v787_v60 }
  0xf5   : > { %899 = vst [vmem:[%s1334_s14 + $0x140] sm:$0xff] %v835_v63  ;;  %v804_v1 = vsel %vm676_vm4, %v530_v57, %v740_v61  ;;  %v820_v2 = vsel %vm692_vm5, %v570_v58, %v756_v62 }
  0xf6   : > { %915 = vst [vmem:[%s1334_s14 + $0x1c0] sm:$0xff] %v851_v0 }
  0xf7   : > { %868 = vst [vmem:[%s1334_s14 + $0x48] sm:$0xff] %v804_v1  ;;  %v609_v3 = vpop.f32.mrf.mxu2  ;;  %v649_v4 = vpop.f32.mrf.mxu3 }
  0xf8   : > { %884 = vst [vmem:[%s1334_s14 + $0xc8] sm:$0xff] %v820_v2  ;;  %v610_v5 = vadd.f32 %v1326_v40, %v609_v3  ;;  %v650_v6 = vadd.f32 %v1326_v40, %v649_v4  ;;  %v532_v7 = vpop.f32.mrf.mxu0  ;;  %v572_v8 = vpop.f32.mrf.mxu1 }
  0xf9   : > { %v533_v9 = vadd.f32 %v1326_v40, %v532_v7  ;;  %v573_v10 = vadd.f32 %v1326_v40, %v572_v8 }
  0xfa   : > { %vm708_vm6 = vcmp.ge.f32.partialorder %v610_v5, 0.0  ;;  %v772_v11 = vmul.f32 0.2, %v610_v5  ;;  %vm724_vm7 = vcmp.ge.f32.partialorder %v650_v6, 0.0  ;;  %v788_v12 = vmul.f32 0.2, %v650_v6 }
  0xfb   : > { %vm677_vm8 = vcmp.ge.f32.partialorder %v533_v9, 0.0  ;;  %v741_v13 = vmul.f32 0.2, %v533_v9  ;;  %vm693_vm9 = vcmp.ge.f32.partialorder %v573_v10, 0.0  ;;  %v757_v14 = vmul.f32 0.2, %v573_v10 }
  0xfc   : > { %v836_v15 = vsel %vm708_vm6, %v610_v5, %v772_v11  ;;  %v852_v16 = vsel %vm724_vm7, %v650_v6, %v788_v12 }
  0xfd   : > { %900 = vst [vmem:[%s1334_s14 + $0x148] sm:$0xff] %v836_v15  ;;  %v805_v17 = vsel %vm677_vm8, %v533_v9, %v741_v13  ;;  %v821_v18 = vsel %vm693_vm9, %v573_v10, %v757_v14 }
  0xfe   : > { %916 = vst [vmem:[%s1334_s14 + $0x1c8] sm:$0xff] %v852_v16 }
  0xff   : > { %869 = vst [vmem:[%s1334_s14 + $0x50] sm:$0xff] %v805_v17  ;;  %v612_v19 = vpop.f32.mrf.mxu2  ;;  %v652_v20 = vpop.f32.mrf.mxu3 }
 0x100   : > { %885 = vst [vmem:[%s1334_s14 + $0xd0] sm:$0xff] %v821_v18  ;;  %v613_v21 = vadd.f32 %v1326_v40, %v612_v19  ;;  %v653_v22 = vadd.f32 %v1326_v40, %v652_v20  ;;  %v534_v23 = vpop.f32.mrf.mxu0  ;;  %v574_v24 = vpop.f32.mrf.mxu1 }
 0x101   : > { %v535_v25 = vadd.f32 %v1326_v40, %v534_v23  ;;  %v575_v26 = vadd.f32 %v1326_v40, %v574_v24 }
 0x102   : > { %vm709_vm10 = vcmp.ge.f32.partialorder %v613_v21, 0.0  ;;  %v773_v27 = vmul.f32 0.2, %v613_v21  ;;  %vm725_vm11 = vcmp.ge.f32.partialorder %v653_v22, 0.0  ;;  %v789_v28 = vmul.f32 0.2, %v653_v22 }
 0x103   : > { %vm678_vm12 = vcmp.ge.f32.partialorder %v535_v25, 0.0  ;;  %v742_v29 = vmul.f32 0.2, %v535_v25  ;;  %vm694_vm13 = vcmp.ge.f32.partialorder %v575_v26, 0.0  ;;  %v758_v30 = vmul.f32 0.2, %v575_v26 }
 0x104   : > { %v837_v31 = vsel %vm709_vm10, %v613_v21, %v773_v27  ;;  %v853_v32 = vsel %vm725_vm11, %v653_v22, %v789_v28 }
 0x105   : > { %901 = vst [vmem:[%s1334_s14 + $0x150] sm:$0xff] %v837_v31  ;;  %v806_v33 = vsel %vm678_vm12, %v535_v25, %v742_v29  ;;  %v822_v34 = vsel %vm694_vm13, %v575_v26, %v758_v30 }
 0x106   : > { %917 = vst [vmem:[%s1334_s14 + $0x1d0] sm:$0xff] %v853_v32 }
 0x107   : > { %870 = vst [vmem:[%s1334_s14 + $0x58] sm:$0xff] %v806_v33  ;;  %v614_v35 = vpop.f32.mrf.mxu2  ;;  %v654_v36 = vpop.f32.mrf.mxu3 }
 0x108   : > { %886 = vst [vmem:[%s1334_s14 + $0xd8] sm:$0xff] %v822_v34  ;;  %v615_v37 = vadd.f32 %v1326_v40, %v614_v35  ;;  %v655_v38 = vadd.f32 %v1326_v40, %v654_v36  ;;  %v537_v39 = vpop.f32.mrf.mxu0  ;;  %v577_v41 = vpop.f32.mrf.mxu1 }
 0x109   : > { %v538_v42 = vadd.f32 %v1326_v40, %v537_v39  ;;  %v578_v43 = vadd.f32 %v1326_v40, %v577_v41 }
 0x10a   : > { %vm710_vm14 = vcmp.ge.f32.partialorder %v615_v37, 0.0  ;;  %v774_v44 = vmul.f32 0.2, %v615_v37  ;;  %vm726_vm15 = vcmp.ge.f32.partialorder %v655_v38, 0.0  ;;  %v790_v45 = vmul.f32 0.2, %v655_v38 }
 0x10b   : > { %vm679_vm0 = vcmp.ge.f32.partialorder %v538_v42, 0.0  ;;  %v743_v46 = vmul.f32 0.2, %v538_v42  ;;  %vm695_vm1 = vcmp.ge.f32.partialorder %v578_v43, 0.0  ;;  %v759_v47 = vmul.f32 0.2, %v578_v43 }
 0x10c   : > { %v838_v48 = vsel %vm710_vm14, %v615_v37, %v774_v44  ;;  %v854_v49 = vsel %vm726_vm15, %v655_v38, %v790_v45 }
 0x10d   : > { %902 = vst [vmem:[%s1334_s14 + $0x158] sm:$0xff] %v838_v48  ;;  %v807_v50 = vsel %vm679_vm0, %v538_v42, %v743_v46  ;;  %v823_v51 = vsel %vm695_vm1, %v578_v43, %v759_v47 }
 0x10e   : > { %918 = vst [vmem:[%s1334_s14 + $0x1d8] sm:$0xff] %v854_v49 }
 0x10f   : > { %871 = vst [vmem:[%s1334_s14 + $0x60] sm:$0xff] %v807_v50  ;;  %v617_v52 = vpop.f32.mrf.mxu2  ;;  %v657_v53 = vpop.f32.mrf.mxu3 }
 0x110   : > { %887 = vst [vmem:[%s1334_s14 + $0xe0] sm:$0xff] %v823_v51  ;;  %v618_v54 = vadd.f32 %v1326_v40, %v617_v52  ;;  %v658_v55 = vadd.f32 %v1326_v40, %v657_v53  ;;  %v539_v56 = vpop.f32.mrf.mxu0  ;;  %v579_v57 = vpop.f32.mrf.mxu1 }
 0x111   : > { %v540_v58 = vadd.f32 %v1326_v40, %v539_v56  ;;  %v580_v59 = vadd.f32 %v1326_v40, %v579_v57 }
 0x112   : > { %vm711_vm2 = vcmp.ge.f32.partialorder %v618_v54, 0.0  ;;  %v775_v60 = vmul.f32 0.2, %v618_v54  ;;  %vm727_vm3 = vcmp.ge.f32.partialorder %v658_v55, 0.0  ;;  %v791_v61 = vmul.f32 0.2, %v658_v55 }
 0x113   : > { %vm680_vm4 = vcmp.ge.f32.partialorder %v540_v58, 0.0  ;;  %v744_v62 = vmul.f32 0.2, %v540_v58  ;;  %vm696_vm5 = vcmp.ge.f32.partialorder %v580_v59, 0.0  ;;  %v760_v63 = vmul.f32 0.2, %v580_v59 }
 0x114   : > { %v839_v0 = vsel %vm711_vm2, %v618_v54, %v775_v60  ;;  %v855_v1 = vsel %vm727_vm3, %v658_v55, %v791_v61 }
 0x115   : > { %903 = vst [vmem:[%s1334_s14 + $0x160] sm:$0xff] %v839_v0  ;;  %v808_v2 = vsel %vm680_vm4, %v540_v58, %v744_v62  ;;  %v824_v3 = vsel %vm696_vm5, %v580_v59, %v760_v63 }
 0x116   : > { %919 = vst [vmem:[%s1334_s14 + $0x1e0] sm:$0xff] %v855_v1 }
 0x117   : > { %872 = vst [vmem:[%s1334_s14 + $0x68] sm:$0xff] %v808_v2  ;;  %v619_v4 = vpop.f32.mrf.mxu2  ;;  %v659_v5 = vpop.f32.mrf.mxu3 }
 0x118   : > { %888 = vst [vmem:[%s1334_s14 + $0xe8] sm:$0xff] %v824_v3  ;;  %v620_v6 = vadd.f32 %v1326_v40, %v619_v4  ;;  %v660_v7 = vadd.f32 %v1326_v40, %v659_v5  ;;  %v542_v8 = vpop.f32.mrf.mxu0  ;;  %v582_v9 = vpop.f32.mrf.mxu1 }
 0x119   : > { %v543_v10 = vadd.f32 %v1326_v40, %v542_v8  ;;  %v583_v11 = vadd.f32 %v1326_v40, %v582_v9 }
 0x11a   : > { %vm712_vm6 = vcmp.ge.f32.partialorder %v620_v6, 0.0  ;;  %v776_v12 = vmul.f32 0.2, %v620_v6  ;;  %vm728_vm7 = vcmp.ge.f32.partialorder %v660_v7, 0.0  ;;  %v792_v13 = vmul.f32 0.2, %v660_v7 }
 0x11b   : > { %vm681_vm8 = vcmp.ge.f32.partialorder %v543_v10, 0.0  ;;  %v745_v14 = vmul.f32 0.2, %v543_v10  ;;  %vm697_vm9 = vcmp.ge.f32.partialorder %v583_v11, 0.0  ;;  %v761_v15 = vmul.f32 0.2, %v583_v11 }
 0x11c   : > { %v840_v16 = vsel %vm712_vm6, %v620_v6, %v776_v12  ;;  %v856_v17 = vsel %vm728_vm7, %v660_v7, %v792_v13 }
 0x11d   : > { %904 = vst [vmem:[%s1334_s14 + $0x168] sm:$0xff] %v840_v16  ;;  %v809_v18 = vsel %vm681_vm8, %v543_v10, %v745_v14  ;;  %v825_v19 = vsel %vm697_vm9, %v583_v11, %v761_v15 }
 0x11e   : > { %920 = vst [vmem:[%s1334_s14 + $0x1e8] sm:$0xff] %v856_v17 }
 0x11f   : > { %873 = vst [vmem:[%s1334_s14 + $0x70] sm:$0xff] %v809_v18  ;;  %v622_v20 = vpop.f32.mrf.mxu2  ;;  %v662_v21 = vpop.f32.mrf.mxu3 }
 0x120   : > { %889 = vst [vmem:[%s1334_s14 + $0xf0] sm:$0xff] %v825_v19  ;;  %v623_v22 = vadd.f32 %v1326_v40, %v622_v20  ;;  %v663_v23 = vadd.f32 %v1326_v40, %v662_v21  ;;  %v544_v24 = vpop.f32.mrf.mxu0  ;;  %v584_v25 = vpop.f32.mrf.mxu1 }
 0x121   : > { %v545_v26 = vadd.f32 %v1326_v40, %v544_v24  ;;  %v585_v27 = vadd.f32 %v1326_v40, %v584_v25 }
 0x122   : > { %vm713_vm10 = vcmp.ge.f32.partialorder %v623_v22, 0.0  ;;  %v777_v28 = vmul.f32 0.2, %v623_v22  ;;  %vm729_vm11 = vcmp.ge.f32.partialorder %v663_v23, 0.0  ;;  %v793_v29 = vmul.f32 0.2, %v663_v23 }
 0x123   : > { %vm682_vm12 = vcmp.ge.f32.partialorder %v545_v26, 0.0  ;;  %v746_v30 = vmul.f32 0.2, %v545_v26  ;;  %vm698_vm13 = vcmp.ge.f32.partialorder %v585_v27, 0.0  ;;  %v762_v31 = vmul.f32 0.2, %v585_v27 }
 0x124   : > { %v841_v32 = vsel %vm713_vm10, %v623_v22, %v777_v28  ;;  %v857_v33 = vsel %vm729_vm11, %v663_v23, %v793_v29 }
 0x125   : > { %905 = vst [vmem:[%s1334_s14 + $0x170] sm:$0xff] %v841_v32  ;;  %v810_v34 = vsel %vm682_vm12, %v545_v26, %v746_v30  ;;  %v826_v35 = vsel %vm698_vm13, %v585_v27, %v762_v31 }
 0x126   : > { %921 = vst [vmem:[%s1334_s14 + $0x1f0] sm:$0xff] %v857_v33 }
 0x127   : > { %874 = vst [vmem:[%s1334_s14 + $0x78] sm:$0xff] %v810_v34  ;;  %v624_v36 = vpop.f32.mrf.mxu2  ;;  %v664_v37 = vpop.f32.mrf.mxu3 }
 0x128   : > { %890 = vst [vmem:[%s1334_s14 + $0xf8] sm:$0xff] %v826_v35  ;;  %v625_v38 = vadd.f32 %v1326_v40, %v624_v36  ;;  %v665_v39 = vadd.f32 %v1326_v40, %v664_v37 }
 0x12a   : > { %vm714_vm14 = vcmp.ge.f32.partialorder %v625_v38, 0.0  ;;  %v778_v41 = vmul.f32 0.2, %v625_v38  ;;  %vm730_vm15 = vcmp.ge.f32.partialorder %v665_v39, 0.0  ;;  %v794_v42 = vmul.f32 0.2, %v665_v39 }
 0x12c   : > { %v842_v43 = vsel %vm714_vm14, %v625_v38, %v778_v41  ;;  %v858_v44 = vsel %vm730_vm15, %v665_v39, %v794_v42 }
 0x12d   : > { %906 = vst [vmem:[%s1334_s14 + $0x178] sm:$0xff] %v842_v43 }
 0x12e   : > { %922 = vst [vmem:[%s1334_s14 + $0x1f8] sm:$0xff] %v858_v44 }
 0x12f PF: > { %s13_s12 = sadd.s32 1, %s1229_s12  }
 0x130   : > { %p10_p4 = scmp.ge.s32.totalorder %s13_s12, 6  }
 0x132   :  { %12 = sbr.rel (!%p10_p4) target bundleno = 1 (0x1), region = 62 }

// kernel: critic_forward.5
= control target key start
LH: loop header
LB: loop body
LE: loop exit
PB: predicated region body
PF: predicated region fallthrough
CT: control target
= control target key end

     0   :  { %s2581_s1 = inlined_call_operand.vmem [shape: bf16[128,128], index: 1, kind: input, shape index: {}]   ;;  %s2582_s0 = inlined_call_operand.vmem [shape: bf16[512,128], index: 0, kind: input, shape index: {}]   ;;  %s2583_s2 = inlined_call_operand.vmem [shape: f32[1,128], index: 2, kind: input, shape index: {}]   ;;  %s2584_s3 = inlined_call_operand.vmem [shape: f32[1,128], index: 3, kind: input, shape index: {}]   ;;  %s2585_s4 = inlined_call_operand.vmem [shape: f32[512,128], index: 4, kind: output, shape index: {}]  }
   0x1   :  { %v1473_v0 = vld [vmem:[%s2581_s1 + $0x38] sm:$0xff]  ;;  %v1472_v1 = vld [vmem:[%s2581_s1 + $0x30] sm:$0xff]  ;;  %v1471_v2 = vld [vmem:[%s2581_s1 + $0x28] sm:$0xff] }
   0x2   :  { %337 = vmatpush.bf16.msra.mxu0 %v1473_v0  ;;  %1474 = vmatpush.bf16.msra.mxu1 %v1473_v0  ;;  %v1470_v3 = vld [vmem:[%s2581_s1 + $0x20] sm:$0xff]  ;;  %v1469_v4 = vld [vmem:[%s2581_s1 + $0x18] sm:$0xff]  ;;  %v1468_v5 = vld [vmem:[%s2581_s1 + $0x10] sm:$0xff] }
   0x3   :  { %1475 = vmatpush.bf16.msra.mxu2 %v1473_v0  ;;  %1476 = vmatpush.bf16.msra.mxu3 %v1473_v0  ;;  %v1467_v6 = vld [vmem:[%s2581_s1 + $0x8] sm:$0xff]  ;;  %v1466_v7 = vld [vmem:[%s2581_s1] sm:$0xff]  ;;  %v1436_v13 = vld [vmem:[%s2582_s0 + $0x10] sm:$0xff] }
   0x4   :  { %v1434_v8 = vld [vmem:[%s2582_s0] sm:$0xff]  ;;  %v1435_v10 = vld [vmem:[%s2582_s0 + $0x8] sm:$0xff]  ;;  %v1444_v14 = vld [vmem:[%s2582_s0 + $0x50] sm:$0xff] }
   0x5   :  { %v1442_v9 = vld [vmem:[%s2582_s0 + $0x40] sm:$0xff]  ;;  %v1443_v11 = vld [vmem:[%s2582_s0 + $0x48] sm:$0xff]  ;;  %v1437_v16 = vld [vmem:[%s2582_s0 + $0x18] sm:$0xff] }
   0x6   :  { %338 = vmatpush.bf16.msra.mxu0 %v1472_v1  ;;  %1477 = vmatpush.bf16.msra.mxu1 %v1472_v1  ;;  %v1450_v12 = vld [vmem:[%s2582_s0 + $0x80] sm:$0xff]  ;;  %v1451_v15 = vld [vmem:[%s2582_s0 + $0x88] sm:$0xff]  ;;  %v1445_v17 = vld [vmem:[%s2582_s0 + $0x58] sm:$0xff] }
   0x7   :  { %1478 = vmatpush.bf16.msra.mxu2 %v1472_v1  ;;  %1479 = vmatpush.bf16.msra.mxu3 %v1472_v1  ;;  %v1452_v18 = vld [vmem:[%s2582_s0 + $0x90] sm:$0xff]  ;;  %v1458_v19 = vld [vmem:[%s2582_s0 + $0xc0] sm:$0xff]  ;;  %v1453_v22 = vld [vmem:[%s2582_s0 + $0x98] sm:$0xff] }
   0x8   :  { %v1438_v20 = vld [vmem:[%s2582_s0 + $0x20] sm:$0xff]  ;;  %v1459_v23 = vld [vmem:[%s2582_s0 + $0xc8] sm:$0xff]  ;;  %v1460_v27 = vld [vmem:[%s2582_s0 + $0xd0] sm:$0xff] }
   0x9   :  { %v1446_v21 = vld [vmem:[%s2582_s0 + $0x60] sm:$0xff]  ;;  %v1439_v24 = vld [vmem:[%s2582_s0 + $0x28] sm:$0xff]  ;;  %v1440_v28 = vld [vmem:[%s2582_s0 + $0x30] sm:$0xff] }
   0xa   :  { %339 = vmatpush.bf16.msra.mxu0 %v1471_v2  ;;  %1480 = vmatpush.bf16.msra.mxu1 %v1471_v2  ;;  %v1447_v25 = vld [vmem:[%s2582_s0 + $0x68] sm:$0xff]  ;;  %v1454_v26 = vld [vmem:[%s2582_s0 + $0xa0] sm:$0xff]  ;;  %v1448_v29 = vld [vmem:[%s2582_s0 + $0x70] sm:$0xff] }
   0xb   :  { %1481 = vmatpush.bf16.msra.mxu2 %v1471_v2  ;;  %1482 = vmatpush.bf16.msra.mxu3 %v1471_v2  ;;  %v1455_v30 = vld [vmem:[%s2582_s0 + $0xa8] sm:$0xff]  ;;  %v1461_v31 = vld [vmem:[%s2582_s0 + $0xd8] sm:$0xff]  ;;  %v1456_v34 = vld [vmem:[%s2582_s0 + $0xb0] sm:$0xff] }
   0xc   :  { %v1441_v32 = vld [vmem:[%s2582_s0 + $0x38] sm:$0xff]  ;;  %v1462_v35 = vld [vmem:[%s2582_s0 + $0xe0] sm:$0xff]  ;;  %v1463_v39 = vld [vmem:[%s2582_s0 + $0xe8] sm:$0xff] }
   0xd   :  { %v1449_v33 = vld [vmem:[%s2582_s0 + $0x78] sm:$0xff]  ;;  %v1464_v43 = vld [vmem:[%s2582_s0 + $0xf0] sm:$0xff] }
   0xe   :  { %340 = vmatpush.bf16.msra.mxu0 %v1470_v3  ;;  %1483 = vmatpush.bf16.msra.mxu1 %v1470_v3  ;;  %v1457_v38 = vld [vmem:[%s2582_s0 + $0xb8] sm:$0xff] }
   0xf   :  { %1484 = vmatpush.bf16.msra.mxu2 %v1470_v3  ;;  %1485 = vmatpush.bf16.msra.mxu3 %v1470_v3  ;;  %v1465_v49 = vld [vmem:[%s2582_s0 + $0xf8] sm:$0xff] }
  0x12   :  { %341 = vmatpush.bf16.msra.mxu0 %v1469_v4  ;;  %1486 = vmatpush.bf16.msra.mxu1 %v1469_v4 }
  0x13   :  { %1487 = vmatpush.bf16.msra.mxu2 %v1469_v4  ;;  %1488 = vmatpush.bf16.msra.mxu3 %v1469_v4 }
  0x16   :  { %342 = vmatpush.bf16.msra.mxu0 %v1468_v5  ;;  %1489 = vmatpush.bf16.msra.mxu1 %v1468_v5 }
  0x17   :  { %1490 = vmatpush.bf16.msra.mxu2 %v1468_v5  ;;  %1491 = vmatpush.bf16.msra.mxu3 %v1468_v5 }
  0x1a   :  { %343 = vmatpush.bf16.msra.mxu0 %v1467_v6  ;;  %1492 = vmatpush.bf16.msra.mxu1 %v1467_v6 }
  0x1b   :  { %1493 = vmatpush.bf16.msra.mxu2 %v1467_v6  ;;  %1494 = vmatpush.bf16.msra.mxu3 %v1467_v6 }
  0x1e   :  { %344 = vmatpush.bf16.msra.mxu0 %v1466_v7  ;;  %1495 = vmatpush.bf16.msra.mxu1 %v1466_v7 }
  0x1f   :  { %1496 = vmatpush.bf16.msra.mxu2 %v1466_v7  ;;  %1497 = vmatpush.bf16.msra.mxu3 %v1466_v7 }
  0x21   :  { %345 = vmatmul.bf16.vlgmr.msra.gmra.mxu0 %v1434_v8  ;;  %385 = vmatmul.bf16.vlgmr.msra.gmra.mxu1 %v1442_v9 }
  0x22   :  { %425 = vmatmul.bf16.vlgmr.msra.gmra.mxu2 %v1450_v12  ;;  %465 = vmatmul.bf16.vlgmr.msra.gmra.mxu3 %v1458_v19 }
  0x31   :  { %350 = vmatmul.bf16.gmra.mxu0 %v1435_v10  ;;  %390 = vmatmul.bf16.gmra.mxu1 %v1443_v11 }
  0x32   :  { %430 = vmatmul.bf16.gmra.mxu2 %v1451_v15  ;;  %470 = vmatmul.bf16.gmra.mxu3 %v1459_v23 }
  0x41   :  { %355 = vmatmul.bf16.gmra.mxu0 %v1436_v13  ;;  %395 = vmatmul.bf16.gmra.mxu1 %v1444_v14 }
  0x42   :  { %435 = vmatmul.bf16.gmra.mxu2 %v1452_v18  ;;  %475 = vmatmul.bf16.gmra.mxu3 %v1460_v27 }
  0x51   :  { %360 = vmatmul.bf16.gmra.mxu0 %v1437_v16  ;;  %400 = vmatmul.bf16.gmra.mxu1 %v1445_v17 }
  0x52   :  { %440 = vmatmul.bf16.gmra.mxu2 %v1453_v22  ;;  %480 = vmatmul.bf16.gmra.mxu3 %v1461_v31 }
  0x61   :  { %365 = vmatmul.bf16.gmra.mxu0 %v1438_v20  ;;  %405 = vmatmul.bf16.gmra.mxu1 %v1446_v21 }
  0x62   :  { %445 = vmatmul.bf16.gmra.mxu2 %v1454_v26  ;;  %485 = vmatmul.bf16.gmra.mxu3 %v1462_v35 }
  0x71   :  { %370 = vmatmul.bf16.gmra.mxu0 %v1439_v24  ;;  %410 = vmatmul.bf16.gmra.mxu1 %v1447_v25 }
  0x72   :  { %450 = vmatmul.bf16.gmra.mxu2 %v1455_v30  ;;  %490 = vmatmul.bf16.gmra.mxu3 %v1463_v39 }
  0x81   :  { %375 = vmatmul.bf16.gmra.mxu0 %v1440_v28  ;;  %415 = vmatmul.bf16.gmra.mxu1 %v1448_v29 }
  0x82   :  { %455 = vmatmul.bf16.gmra.mxu2 %v1456_v34  ;;  %495 = vmatmul.bf16.gmra.mxu3 %v1464_v43 }
  0x91   :  { %380 = vmatmul.bf16.gmra.mxu0 %v1441_v32  ;;  %420 = vmatmul.bf16.gmra.mxu1 %v1449_v33 }
  0x92   :  { %460 = vmatmul.bf16.gmra.mxu2 %v1457_v38  ;;  %500 = vmatmul.bf16.gmra.mxu3 %v1465_v49 }
  0x9e   :  { %v1633_v36 = vpop.f32.mrf.mxu0  ;;  %v1635_v37 = vpop.f32.mrf.mxu1 }
  0x9f   :  { %v641_v9 = vmul.f32 %v1633_v36, %v1633_v36 }
  0xa5   :  { %v1660_v48 = vpop.f32.mrf.mxu2  ;;  %v1685_v60 = vpop.f32.mrf.mxu3 }
  0xa6   :  { %v1643_v40 = vpop.f32.mrf.mxu0  ;;  %v1645_v41 = vpop.f32.mrf.mxu1  ;;  %2624 = vst [vmem:[#allocation4_spill] sm:$0xff] %v1660_v48 }
  0xa7   :  { %v642_v7 = vmul.f32 %v1643_v40, %v1643_v40  ;;  %v572_v10 = vadd.f32 %v1643_v40, %v1633_v36 }
  0xa9   :  { %v705_v13 = vadd.f32 %v642_v7, %v641_v9 }
  0xad   :  { %v1669_v52 = vpop.f32.mrf.mxu2  ;;  %v1693_v0 = vpop.f32.mrf.mxu3 }
  0xae   :  { %v1647_v42 = vpop.f32.mrf.mxu0  ;;  %v1652_v44 = vpop.f32.mrf.mxu1  ;;  %2625 = vst [vmem:[#allocation5_spill] sm:$0xff] %v1669_v52 }
  0xaf   :  { %v643_v11 = vmul.f32 %v1647_v42, %v1647_v42  ;;  %v573_v14 = vadd.f32 %v572_v10, %v1647_v42 }
  0xb1   :  { %v706_v17 = vadd.f32 %v705_v13, %v643_v11 }
  0xb5   :  { %v1675_v55 = vpop.f32.mrf.mxu2  ;;  %v1701_v4 = vpop.f32.mrf.mxu3 }
  0xb6   :  { %v1654_v45 = vpop.f32.mrf.mxu0  ;;  %v1656_v46 = vpop.f32.mrf.mxu1  ;;  %2626 = vst [vmem:[#allocation6_spill] sm:$0xff] %v1675_v55 }
  0xb7   :  { %v644_v15 = vmul.f32 %v1654_v45, %v1654_v45  ;;  %v574_v18 = vadd.f32 %v573_v14, %v1654_v45 }
  0xb9   :  { %v707_v20 = vadd.f32 %v706_v17, %v644_v15 }
  0xbd   :  { %v1681_v58 = vpop.f32.mrf.mxu2  ;;  %v1717_v12 = vpop.f32.mrf.mxu3 }
  0xbe   :  { %v1658_v47 = vpop.f32.mrf.mxu0  ;;  %v1667_v51 = vpop.f32.mrf.mxu1  ;;  %2627 = vst [vmem:[#allocation7_spill] sm:$0xff] %v1681_v58 }
  0xbf   :  { %v645_v19 = vmul.f32 %v1658_v47, %v1658_v47  ;;  %v575_v21 = vadd.f32 %v574_v18, %v1658_v47 }
  0xc1   :  { %v708_v24 = vadd.f32 %v707_v20, %v645_v19 }
  0xc5   :  { %v1691_v63 = vpop.f32.mrf.mxu2  ;;  %v1742_v32 = vpop.f32.mrf.mxu3 }
  0xc6   :  { %v1665_v50 = vpop.f32.mrf.mxu0  ;;  %v1673_v54 = vpop.f32.mrf.mxu1  ;;  %2628 = vst [vmem:[#allocation8_spill] sm:$0xff] %v1691_v63 }
  0xc7   :  { %v646_v22 = vmul.f32 %v1665_v50, %v1665_v50  ;;  %v576_v25 = vadd.f32 %v575_v21, %v1665_v50 }
  0xc9   :  { %v709_v28 = vadd.f32 %v708_v24, %v646_v22 }
  0xcd   :  { %v1699_v3 = vpop.f32.mrf.mxu2  ;;  %v1765_v21 = vpop.f32.mrf.mxu3 }
  0xce   :  { %v1671_v53 = vpop.f32.mrf.mxu0  ;;  %v1679_v57 = vpop.f32.mrf.mxu1  ;;  %2630 = vst [vmem:[#allocation10_spill] sm:$0xff] %v1699_v3 }
  0xcf   :  { %v647_v26 = vmul.f32 %v1671_v53, %v1671_v53  ;;  %v577_v29 = vadd.f32 %v576_v25, %v1671_v53 }
  0xd1   :  { %v710_v33 = vadd.f32 %v709_v28, %v647_v26 }
  0xd5   :  { %v1709_v8 = vpop.f32.mrf.mxu2 }
  0xd6   :  { %v1677_v56 = vpop.f32.mrf.mxu0  ;;  %v1687_v61 = vpop.f32.mrf.mxu1  ;;  %2632 = vst [vmem:[#allocation12_spill] sm:$0xff] %v1709_v8 }
  0xd7   :  { %v648_v30 = vmul.f32 %v1677_v56, %v1677_v56  ;;  %v578_v34 = vadd.f32 %v577_v29, %v1677_v56 }
  0xd9   :  { %v711_v38 = vadd.f32 %v710_v33, %v648_v30 }
  0xdd   :  { %v1735_v27 = vpop.f32.mrf.mxu2 }
  0xde   :  { %v1683_v59 = vpop.f32.mrf.mxu0  ;;  %v1697_v2 = vpop.f32.mrf.mxu1  ;;  %2634 = vst [vmem:[#allocation14_spill] sm:$0xff] %v1735_v27 }
  0xdf   :  { %2629 = vst [vmem:[#allocation9_spill] sm:$0xff] %v1697_v2  ;;  %v649_v35 = vmul.f32 %v1683_v59, %v1683_v59  ;;  %v579_v39 = vadd.f32 %v578_v34, %v1683_v59 }
  0xe1   :  { %v712_v49 = vadd.f32 %v711_v38, %v649_v35 }
  0xe5   :  { %v1760_v17 = vpop.f32.mrf.mxu2 }
  0xe6   :  { %v1689_v62 = vpop.f32.mrf.mxu0  ;;  %v1705_v6 = vpop.f32.mrf.mxu1  ;;  %2636 = vst [vmem:[#allocation16_spill] sm:$0xff] %v1760_v17 }
  0xe7   :  { %2631 = vst [vmem:[#allocation11_spill] sm:$0xff] %v1705_v6  ;;  %v650_v43 = vmul.f32 %v1689_v62, %v1689_v62  ;;  %v580_v7 = vadd.f32 %v579_v39, %v1689_v62 }
  0xe9   :  { %v713_v11 = vadd.f32 %v712_v49, %v650_v43 }
  0xed   :  { %v1781_v49 = vpop.f32.mrf.mxu2 }
  0xee   :  { %v1695_v1 = vpop.f32.mrf.mxu0  ;;  %v1730_v23 = vpop.f32.mrf.mxu1  ;;  %2638 = vst [vmem:[#allocation18_spill] sm:$0xff] %v1781_v49 }
  0xef   :  { %2633 = vst [vmem:[#allocation13_spill] sm:$0xff] %v1730_v23  ;;  %v651_v9 = vmul.f32 %v1695_v1, %v1695_v1  ;;  %v581_v13 = vadd.f32 %v580_v7, %v1695_v1  ;;  %v657_v7 = vmul.f32 %v1635_v37, %v1635_v37 }
  0xf1   :  { %v714_v18 = vadd.f32 %v713_v11, %v651_v9 }
  0xf6   :  { %v1703_v5 = vpop.f32.mrf.mxu0  ;;  %v1753_v10 = vpop.f32.mrf.mxu1 }
  0xf7   :  { %2635 = vst [vmem:[#allocation15_spill] sm:$0xff] %v1753_v10  ;;  %v652_v14 = vmul.f32 %v1703_v5, %v1703_v5  ;;  %v582_v19 = vadd.f32 %v581_v13, %v1703_v5  ;;  %v1786_v13 = vpop.f32.mrf.mxu3 }
  0xf9   :  { %v715_v22 = vadd.f32 %v714_v18, %v652_v14  ;;  %v658_v14 = vmul.f32 %v1645_v41, %v1645_v41 }
  0xfe   :  { %v1722_v16 = vpop.f32.mrf.mxu0  ;;  %v1776_v35 = vpop.f32.mrf.mxu1 }
  0xff   :  { %v653_v20 = vmul.f32 %v1722_v16, %v1722_v16  ;;  %v583_v24 = vadd.f32 %v582_v19, %v1722_v16  ;;  %2637 = vst [vmem:[#allocation17_spill] sm:$0xff] %v1776_v35 }
 0x101   :  { %v716_v26 = vadd.f32 %v715_v22, %v653_v20  ;;  %v659_v20 = vmul.f32 %v1652_v44, %v1652_v44 }
 0x106   :  { %v1740_v31 = vpop.f32.mrf.mxu0 }
 0x107   :  { %v654_v25 = vmul.f32 %v1740_v31, %v1740_v31  ;;  %v584_v28 = vadd.f32 %v583_v24, %v1740_v31 }
 0x109   :  { %v717_v30 = vadd.f32 %v716_v26, %v654_v25  ;;  %v660_v25 = vmul.f32 %v1656_v46, %v1656_v46 }
 0x10e   :  { %v1758_v15 = vpop.f32.mrf.mxu0 }
 0x10f   :  { %v655_v29 = vmul.f32 %v1758_v15, %v1758_v15  ;;  %v585_v33 = vadd.f32 %v584_v28, %v1758_v15 }
 0x111   :  { %v718_v38 = vadd.f32 %v717_v30, %v655_v29  ;;  %v1797_v29 = vpop.f32.mrf.mxu1  ;;  %v661_v30 = vmul.f32 %v1667_v51, %v1667_v51 }
 0x112   :  { %2639 = vst [vmem:[#allocation19_spill] sm:$0xff] %v1797_v29 }
 0x116   :  { %v1774_v34 = vpop.f32.mrf.mxu0 }
 0x117   :  { %v586_v39 = vadd.f32 %v585_v33, %v1774_v34  ;;  %v656_v43 = vmul.f32 %v1774_v34, %v1774_v34 }
 0x119   :  { %v587_v9 = vadd.f32 %v586_v39, %v1635_v37  ;;  %v719_v11 = vadd.f32 %v718_v38, %v656_v43  ;;  %v1802_v39 = vpop.f32.mrf.mxu2  ;;  %v662_v43 = vmul.f32 %v1673_v54, %v1673_v54 }
 0x11a   :  { %2640 = vst [vmem:[#allocation20_spill] sm:$0xff] %v1802_v39 }
 0x11b   :  { %v588_v18 = vadd.f32 %v587_v9, %v1645_v41  ;;  %v720_v19 = vadd.f32 %v719_v11, %v657_v7  ;;  %v1807_v11 = vpop.f32.mrf.mxu3 }
 0x11d   :  { %v589_v22 = vadd.f32 %v588_v18, %v1652_v44  ;;  %v721_v24 = vadd.f32 %v720_v19, %v658_v14  ;;  %v663_v14 = vmul.f32 %v1679_v57, %v1679_v57 }
 0x11f   :  { %v590_v26 = vadd.f32 %v589_v22, %v1656_v46  ;;  %v722_v28 = vadd.f32 %v721_v24, %v659_v20  ;;  %v664_v20 = vmul.f32 %v1687_v61, %v1687_v61 }
 0x121   :  { %v591_v33 = vadd.f32 %v590_v26, %v1667_v51  ;;  %v723_v38 = vadd.f32 %v722_v28, %v660_v25  ;;  %v665_v25 = vmul.f32 %v1697_v2, %v1697_v2 }
 0x123   :  { %v592_v7 = vadd.f32 %v591_v33, %v1673_v54  ;;  %v724_v9 = vadd.f32 %v723_v38, %v661_v30  ;;  %v1818_v30 = vpop.f32.mrf.mxu1  ;;  %v666_v33 = vmul.f32 %v1705_v6, %v1705_v6 }
 0x124   :  { %2641 = vst [vmem:[#allocation21_spill] sm:$0xff] %v1818_v30 }
 0x125   :  { %v725_v18 = vadd.f32 %v724_v9, %v662_v43  ;;  %v593_v19 = vadd.f32 %v592_v7, %v1679_v57  ;;  %v1823_v7 = vpop.f32.mrf.mxu2  ;;  %v667_v9 = vmul.f32 %v1730_v23, %v1730_v23 }
 0x126   :  { %2642 = vst [vmem:[#allocation22_spill] sm:$0xff] %v1823_v7 }
 0x127   :  { %v594_v22 = vadd.f32 %v593_v19, %v1687_v61  ;;  %v726_v24 = vadd.f32 %v725_v18, %v663_v14  ;;  %v1828_v19 = vpop.f32.mrf.mxu3 }
 0x129   :  { %v595_v26 = vadd.f32 %v594_v22, %v1697_v2  ;;  %v727_v28 = vadd.f32 %v726_v24, %v664_v20  ;;  %v668_v20 = vmul.f32 %v1753_v10, %v1753_v10 }
 0x12b   :  { %v596_v38 = vadd.f32 %v595_v26, %v1705_v6  ;;  %v728_v43 = vadd.f32 %v727_v28, %v665_v25  ;;  %v669_v25 = vmul.f32 %v1776_v35, %v1776_v35 }
 0x12d   :  { %v597_v14 = vadd.f32 %v596_v38, %v1730_v23  ;;  %v729_v18 = vadd.f32 %v728_v43, %v666_v33  ;;  %v670_v33 = vmul.f32 %v1797_v29, %v1797_v29  ;;  %v1839_v38 = vpop.f32.mrf.mxu1 }
 0x12e   :  { %2643 = vst [vmem:[#allocation23_spill] sm:$0xff] %v1839_v38 }
 0x12f   :  { %v598_v22 = vadd.f32 %v597_v14, %v1753_v10  ;;  %v730_v24 = vadd.f32 %v729_v18, %v667_v9  ;;  %v671_v9 = vmul.f32 %v1818_v30, %v1818_v30  ;;  %v1844_v14 = vpop.f32.mrf.mxu2 }
 0x130   :  { %2644 = vst [vmem:[#allocation24_spill] sm:$0xff] %v1844_v14 }
 0x131   :  { %v599_v2 = vadd.f32 %v598_v22, %v1776_v35  ;;  %v731_v26 = vadd.f32 %v730_v24, %v668_v20  ;;  %v672_v20 = vmul.f32 %v1839_v38, %v1839_v38  ;;  %v673_v24 = vmul.f32 %v1660_v48, %v1660_v48 }
 0x133   :  { %v732_v28 = vadd.f32 %v731_v26, %v669_v25  ;;  %v600_v6 = vadd.f32 %v599_v2, %v1797_v29  ;;  %v1849_v2 = vpop.f32.mrf.mxu3 }
 0x135   :  { %v733_v43 = vadd.f32 %v732_v28, %v670_v33  ;;  %v601_v23 = vadd.f32 %v600_v6, %v1818_v30  ;;  %v674_v6 = vmul.f32 %v1669_v52, %v1669_v52 }
 0x137   :  { %v734_v18 = vadd.f32 %v733_v43, %v671_v9  ;;  %v602_v22 = vadd.f32 %v601_v23, %v1839_v38  ;;  %v675_v23 = vmul.f32 %v1675_v55, %v1675_v55  ;;  %v676_v38 = vmul.f32 %v1681_v58, %v1681_v58 }
 0x139   :  { %v603_v25 = vadd.f32 %v602_v22, %v1660_v48  ;;  %v735_v26 = vadd.f32 %v734_v18, %v672_v20  ;;  %v1863_v22 = vpop.f32.mrf.mxu2  ;;  %v677_v18 = vmul.f32 %v1691_v63, %v1691_v63 }
 0x13a   :  { %2645 = vst [vmem:[#allocation25_spill] sm:$0xff] %v1863_v22 }
 0x13b   :  { %v604_v28 = vadd.f32 %v603_v25, %v1669_v52  ;;  %v736_v33 = vadd.f32 %v735_v26, %v673_v24  ;;  %v1868_v25 = vpop.f32.mrf.mxu3  ;;  %v678_v26 = vmul.f32 %v1699_v3, %v1699_v3 }
 0x13d   :  { %v605_v43 = vadd.f32 %v604_v28, %v1675_v55  ;;  %v737_v9 = vadd.f32 %v736_v33, %v674_v6  ;;  %v679_v33 = vmul.f32 %v1709_v8, %v1709_v8 }
 0x13f   :  { %v606_v30 = vadd.f32 %v605_v43, %v1681_v58  ;;  %v738_v29 = vadd.f32 %v737_v9, %v675_v23  ;;  %v680_v9 = vmul.f32 %v1735_v27, %v1735_v27 }
 0x141   :  { %v607_v20 = vadd.f32 %v606_v30, %v1691_v63  ;;  %v739_v24 = vadd.f32 %v738_v29, %v676_v38  ;;  %v681_v38 = vmul.f32 %v1760_v17, %v1760_v17 }
 0x143   :  { %v608_v6 = vadd.f32 %v607_v20, %v1699_v3  ;;  %v740_v28 = vadd.f32 %v739_v24, %v677_v18  ;;  %v1882_v20 = vpop.f32.mrf.mxu2  ;;  %v682_v18 = vmul.f32 %v1781_v49, %v1781_v49 }
 0x145   :  { %v741_v23 = vadd.f32 %v740_v28, %v678_v26  ;;  %v609_v43 = vadd.f32 %v608_v6, %v1709_v8  ;;  %v1887_v6 = vpop.f32.mrf.mxu3  ;;  %v683_v28 = vmul.f32 %v1802_v39, %v1802_v39 }
 0x147   :  { %v610_v30 = vadd.f32 %v609_v43, %v1735_v27  ;;  %v742_v29 = vadd.f32 %v741_v23, %v679_v33 }
 0x149   :  { %v611_v63 = vadd.f32 %v610_v30, %v1760_v17  ;;  %v743_v58 = vadd.f32 %v742_v29, %v680_v9  ;;  %v684_v9 = vmul.f32 %v1823_v7, %v1823_v7 }
 0x14b   :  { %v612_v24 = vadd.f32 %v611_v63, %v1781_v49  ;;  %v744_v26 = vadd.f32 %v743_v58, %v681_v38  ;;  %v685_v58 = vmul.f32 %v1844_v14, %v1844_v14  ;;  %v686_v49 = vmul.f32 %v1863_v22, %v1863_v22 }
 0x14d   :  { %v613_v33 = vadd.f32 %v612_v24, %v1802_v39  ;;  %v745_v23 = vadd.f32 %v744_v26, %v682_v18  ;;  %v1901_v24 = vpop.f32.mrf.mxu2 }
 0x14f   :  { %v614_v43 = vadd.f32 %v613_v33, %v1823_v7  ;;  %v746_v30 = vadd.f32 %v745_v23, %v683_v28  ;;  %v687_v28 = vmul.f32 %v1882_v20, %v1882_v20  ;;  %v1906_v33 = vpop.f32.mrf.mxu3 }
 0x150   :  { %v701_v39 = vmul.f32 %v1906_v33, %v1906_v33 }
 0x151   :  { %v747_v29 = vadd.f32 %v746_v30, %v684_v9  ;;  %v615_v17 = vadd.f32 %v614_v43, %v1844_v14  ;;  %v688_v9 = vmul.f32 %v1901_v24, %v1901_v24 }
 0x153   :  { %v748_v63 = vadd.f32 %v747_v29, %v685_v58  ;;  %v616_v38 = vadd.f32 %v615_v17, %v1863_v22  ;;  %v689_v17 = vmul.f32 %v1685_v60, %v1685_v60 }
 0x155   :  { %v749_v18 = vadd.f32 %v748_v63, %v686_v49  ;;  %v617_v26 = vadd.f32 %v616_v38, %v1882_v20  ;;  %v690_v49 = vmul.f32 %v1693_v0, %v1693_v0  ;;  %v691_v38 = vmul.f32 %v1701_v4, %v1701_v4 }
 0x157   :  { %v750_v23 = vadd.f32 %v749_v18, %v687_v28  ;;  %v618_v43 = vadd.f32 %v617_v26, %v1901_v24  ;;  %v692_v28 = vmul.f32 %v1717_v12, %v1717_v12 }
 0x159   :  { %v619_v30 = vadd.f32 %v618_v43, %v1685_v60  ;;  %v751_v29 = vadd.f32 %v750_v23, %v688_v9  ;;  %v1923_v43 = vpop.f32.mrf.mxu3  ;;  %v693_v23 = vmul.f32 %v1742_v32, %v1742_v32 }
 0x15b   :  { %v620_v58 = vadd.f32 %v619_v30, %v1693_v0  ;;  %v752_v63 = vadd.f32 %v751_v29, %v689_v17  ;;  %v694_v30 = vmul.f32 %v1765_v21, %v1765_v21 }
 0x15d   :  { %v621_v18 = vadd.f32 %v620_v58, %v1701_v4  ;;  %v753_v26 = vadd.f32 %v752_v63, %v690_v49  ;;  %v695_v58 = vmul.f32 %v1786_v13, %v1786_v13 }
 0x15f   :  { %v622_v22 = vadd.f32 %v621_v18, %v1717_v12  ;;  %v754_v14 = vadd.f32 %v753_v26, %v691_v38  ;;  %v696_v18 = vmul.f32 %v1807_v11, %v1807_v11 }
 0x161   :  { %v623_v9 = vadd.f32 %v622_v22, %v1742_v32  ;;  %v755_v17 = vadd.f32 %v754_v14, %v692_v28  ;;  %v697_v14 = vmul.f32 %v1828_v19, %v1828_v19 }
 0x163   :  { %v624_v29 = vadd.f32 %v623_v9, %v1765_v21  ;;  %v756_v49 = vadd.f32 %v755_v17, %v693_v23  ;;  %v1940_v9 = vpop.f32.mrf.mxu3  ;;  %v698_v23 = vmul.f32 %v1849_v2, %v1849_v2 }
 0x165   :  { %v757_v63 = vadd.f32 %v756_v49, %v694_v30  ;;  %v625_v38 = vadd.f32 %v624_v29, %v1786_v13  ;;  %v699_v29 = vmul.f32 %v1868_v25, %v1868_v25 }
 0x167   :  { %v626_v26 = vadd.f32 %v625_v38, %v1807_v11  ;;  %v758_v7 = vadd.f32 %v757_v63, %v695_v58  ;;  %v700_v38 = vmul.f32 %v1887_v6, %v1887_v6 }
 0x169   :  { %v627_v22 = vadd.f32 %v626_v26, %v1828_v19  ;;  %v759_v28 = vadd.f32 %v758_v7, %v696_v18 }
 0x16b   :  { %v628_v17 = vadd.f32 %v627_v22, %v1849_v2  ;;  %v760_v30 = vadd.f32 %v759_v28, %v697_v14  ;;  %v702_v28 = vmul.f32 %v1923_v43, %v1923_v43 }
 0x16d   :  { %v629_v49 = vadd.f32 %v628_v17, %v1868_v25  ;;  %v761_v58 = vadd.f32 %v760_v30, %v698_v23  ;;  %v1957_v17 = vpop.f32.mrf.mxu3 }
 0x16f   :  { %v630_v63 = vadd.f32 %v629_v49, %v1887_v6  ;;  %v762_v7 = vadd.f32 %v761_v58, %v699_v29  ;;  %v703_v29 = vmul.f32 %v1940_v9, %v1940_v9 }
 0x171   :  { %v763_v18 = vadd.f32 %v762_v7, %v700_v38  ;;  %v631_v26 = vadd.f32 %v630_v63, %v1906_v33  ;;  %v704_v63 = vmul.f32 %v1957_v17, %v1957_v17 }
 0x173   :  { %v764_v22 = vadd.f32 %v763_v18, %v701_v39  ;;  %v632_v14 = vadd.f32 %v631_v26, %v1923_v43 }
 0x175   :  { %v765_v23 = vadd.f32 %v764_v22, %v702_v28  ;;  %v633_v30 = vadd.f32 %v632_v14, %v1940_v9 }
 0x177   :  { %v766_v49 = vadd.f32 %v765_v23, %v703_v29  ;;  %v634_v58 = vadd.f32 %v633_v30, %v1957_v17 }
 0x179   :  { %v635_v39 = vrot.slane %v634_v58, 4  ;;  %v767_v38 = vadd.f32 %v766_v49, %v704_v63 }
 0x17b   :  { %v636_v7 = vadd.f32 %v635_v39, %v634_v58  ;;  %v768_v18 = vrot.slane %v767_v38, 4 }
 0x17d   :  { %v637_v26 = vrot.slane %v636_v7, 2  ;;  %v769_v27 = vadd.f32 %v768_v18, %v767_v38 }
 0x17f   :  { %v638_v8 = vadd.f32 %v637_v26, %v636_v7  ;;  %v770_v3 = vrot.slane %v769_v27, 2 }
 0x181   :  { %v639_v22 = vrot.slane %v638_v8, 1  ;;  %v771_v28 = vadd.f32 %v770_v3, %v769_v27 }
 0x183   :  { %v640_v14 = vadd.f32 %v639_v22, %v638_v8  ;;  %v772_v55 = vrot.slane %v771_v28, 1 }
 0x185   :  { %v773_v52 = vadd.f32 %v772_v55, %v771_v28  ;;  %778 = vst [vmem:[#allocation2] sm:$0x1] %v640_v14 }
 0x187   :  { %779 = vst [vmem:[#allocation3] sm:$0x1] %v773_v52  ;;  %v800_v52 = vld [vmem:[%s2583_s2] sm:$0x1] }
 0x18c   :  { %v793_v23 = vld [vmem:[#allocation2] sm:$0x1] }
 0x18d   :  { %v794_v30 = vmul.f32 0.001953125, %v793_v23 }
 0x18e   :  { %v795_v29 = vld [vmem:[#allocation3] sm:$0x1] }
 0x18f   :  { %v796_v48 = vmul.f32 0.001953125, %v795_v29  ;;  %v797_v35 = vmul.f32 %v794_v30, %v794_v30 }
 0x191   :  { %v798_v10 = vsub.f32 %v796_v48, %v797_v35  ;;  %v813_v48 = vld [vmem:[%s2584_s3] sm:$0x1] }
 0x193   :  { %v799_v49 = vmax.f32 %v798_v10, 0.0 }
 0x195   :  { %v801_v58 = vadd.f32 1e-05, %v799_v49 }
 0x197   :  { %1498 = vrsqrt.f32 %v801_v58  ;;  %vm808_vm1 = vweird.f32 %v801_v58 }
 0x19d   :  { %v1499_v63 = vpop.eup %1498 }
 0x19e   :  { %v803_v39 = vmul.f32 %v1499_v63, %v801_v58  ;;  %vm809_vm0 = vweird.f32 %v1499_v63 }
 0x19f   :  { %vm810_vm2 = vmor %vm808_vm1, %vm809_vm0 }
 0x1a0   :  { %v804_v38 = vmul.f32 %v1499_v63, %v803_v39 }
 0x1a2   :  { %v805_v7 = vmul.f32 0.5, %v804_v38 }
 0x1a4   :  { %v806_v18 = vsub.f32 1.5, %v805_v7 }
 0x1a6   :  { %v807_v3 = vmul.f32 %v1499_v63, %v806_v18 }
 0x1a8   :  { %v811_v55 = vsel %vm810_vm2, %v1499_v63, %v807_v3 }
 0x1a9   :  { %v812_v8 = vmul.f32 %v811_v55, %v800_v52 }
 0x1ab   :  { %v814_v27 = vmul.f32 %v812_v8, %v794_v30  ;;  %v1971_v10 = vperm.slane %v812_v8, 0 }
 0x1ad   :  { %v815_v35 = vsub.f32 %v813_v48, %v814_v27  ;;  %v929_v26 = vmul.f32 %v1971_v10, %v1882_v20  ;;  %v930_v22 = vmul.f32 %v1971_v10, %v1901_v24  ;;  %v931_v28 = vmul.f32 %v1971_v10, %v1685_v60 }
 0x1ae   :  { %v932_v14 = vmul.f32 %v1971_v10, %v1693_v0  ;;  %v933_v30 = vmul.f32 %v1971_v10, %v1701_v4  ;;  %v934_v29 = vmul.f32 %v1971_v10, %v1717_v12  ;;  %v935_v20 = vmul.f32 %v1971_v10, %v1742_v32 }
 0x1af   :  { %v1981_v23 = vperm.slane %v815_v35, 0  ;;  %v936_v24 = vmul.f32 %v1971_v10, %v1765_v21  ;;  %v937_v60 = vmul.f32 %v1971_v10, %v1786_v13  ;;  %v938_v0 = vmul.f32 %v1971_v10, %v1807_v11 }
 0x1b0   :  { %v939_v49 = vmul.f32 %v1971_v10, %v1828_v19  ;;  %v940_v4 = vmul.f32 %v1971_v10, %v1849_v2  ;;  %v941_v12 = vmul.f32 %v1971_v10, %v1868_v25  ;;  %v942_v32 = vmul.f32 %v1971_v10, %v1887_v6 }
 0x1b1   :  { %v943_v21 = vmul.f32 %v1971_v10, %v1906_v33  ;;  %v944_v13 = vmul.f32 %v1971_v10, %v1923_v43  ;;  %v945_v11 = vmul.f32 %v1971_v10, %v1940_v9  ;;  %v946_v19 = vmul.f32 %v1971_v10, %v1957_v17 }
 0x1b2   :  { %v2012_v2 = vadd.f32 %v1981_v23, %v929_v26  ;;  %v2015_v25 = vadd.f32 %v1981_v23, %v930_v22  ;;  %v2018_v6 = vadd.f32 %v1981_v23, %v931_v28  ;;  %v2021_v33 = vadd.f32 %v1981_v23, %v932_v14 }
 0x1b3   :  { %v2024_v43 = vadd.f32 %v1981_v23, %v933_v30  ;;  %v2027_v9 = vadd.f32 %v1981_v23, %v934_v29  ;;  %v2030_v17 = vadd.f32 %v1981_v23, %v935_v20  ;;  %v2033_v58 = vadd.f32 %v1981_v23, %v936_v24 }
 0x1b4   :  { %2646 = vst [vmem:[#allocation26_spill] sm:$0xff] %v2018_v6  ;;  %v2036_v63 = vadd.f32 %v1981_v23, %v937_v60  ;;  %v2039_v39 = vadd.f32 %v1981_v23, %v938_v0  ;;  %v2042_v38 = vadd.f32 %v1981_v23, %v939_v49  ;;  %v2045_v7 = vadd.f32 %v1981_v23, %v940_v4  ;;  %v2664_v60 = vld [vmem:[#allocation13_spill] sm:$0xff]  ;;  %v2665_v0 = vld [vmem:[#allocation15_spill] sm:$0xff] }
 0x1b5   :  { %2647 = vst [vmem:[#allocation27_spill] sm:$0xff] %v2021_v33  ;;  %v2048_v18 = vadd.f32 %v1981_v23, %v941_v12  ;;  %v2051_v3 = vadd.f32 %v1981_v23, %v942_v32  ;;  %v2054_v52 = vadd.f32 %v1981_v23, %v943_v21  ;;  %v2057_v55 = vadd.f32 %v1981_v23, %v944_v13  ;;  %v2666_v49 = vld [vmem:[#allocation17_spill] sm:$0xff]  ;;  %v2667_v4 = vld [vmem:[#allocation19_spill] sm:$0xff] }
 0x1b6   :  { %2648 = vst [vmem:[#allocation28_spill] sm:$0xff] %v2024_v43  ;;  %v2060_v8 = vadd.f32 %v1981_v23, %v945_v11  ;;  %v2063_v27 = vadd.f32 %v1981_v23, %v946_v19  ;;  %v883_v48 = vmul.f32 %v1971_v10, %v1633_v36  ;;  %v884_v28 = vmul.f32 %v1971_v10, %v1643_v40  ;;  %v2668_v32 = vld [vmem:[#allocation21_spill] sm:$0xff]  ;;  %v2669_v13 = vld [vmem:[#allocation23_spill] sm:$0xff] }
 0x1b7   :  { %2649 = vst [vmem:[#allocation29_spill] sm:$0xff] %v2027_v9  ;;  %v885_v14 = vmul.f32 %v1971_v10, %v1647_v42  ;;  %v886_v30 = vmul.f32 %v1971_v10, %v1654_v45  ;;  %v887_v29 = vmul.f32 %v1971_v10, %v1658_v47  ;;  %v888_v36 = vmul.f32 %v1971_v10, %v1665_v50 }
 0x1b8   :  { %2650 = vst [vmem:[#allocation30_spill] sm:$0xff] %v2030_v17  ;;  %v950_v35 = vadd.f32 %v1981_v23, %v883_v48  ;;  %v889_v20 = vmul.f32 %v1971_v10, %v1671_v53  ;;  %v890_v40 = vmul.f32 %v1971_v10, %v1677_v56  ;;  %v891_v42 = vmul.f32 %v1971_v10, %v1683_v59  ;;  %v2670_v48 = vld [vmem:[#allocation4_spill] sm:$0xff] }
 0x1b9   :  { %2651 = vst [vmem:[#allocation31_spill] sm:$0xff] %v2033_v58  ;;  %v892_v45 = vmul.f32 %v1971_v10, %v1689_v62  ;;  %v893_v47 = vmul.f32 %v1971_v10, %v1695_v1  ;;  %v894_v24 = vmul.f32 %v1971_v10, %v1703_v5  ;;  %v895_v50 = vmul.f32 %v1971_v10, %v1722_v16 }
 0x1ba   :  { %2652 = vst [vmem:[#allocation32_spill] sm:$0xff] %v2036_v63  ;;  %vm1014_vm3 = vcmp.ge.f32.partialorder %v950_v35, 0.0  ;;  %v1078_v26 = vmul.f32 0.2, %v950_v35  ;;  %v2097_v53 = vmul.f32 %v1971_v10, %v1740_v31  ;;  %v2101_v56 = vmul.f32 %v1971_v10, %v1758_v15  ;;  %v2662_v15 = vld [vmem:[#allocation9_spill] sm:$0xff] }
 0x1bb   :  { %2653 = vst [vmem:[#allocation33_spill] sm:$0xff] %v2039_v39  ;;  %v2105_v59 = vmul.f32 %v1971_v10, %v1774_v34  ;;  %v2109_v62 = vmul.f32 %v1971_v10, %v1635_v37  ;;  %v2113_v1 = vmul.f32 %v1971_v10, %v1645_v41  ;;  %v2117_v5 = vmul.f32 %v1971_v10, %v1652_v44  ;;  %v2663_v34 = vld [vmem:[#allocation11_spill] sm:$0xff]  ;;  %v2683_v39 = vld [vmem:[#allocation25_spill] sm:$0xff] }
 0x1bc   :  { %2654 = vst [vmem:[#allocation34_spill] sm:$0xff] %v2042_v38  ;;  %v1142_v22 = vsel %vm1014_vm3, %v950_v35, %v1078_v26  ;;  %v2121_v16 = vmul.f32 %v1971_v10, %v1656_v46  ;;  %v2125_v31 = vmul.f32 %v1971_v10, %v1667_v51  ;;  %v2129_v37 = vmul.f32 %v1971_v10, %v1673_v54  ;;  %v2671_v26 = vld [vmem:[#allocation5_spill] sm:$0xff] }
 0x1bd   :  { %2655 = vst [vmem:[#allocation35_spill] sm:$0xff] %v2045_v7  ;;  %v2133_v41 = vmul.f32 %v1971_v10, %v1679_v57  ;;  %v2137_v44 = vmul.f32 %v1971_v10, %v1687_v61  ;;  %v2141_v46 = vmul.f32 %v1971_v10, %v2662_v15  ;;  %v2145_v51 = vmul.f32 %v1971_v10, %v2663_v34  ;;  %v2672_v15 = vld [vmem:[#allocation6_spill] sm:$0xff] }
 0x1be   :  { %2656 = vst [vmem:[#allocation36_spill] sm:$0xff] %v2048_v18  ;;  %v2149_v54 = vmul.f32 %v1971_v10, %v2664_v60  ;;  %v2153_v57 = vmul.f32 %v1971_v10, %v2665_v0  ;;  %v2157_v61 = vmul.f32 %v1971_v10, %v2666_v49  ;;  %v2161_v12 = vmul.f32 %v1971_v10, %v2667_v4  ;;  %v2673_v0 = vld [vmem:[#allocation7_spill] sm:$0xff]  ;;  %v2674_v4 = vld [vmem:[#allocation8_spill] sm:$0xff]  ;;  %v2681_v18 = vld [vmem:[#allocation22_spill] sm:$0xff] }
 0x1bf   :  { %2657 = vst [vmem:[#allocation37_spill] sm:$0xff] %v2051_v3  ;;  %v2165_v21 = vmul.f32 %v1971_v10, %v2668_v32  ;;  %v2169_v11 = vmul.f32 %v1971_v10, %v2669_v13  ;;  %v951_v19 = vadd.f32 %v1981_v23, %v884_v28  ;;  %v2174_v35 = vmul.f32 %v1971_v10, %v2670_v48  ;;  %v2675_v32 = vld [vmem:[#allocation10_spill] sm:$0xff] }
 0x1c0   :  { %2658 = vst [vmem:[#allocation38_spill] sm:$0xff] %v2054_v52  ;;  %v2182_v34 = vmul.f32 %v1971_v10, %v2672_v15  ;;  %v952_v60 = vadd.f32 %v1981_v23, %v885_v14  ;;  %v2187_v49 = vmul.f32 %v1971_v10, %v2673_v0  ;;  %v2191_v28 = vmul.f32 %v1971_v10, %v2674_v4  ;;  %v2678_v0 = vld [vmem:[#allocation16_spill] sm:$0xff] }
 0x1c1   :  { %2659 = vst [vmem:[#allocation39_spill] sm:$0xff] %v2057_v55  ;;  %v2195_v13 = vmul.f32 %v1971_v10, %v2675_v32  ;;  %v953_v48 = vadd.f32 %v1981_v23, %v886_v30  ;;  %v954_v4 = vadd.f32 %v1981_v23, %v887_v29  ;;  %v2679_v55 = vld [vmem:[#allocation18_spill] sm:$0xff]  ;;  %v2680_v52 = vld [vmem:[#allocation20_spill] sm:$0xff]  ;;  %v1079_v3 = vmul.f32 0.2, %v951_v19 }
 0x1c2   :  { %2660 = vst [vmem:[#allocation40_spill] sm:$0xff] %v2060_v8  ;;  %v2208_v8 = vmul.f32 %v1971_v10, %v2678_v0  ;;  %v2213_v32 = vmul.f32 %v1971_v10, %v2679_v55  ;;  %v2217_v30 = vmul.f32 %v1971_v10, %v2680_v52  ;;  %v956_v0 = vadd.f32 %v1981_v23, %v889_v20  ;;  %v2682_v29 = vld [vmem:[#allocation24_spill] sm:$0xff] }
 0x1c3   :  { %2661 = vst [vmem:[#allocation41_spill] sm:$0xff] %v2063_v27  ;;  %v2677_v27 = vld [vmem:[#allocation14_spill] sm:$0xff]  ;;  %vm1015_vm4 = vcmp.ge.f32.partialorder %v951_v19, 0.0  ;;  %v1080_v7 = vmul.f32 0.2, %v952_v60  ;;  %v2227_v38 = vmul.f32 %v1971_v10, %v2682_v29  ;;  %v957_v55 = vadd.f32 %v1981_v23, %v890_v40 }
 0x1c4   :  { %1206 = vst [vmem:[%s2585_s4] sm:$0xff] %v1142_v22  ;;  %v2178_v22 = vmul.f32 %v1971_v10, %v2671_v26  ;;  %v2676_v26 = vld [vmem:[#allocation12_spill] sm:$0xff]  ;;  %v2204_v14 = vmul.f32 %v1971_v10, %v2677_v27  ;;  %v2222_v27 = vmul.f32 %v1971_v10, %v2681_v18  ;;  %vm1016_vm5 = vcmp.ge.f32.partialorder %v952_v60, 0.0 }
 0x1c5   :  { %v2200_v15 = vmul.f32 %v1971_v10, %v2676_v26  ;;  %v955_v26 = vadd.f32 %v1981_v23, %v888_v36  ;;  %v1081_v52 = vmul.f32 0.2, %v953_v48  ;;  %v2232_v36 = vmul.f32 %v1971_v10, %v2683_v39 }
 0x1c6   :  { %v958_v63 = vadd.f32 %v1981_v23, %v891_v42  ;;  %vm1017_vm6 = vcmp.ge.f32.partialorder %v953_v48, 0.0  ;;  %v1082_v18 = vmul.f32 0.2, %v954_v4  ;;  %v959_v20 = vadd.f32 %v1981_v23, %v892_v45 }
 0x1c7   :  { %vm1018_vm7 = vcmp.ge.f32.partialorder %v954_v4, 0.0  ;;  %v1083_v58 = vmul.f32 0.2, %v955_v26  ;;  %v1143_v17 = vsel %vm1015_vm4, %v951_v19, %v1079_v3  ;;  %v960_v29 = vadd.f32 %v1981_v23, %v893_v47 }
 0x1c8   :  { %vm1019_vm8 = vcmp.ge.f32.partialorder %v955_v26, 0.0  ;;  %v1084_v9 = vmul.f32 0.2, %v956_v0  ;;  %v1144_v40 = vsel %vm1016_vm5, %v952_v60, %v1080_v7  ;;  %v961_v43 = vadd.f32 %v1981_v23, %v894_v24  ;;  %1207 = vst [vmem:[%s2585_s4 + $0x8] sm:$0xff] %v1143_v17 }
 0x1c9   :  { %vm1020_vm9 = vcmp.ge.f32.partialorder %v956_v0, 0.0  ;;  %v1085_v33 = vmul.f32 0.2, %v957_v55  ;;  %v1145_v10 = vsel %vm1017_vm6, %v953_v48, %v1081_v52  ;;  %v962_v39 = vadd.f32 %v1981_v23, %v895_v50  ;;  %1208 = vst [vmem:[%s2585_s4 + $0x10] sm:$0xff] %v1144_v40 }
 0x1ca   :  { %vm1021_vm10 = vcmp.ge.f32.partialorder %v957_v55, 0.0  ;;  %v1086_v42 = vmul.f32 0.2, %v958_v63  ;;  %v1146_v6 = vsel %vm1018_vm7, %v954_v4, %v1082_v18  ;;  %v963_v3 = vadd.f32 %v1981_v23, %v2097_v53  ;;  %1209 = vst [vmem:[%s2585_s4 + $0x18] sm:$0xff] %v1145_v10 }
 0x1cb   :  { %vm1022_vm11 = vcmp.ge.f32.partialorder %v958_v63, 0.0  ;;  %v1087_v45 = vmul.f32 0.2, %v959_v20  ;;  %v1147_v7 = vsel %vm1019_vm8, %v955_v26, %v1083_v58  ;;  %v964_v47 = vadd.f32 %v1981_v23, %v2101_v56  ;;  %1210 = vst [vmem:[%s2585_s4 + $0x20] sm:$0xff] %v1146_v6 }
 0x1cc   :  { %vm1023_vm12 = vcmp.ge.f32.partialorder %v959_v20, 0.0  ;;  %v1088_v24 = vmul.f32 0.2, %v960_v29  ;;  %v1148_v50 = vsel %vm1020_vm9, %v956_v0, %v1084_v9  ;;  %v965_v17 = vadd.f32 %v1981_v23, %v2105_v59  ;;  %1211 = vst [vmem:[%s2585_s4 + $0x28] sm:$0xff] %v1147_v7 }
 0x1cd   :  { %vm1024_vm13 = vcmp.ge.f32.partialorder %v960_v29, 0.0  ;;  %v1089_v58 = vmul.f32 0.2, %v961_v43  ;;  %v1149_v53 = vsel %vm1021_vm10, %v957_v55, %v1085_v33  ;;  %v966_v56 = vadd.f32 %v1981_v23, %v2109_v62  ;;  %1212 = vst [vmem:[%s2585_s4 + $0x30] sm:$0xff] %v1148_v50 }
 0x1ce   :  { %vm1025_vm14 = vcmp.ge.f32.partialorder %v961_v43, 0.0  ;;  %v1090_v9 = vmul.f32 0.2, %v962_v39  ;;  %v1150_v19 = vsel %vm1022_vm11, %v958_v63, %v1086_v42  ;;  %v967_v59 = vadd.f32 %v1981_v23, %v2113_v1  ;;  %1213 = vst [vmem:[%s2585_s4 + $0x38] sm:$0xff] %v1149_v53 }
 0x1cf   :  { %vm1026_vm15 = vcmp.ge.f32.partialorder %v962_v39, 0.0  ;;  %v1091_v33 = vmul.f32 0.2, %v963_v3  ;;  %v1151_v60 = vsel %vm1023_vm12, %v959_v20, %v1087_v45  ;;  %v968_v6 = vadd.f32 %v1981_v23, %v2117_v5  ;;  %1214 = vst [vmem:[%s2585_s4 + $0x40] sm:$0xff] %v1150_v19 }
 0x1d0   :  { %vm1027_vm0 = vcmp.ge.f32.partialorder %v963_v3, 0.0  ;;  %v1092_v63 = vmul.f32 0.2, %v964_v47  ;;  %v1152_v62 = vsel %vm1024_vm13, %v960_v29, %v1088_v24  ;;  %v969_v1 = vadd.f32 %v1981_v23, %v2121_v16  ;;  %1215 = vst [vmem:[%s2585_s4 + $0x48] sm:$0xff] %v1151_v60 }
 0x1d1   :  { %vm1028_vm1 = vcmp.ge.f32.partialorder %v964_v47, 0.0  ;;  %v1093_v48 = vmul.f32 0.2, %v965_v17  ;;  %v1153_v4 = vsel %vm1025_vm14, %v961_v43, %v1089_v58  ;;  %v970_v5 = vadd.f32 %v1981_v23, %v2125_v31  ;;  %1216 = vst [vmem:[%s2585_s4 + $0x50] sm:$0xff] %v1152_v62 }
 0x1d2   :  { %vm1029_vm2 = vcmp.ge.f32.partialorder %v965_v17, 0.0  ;;  %v1094_v26 = vmul.f32 0.2, %v966_v56  ;;  %v1154_v0 = vsel %vm1026_vm15, %v962_v39, %v1090_v9  ;;  %v971_v16 = vadd.f32 %v1981_v23, %v2129_v37  ;;  %1217 = vst [vmem:[%s2585_s4 + $0x58] sm:$0xff] %v1153_v4 }
 0x1d3   :  { %vm1030_vm3 = vcmp.ge.f32.partialorder %v966_v56, 0.0  ;;  %v1095_v43 = vmul.f32 0.2, %v967_v59  ;;  %v1155_v55 = vsel %vm1027_vm0, %v963_v3, %v1091_v33  ;;  %v972_v31 = vadd.f32 %v1981_v23, %v2133_v41  ;;  %1218 = vst [vmem:[%s2585_s4 + $0x60] sm:$0xff] %v1154_v0 }
 0x1d4   :  { %vm1031_vm4 = vcmp.ge.f32.partialorder %v967_v59, 0.0  ;;  %v1096_v52 = vmul.f32 0.2, %v968_v6  ;;  %v1156_v18 = vsel %vm1028_vm1, %v964_v47, %v1092_v63  ;;  %v973_v37 = vadd.f32 %v1981_v23, %v2137_v44  ;;  %1219 = vst [vmem:[%s2585_s4 + $0x68] sm:$0xff] %v1155_v55 }
 0x1d5   :  { %vm1032_vm5 = vcmp.ge.f32.partialorder %v968_v6, 0.0  ;;  %v1097_v20 = vmul.f32 0.2, %v969_v1  ;;  %v1157_v29 = vsel %vm1029_vm2, %v965_v17, %v1093_v48  ;;  %v974_v41 = vadd.f32 %v1981_v23, %v2141_v46  ;;  %1220 = vst [vmem:[%s2585_s4 + $0x70] sm:$0xff] %v1156_v18 }
 0x1d6   :  { %vm1033_vm6 = vcmp.ge.f32.partialorder %v969_v1, 0.0  ;;  %v1098_v40 = vmul.f32 0.2, %v970_v5  ;;  %v1158_v10 = vsel %vm1030_vm3, %v966_v56, %v1094_v26  ;;  %v975_v44 = vadd.f32 %v1981_v23, %v2145_v51  ;;  %1221 = vst [vmem:[%s2585_s4 + $0x78] sm:$0xff] %v1157_v29 }
 0x1d7   :  { %vm1034_vm7 = vcmp.ge.f32.partialorder %v970_v5, 0.0  ;;  %v1099_v39 = vmul.f32 0.2, %v971_v16  ;;  %v1159_v42 = vsel %vm1031_vm4, %v967_v59, %v1095_v43  ;;  %v976_v46 = vadd.f32 %v1981_v23, %v2149_v54  ;;  %1222 = vst [vmem:[%s2585_s4 + $0x80] sm:$0xff] %v1158_v10 }
 0x1d8   :  { %vm1035_vm8 = vcmp.ge.f32.partialorder %v971_v16, 0.0  ;;  %v1100_v3 = vmul.f32 0.2, %v972_v31  ;;  %v1160_v45 = vsel %vm1032_vm5, %v968_v6, %v1096_v52  ;;  %v977_v51 = vadd.f32 %v1981_v23, %v2153_v57  ;;  %1223 = vst [vmem:[%s2585_s4 + $0x88] sm:$0xff] %v1159_v42 }
 0x1d9   :  { %vm1036_vm9 = vcmp.ge.f32.partialorder %v972_v31, 0.0  ;;  %v1101_v7 = vmul.f32 0.2, %v973_v37  ;;  %v1161_v47 = vsel %vm1033_vm6, %v969_v1, %v1097_v20  ;;  %v978_v54 = vadd.f32 %v1981_v23, %v2157_v61  ;;  %1224 = vst [vmem:[%s2585_s4 + $0x90] sm:$0xff] %v1160_v45 }
 0x1da   :  { %vm1037_vm10 = vcmp.ge.f32.partialorder %v973_v37, 0.0  ;;  %v1102_v24 = vmul.f32 0.2, %v974_v41  ;;  %v1162_v50 = vsel %vm1034_vm7, %v970_v5, %v1098_v40  ;;  %v979_v57 = vadd.f32 %v1981_v23, %v2161_v12  ;;  %1225 = vst [vmem:[%s2585_s4 + $0x98] sm:$0xff] %v1161_v47 }
 0x1db   :  { %vm1038_vm11 = vcmp.ge.f32.partialorder %v974_v41, 0.0  ;;  %v1103_v17 = vmul.f32 0.2, %v975_v44  ;;  %v1163_v58 = vsel %vm1035_vm8, %v971_v16, %v1099_v39  ;;  %v980_v61 = vadd.f32 %v1981_v23, %v2165_v21  ;;  %1226 = vst [vmem:[%s2585_s4 + $0xa0] sm:$0xff] %v1162_v50 }
 0x1dc   :  { %vm1039_vm12 = vcmp.ge.f32.partialorder %v975_v44, 0.0  ;;  %v1104_v53 = vmul.f32 0.2, %v976_v46  ;;  %v1164_v56 = vsel %vm1036_vm9, %v972_v31, %v1100_v3  ;;  %v981_v12 = vadd.f32 %v1981_v23, %v2169_v11  ;;  %1227 = vst [vmem:[%s2585_s4 + $0xa8] sm:$0xff] %v1163_v58 }
 0x1dd   :  { %vm1040_vm13 = vcmp.ge.f32.partialorder %v976_v46, 0.0  ;;  %v1105_v9 = vmul.f32 0.2, %v977_v51  ;;  %v1165_v19 = vsel %vm1037_vm10, %v973_v37, %v1101_v7  ;;  %v982_v21 = vadd.f32 %v1981_v23, %v2174_v35  ;;  %1228 = vst [vmem:[%s2585_s4 + $0xb0] sm:$0xff] %v1164_v56 }
 0x1de   :  { %vm1041_vm14 = vcmp.ge.f32.partialorder %v977_v51, 0.0  ;;  %v1106_v59 = vmul.f32 0.2, %v978_v54  ;;  %v1166_v33 = vsel %vm1038_vm11, %v974_v41, %v1102_v24  ;;  %v983_v11 = vadd.f32 %v1981_v23, %v2178_v22  ;;  %1229 = vst [vmem:[%s2585_s4 + $0xb8] sm:$0xff] %v1165_v19 }
 0x1df   :  { %vm1042_vm15 = vcmp.ge.f32.partialorder %v978_v54, 0.0  ;;  %v1107_v60 = vmul.f32 0.2, %v979_v57  ;;  %v1167_v6 = vsel %vm1039_vm12, %v975_v44, %v1103_v17  ;;  %v984_v35 = vadd.f32 %v1981_v23, %v2182_v34  ;;  %1230 = vst [vmem:[%s2585_s4 + $0xc0] sm:$0xff] %v1166_v33  ;;  %v2684_v17 = vld [vmem:[#allocation26_spill] sm:$0xff] }
 0x1e0   :  { %vm1043_vm0 = vcmp.ge.f32.partialorder %v979_v57, 0.0  ;;  %v1108_v63 = vmul.f32 0.2, %v980_v61  ;;  %v1168_v62 = vsel %vm1040_vm13, %v976_v46, %v1104_v53  ;;  %v985_v22 = vadd.f32 %v1981_v23, %v2187_v49  ;;  %1231 = vst [vmem:[%s2585_s4 + $0xc8] sm:$0xff] %v1167_v6  ;;  %v2685_v53 = vld [vmem:[#allocation27_spill] sm:$0xff] }
 0x1e1   :  { %vm1044_vm1 = vcmp.ge.f32.partialorder %v980_v61, 0.0  ;;  %v1109_v1 = vmul.f32 0.2, %v981_v12  ;;  %v1169_v48 = vsel %vm1041_vm14, %v977_v51, %v1105_v9  ;;  %v986_v34 = vadd.f32 %v1981_v23, %v2191_v28  ;;  %1232 = vst [vmem:[%s2585_s4 + $0xd0] sm:$0xff] %v1168_v62  ;;  %v2686_v9 = vld [vmem:[#allocation28_spill] sm:$0xff] }
 0x1e2   :  { %vm1045_vm2 = vcmp.ge.f32.partialorder %v981_v12, 0.0  ;;  %v1110_v4 = vmul.f32 0.2, %v982_v21  ;;  %v1170_v5 = vsel %vm1042_vm15, %v978_v54, %v1106_v59  ;;  %v987_v49 = vadd.f32 %v1981_v23, %v2195_v13  ;;  %1233 = vst [vmem:[%s2585_s4 + $0xd8] sm:$0xff] %v1169_v48  ;;  %v2687_v59 = vld [vmem:[#allocation29_spill] sm:$0xff]  ;;  %v2690_v62 = vld [vmem:[#allocation32_spill] sm:$0xff] }
 0x1e3   :  { %vm1046_vm3 = vcmp.ge.f32.partialorder %v982_v21, 0.0  ;;  %v1111_v26 = vmul.f32 0.2, %v983_v11  ;;  %v1171_v0 = vsel %vm1043_vm0, %v979_v57, %v1107_v60  ;;  %v988_v28 = vadd.f32 %v1981_v23, %v2200_v15  ;;  %1234 = vst [vmem:[%s2585_s4 + $0xe0] sm:$0xff] %v1170_v5  ;;  %v2688_v60 = vld [vmem:[#allocation30_spill] sm:$0xff]  ;;  %v2691_v48 = vld [vmem:[#allocation33_spill] sm:$0xff] }
 0x1e4   :  { %vm1047_vm4 = vcmp.ge.f32.partialorder %v983_v11, 0.0  ;;  %v1112_v16 = vmul.f32 0.2, %v984_v35  ;;  %v1172_v43 = vsel %vm1044_vm1, %v980_v61, %v1108_v63  ;;  %v989_v13 = vadd.f32 %v1981_v23, %v2204_v14  ;;  %1235 = vst [vmem:[%s2585_s4 + $0xe8] sm:$0xff] %v1171_v0  ;;  %v2692_v5 = vld [vmem:[#allocation34_spill] sm:$0xff]  ;;  %v2693_v0 = vld [vmem:[#allocation35_spill] sm:$0xff] }
 0x1e5   :  { %vm1048_vm5 = vcmp.ge.f32.partialorder %v984_v35, 0.0  ;;  %v1113_v55 = vmul.f32 0.2, %v985_v22  ;;  %v1173_v31 = vsel %vm1045_vm2, %v981_v12, %v1109_v1  ;;  %v990_v15 = vadd.f32 %v1981_v23, %v2208_v8  ;;  %1236 = vst [vmem:[%s2585_s4 + $0xf0] sm:$0xff] %v1172_v43  ;;  %v2694_v43 = vld [vmem:[#allocation36_spill] sm:$0xff] }
 0x1e6   :  { %vm1049_vm6 = vcmp.ge.f32.partialorder %v985_v22, 0.0  ;;  %v1114_v52 = vmul.f32 0.2, %v986_v34  ;;  %v1174_v18 = vsel %vm1046_vm3, %v982_v21, %v1110_v4  ;;  %v991_v14 = vadd.f32 %v1981_v23, %v2213_v32  ;;  %1237 = vst [vmem:[%s2585_s4 + $0xf8] sm:$0xff] %v1173_v31  ;;  %v2695_v31 = vld [vmem:[#allocation37_spill] sm:$0xff] }
 0x1e7   :  { %vm1050_vm7 = vcmp.ge.f32.partialorder %v986_v34, 0.0  ;;  %v1115_v37 = vmul.f32 0.2, %v987_v49  ;;  %v1175_v20 = vsel %vm1047_vm4, %v983_v11, %v1111_v26  ;;  %v992_v8 = vadd.f32 %v1981_v23, %v2217_v30  ;;  %1238 = vst [vmem:[%s2585_s4 + $0x100] sm:$0xff] %v1174_v18  ;;  %v2696_v18 = vld [vmem:[#allocation38_spill] sm:$0xff] }
 0x1e8   :  { %vm1051_vm8 = vcmp.ge.f32.partialorder %v987_v49, 0.0  ;;  %v1116_v29 = vmul.f32 0.2, %v988_v28  ;;  %v1176_v41 = vsel %vm1048_vm5, %v984_v35, %v1112_v16  ;;  %v993_v32 = vadd.f32 %v1981_v23, %v2222_v27  ;;  %1239 = vst [vmem:[%s2585_s4 + $0x108] sm:$0xff] %v1175_v20  ;;  %v2689_v35 = vld [vmem:[#allocation31_spill] sm:$0xff] }
 0x1e9   :  { %vm1052_vm9 = vcmp.ge.f32.partialorder %v988_v28, 0.0  ;;  %v1117_v40 = vmul.f32 0.2, %v989_v13  ;;  %v1177_v10 = vsel %vm1049_vm6, %v985_v22, %v1113_v55  ;;  %v994_v30 = vadd.f32 %v1981_v23, %v2227_v38  ;;  %1240 = vst [vmem:[%s2585_s4 + $0x110] sm:$0xff] %v1176_v41  ;;  %v2697_v20 = vld [vmem:[#allocation39_spill] sm:$0xff]  ;;  %v2698_v41 = vld [vmem:[#allocation40_spill] sm:$0xff] }
 0x1ea   :  { %vm1053_vm10 = vcmp.ge.f32.partialorder %v989_v13, 0.0  ;;  %v1118_v44 = vmul.f32 0.2, %v990_v15  ;;  %v1178_v39 = vsel %vm1050_vm7, %v986_v34, %v1114_v52  ;;  %v995_v27 = vadd.f32 %v1981_v23, %v2232_v36  ;;  %1241 = vst [vmem:[%s2585_s4 + $0x118] sm:$0xff] %v1177_v10  ;;  %v2699_v10 = vld [vmem:[#allocation41_spill] sm:$0xff] }
 0x1eb   :  { %vm1054_vm11 = vcmp.ge.f32.partialorder %v990_v15, 0.0  ;;  %v1119_v42 = vmul.f32 0.2, %v991_v14  ;;  %v1179_v46 = vsel %vm1051_vm8, %v987_v49, %v1115_v37  ;;  %vm1055_vm12 = vcmp.ge.f32.partialorder %v991_v14, 0.0  ;;  %1242 = vst [vmem:[%s2585_s4 + $0x120] sm:$0xff] %v1178_v39 }
 0x1ec   :  { %v1120_v38 = vmul.f32 0.2, %v992_v8  ;;  %v1180_v3 = vsel %vm1052_vm9, %v988_v28, %v1116_v29  ;;  %vm1056_vm13 = vcmp.ge.f32.partialorder %v992_v8, 0.0  ;;  %v1121_v45 = vmul.f32 0.2, %v993_v32  ;;  %1243 = vst [vmem:[%s2585_s4 + $0x128] sm:$0xff] %v1179_v46 }
 0x1ed   :  { %v1181_v51 = vsel %vm1053_vm10, %v989_v13, %v1117_v40  ;;  %vm1057_vm14 = vcmp.ge.f32.partialorder %v993_v32, 0.0  ;;  %v1122_v23 = vmul.f32 0.2, %v994_v30  ;;  %v1182_v36 = vsel %vm1054_vm11, %v990_v15, %v1118_v44  ;;  %1244 = vst [vmem:[%s2585_s4 + $0x130] sm:$0xff] %v1180_v3 }
 0x1ee   :  { %vm1058_vm15 = vcmp.ge.f32.partialorder %v994_v30, 0.0  ;;  %v1123_v7 = vmul.f32 0.2, %v995_v27  ;;  %v1183_v47 = vsel %vm1055_vm12, %v991_v14, %v1119_v42  ;;  %vm1059_vm0 = vcmp.ge.f32.partialorder %v995_v27, 0.0  ;;  %1245 = vst [vmem:[%s2585_s4 + $0x138] sm:$0xff] %v1181_v51 }
 0x1ef   :  { %v1124_v54 = vmul.f32 0.2, %v2012_v2  ;;  %v1184_v24 = vsel %vm1056_vm13, %v992_v8, %v1120_v38  ;;  %vm1060_vm1 = vcmp.ge.f32.partialorder %v2012_v2, 0.0  ;;  %v1125_v50 = vmul.f32 0.2, %v2015_v25  ;;  %1246 = vst [vmem:[%s2585_s4 + $0x140] sm:$0xff] %v1182_v36 }
 0x1f0   :  { %v1185_v57 = vsel %vm1057_vm14, %v993_v32, %v1121_v45  ;;  %vm1061_vm2 = vcmp.ge.f32.partialorder %v2015_v25, 0.0  ;;  %v1126_v58 = vmul.f32 0.2, %v2684_v17  ;;  %v1186_v61 = vsel %vm1058_vm15, %v994_v30, %v1122_v23  ;;  %1247 = vst [vmem:[%s2585_s4 + $0x148] sm:$0xff] %v1183_v47 }
 0x1f1   :  { %vm1062_vm3 = vcmp.ge.f32.partialorder %v2684_v17, 0.0  ;;  %v1127_v56 = vmul.f32 0.2, %v2685_v53  ;;  %v1187_v12 = vsel %vm1059_vm0, %v995_v27, %v1123_v7  ;;  %1248 = vst [vmem:[%s2585_s4 + $0x150] sm:$0xff] %v1184_v24  ;;  %vm1063_vm4 = vcmp.ge.f32.partialorder %v2685_v53, 0.0 }
 0x1f2   :  { %v1128_v19 = vmul.f32 0.2, %v2686_v9  ;;  %v1188_v21 = vsel %vm1060_vm1, %v2012_v2, %v1124_v54  ;;  %1249 = vst [vmem:[%s2585_s4 + $0x158] sm:$0xff] %v1185_v57  ;;  %vm1064_vm5 = vcmp.ge.f32.partialorder %v2686_v9, 0.0  ;;  %v1129_v33 = vmul.f32 0.2, %v2687_v59 }
 0x1f3   :  { %v1189_v11 = vsel %vm1061_vm2, %v2015_v25, %v1125_v50  ;;  %1250 = vst [vmem:[%s2585_s4 + $0x160] sm:$0xff] %v1186_v61  ;;  %vm1065_vm6 = vcmp.ge.f32.partialorder %v2687_v59, 0.0  ;;  %v1130_v6 = vmul.f32 0.2, %v2688_v60  ;;  %v1190_v2 = vsel %vm1062_vm3, %v2684_v17, %v1126_v58 }
 0x1f4   :  { %1251 = vst [vmem:[%s2585_s4 + $0x168] sm:$0xff] %v1187_v12  ;;  %vm1066_vm7 = vcmp.ge.f32.partialorder %v2688_v60, 0.0  ;;  %v1131_v63 = vmul.f32 0.2, %v2689_v35  ;;  %v1191_v25 = vsel %vm1063_vm4, %v2685_v53, %v1127_v56  ;;  %vm1067_vm8 = vcmp.ge.f32.partialorder %v2689_v35, 0.0 }
 0x1f5   :  { %1252 = vst [vmem:[%s2585_s4 + $0x170] sm:$0xff] %v1188_v21  ;;  %v1132_v22 = vmul.f32 0.2, %v2690_v62  ;;  %v1192_v1 = vsel %vm1064_vm5, %v2686_v9, %v1128_v19  ;;  %vm1068_vm9 = vcmp.ge.f32.partialorder %v2690_v62, 0.0  ;;  %v1133_v34 = vmul.f32 0.2, %v2691_v48 }
 0x1f6   :  { %1253 = vst [vmem:[%s2585_s4 + $0x178] sm:$0xff] %v1189_v11  ;;  %v1193_v4 = vsel %vm1065_vm6, %v2687_v59, %v1129_v33  ;;  %vm1069_vm10 = vcmp.ge.f32.partialorder %v2691_v48, 0.0  ;;  %v1134_v49 = vmul.f32 0.2, %v2692_v5  ;;  %v1194_v26 = vsel %vm1066_vm7, %v2688_v60, %v1130_v6 }
 0x1f7   :  { %1254 = vst [vmem:[%s2585_s4 + $0x180] sm:$0xff] %v1190_v2  ;;  %vm1070_vm11 = vcmp.ge.f32.partialorder %v2692_v5, 0.0  ;;  %v1135_v28 = vmul.f32 0.2, %v2693_v0  ;;  %v1195_v16 = vsel %vm1067_vm8, %v2689_v35, %v1131_v63  ;;  %vm1071_vm12 = vcmp.ge.f32.partialorder %v2693_v0, 0.0 }
 0x1f8   :  { %1255 = vst [vmem:[%s2585_s4 + $0x188] sm:$0xff] %v1191_v25  ;;  %v1136_v13 = vmul.f32 0.2, %v2694_v43  ;;  %v1196_v55 = vsel %vm1068_vm9, %v2690_v62, %v1132_v22  ;;  %vm1072_vm13 = vcmp.ge.f32.partialorder %v2694_v43, 0.0  ;;  %v1137_v15 = vmul.f32 0.2, %v2695_v31 }
 0x1f9   :  { %1256 = vst [vmem:[%s2585_s4 + $0x190] sm:$0xff] %v1192_v1  ;;  %v1197_v52 = vsel %vm1069_vm10, %v2691_v48, %v1133_v34  ;;  %vm1073_vm14 = vcmp.ge.f32.partialorder %v2695_v31, 0.0  ;;  %v1138_v14 = vmul.f32 0.2, %v2696_v18  ;;  %v1198_v37 = vsel %vm1070_vm11, %v2692_v5, %v1134_v49 }
 0x1fa   :  { %1257 = vst [vmem:[%s2585_s4 + $0x198] sm:$0xff] %v1193_v4  ;;  %vm1074_vm15 = vcmp.ge.f32.partialorder %v2696_v18, 0.0  ;;  %v1139_v8 = vmul.f32 0.2, %v2697_v20  ;;  %v1199_v29 = vsel %vm1071_vm12, %v2693_v0, %v1135_v28  ;;  %vm1075_vm0 = vcmp.ge.f32.partialorder %v2697_v20, 0.0 }
 0x1fb   :  { %1258 = vst [vmem:[%s2585_s4 + $0x1a0] sm:$0xff] %v1194_v26  ;;  %v1140_v32 = vmul.f32 0.2, %v2698_v41  ;;  %v1200_v40 = vsel %vm1072_vm13, %v2694_v43, %v1136_v13  ;;  %vm1076_vm1 = vcmp.ge.f32.partialorder %v2698_v41, 0.0  ;;  %v1141_v30 = vmul.f32 0.2, %v2699_v10 }
 0x1fc   :  { %1259 = vst [vmem:[%s2585_s4 + $0x1a8] sm:$0xff] %v1195_v16  ;;  %v1201_v44 = vsel %vm1073_vm14, %v2695_v31, %v1137_v15  ;;  %vm1077_vm2 = vcmp.ge.f32.partialorder %v2699_v10, 0.0  ;;  %v1202_v39 = vsel %vm1074_vm15, %v2696_v18, %v1138_v14  ;;  %v1203_v27 = vsel %vm1075_vm0, %v2697_v20, %v1139_v8 }
 0x1fd   :  { %1260 = vst [vmem:[%s2585_s4 + $0x1b0] sm:$0xff] %v1196_v55  ;;  %v1204_v42 = vsel %vm1076_vm1, %v2698_v41, %v1140_v32  ;;  %v1205_v46 = vsel %vm1077_vm2, %v2699_v10, %v1141_v30 }
 0x1fe   :  { %1261 = vst [vmem:[%s2585_s4 + $0x1b8] sm:$0xff] %v1197_v52 }
 0x1ff   :  { %1262 = vst [vmem:[%s2585_s4 + $0x1c0] sm:$0xff] %v1198_v37 }
 0x200   :  { %1263 = vst [vmem:[%s2585_s4 + $0x1c8] sm:$0xff] %v1199_v29 }
 0x201   :  { %1264 = vst [vmem:[%s2585_s4 + $0x1d0] sm:$0xff] %v1200_v40 }
 0x202   :  { %1265 = vst [vmem:[%s2585_s4 + $0x1d8] sm:$0xff] %v1201_v44 }
 0x203   :  { %1266 = vst [vmem:[%s2585_s4 + $0x1e0] sm:$0xff] %v1202_v39 }
 0x204   :  { %1267 = vst [vmem:[%s2585_s4 + $0x1e8] sm:$0xff] %v1203_v27 }
 0x205   :  { %1268 = vst [vmem:[%s2585_s4 + $0x1f0] sm:$0xff] %v1204_v42 }
 0x206   :  { %1269 = vst [vmem:[%s2585_s4 + $0x1f8] sm:$0xff] %v1205_v46 }

// kernel: critic_forward.6
= control target key start
LH: loop header
LB: loop body
LE: loop exit
PB: predicated region body
PF: predicated region fallthrough
CT: control target
= control target key end

     0   :  { %s1099_s1 = inlined_call_operand.vmem [shape: bf16[256,128], index: 1, kind: input, shape index: {}]   ;;  %s1100_s0 = inlined_call_operand.vmem [shape: bf16[128,256], index: 0, kind: input, shape index: {}]   ;;  %s1101_s2 = inlined_call_operand.vmem [shape: f32[1,128], index: 2, kind: input, shape index: {}]   ;;  %s1102_s3 = inlined_call_operand.vmem [shape: f32[1,128], index: 3, kind: input, shape index: {}]   ;;  %s1103_s4 = inlined_call_operand.vmem [shape: f32[128,128], index: 4, kind: output, shape index: {}]  }
   0x1   :  { %v730_v0 = vld [vmem:[%s1099_s1 + $0x38] sm:$0xff]  ;;  %v729_v2 = vld [vmem:[%s1099_s1 + $0x30] sm:$0xff]  ;;  %v728_v4 = vld [vmem:[%s1099_s1 + $0x28] sm:$0xff] }
   0x2   :  { %v738_v1 = vld [vmem:[%s1099_s1 + $0x78] sm:$0xff]  ;;  %241 = vmatpush.bf16.msra.mxu0 %v730_v0  ;;  %v737_v3 = vld [vmem:[%s1099_s1 + $0x70] sm:$0xff]  ;;  %739 = vmatpush.bf16.msra.mxu2 %v730_v0  ;;  %v736_v5 = vld [vmem:[%s1099_s1 + $0x68] sm:$0xff] }
   0x3   :  { %290 = vmatpush.bf16.msra.mxu1 %v738_v1  ;;  %747 = vmatpush.bf16.msra.mxu3 %v738_v1  ;;  %v727_v6 = vld [vmem:[%s1099_s1 + $0x20] sm:$0xff]  ;;  %v726_v8 = vld [vmem:[%s1099_s1 + $0x18] sm:$0xff]  ;;  %v725_v10 = vld [vmem:[%s1099_s1 + $0x10] sm:$0xff] }
   0x4   :  { %v735_v7 = vld [vmem:[%s1099_s1 + $0x60] sm:$0xff]  ;;  %v734_v9 = vld [vmem:[%s1099_s1 + $0x58] sm:$0xff]  ;;  %v733_v11 = vld [vmem:[%s1099_s1 + $0x50] sm:$0xff] }
   0x5   :  { %v724_v12 = vld [vmem:[%s1099_s1 + $0x8] sm:$0xff]  ;;  %v723_v14 = vld [vmem:[%s1099_s1] sm:$0xff]  ;;  %v589_v28 = vld [vmem:[%s1100_s0 + $0x10] sm:$0xf] }
   0x6   :  { %242 = vmatpush.bf16.msra.mxu0 %v729_v2  ;;  %740 = vmatpush.bf16.msra.mxu2 %v729_v2  ;;  %v732_v13 = vld [vmem:[%s1099_s1 + $0x48] sm:$0xff]  ;;  %v731_v15 = vld [vmem:[%s1099_s1 + $0x40] sm:$0xff]  ;;  %v710_v29 = vld [vmem:[%s1100_s0 + $0x14] sm:$0xf0] }
   0x7   :  { %291 = vmatpush.bf16.msra.mxu1 %v737_v3  ;;  %748 = vmatpush.bf16.msra.mxu3 %v737_v3  ;;  %v581_v16 = vld [vmem:[%s1100_s0] sm:$0xf]  ;;  %v708_v17 = vld [vmem:[%s1100_s0 + $0x4] sm:$0xf0]  ;;  %v707_v18 = vld [vmem:[%s1100_s0 + $0x4] sm:$0xf]  ;;  %v590_v36 = vor.u32 %v710_v29, %v589_v28 }
   0x8   :  { %v583_v19 = vld [vmem:[%s1100_s0 + $0x8] sm:$0xf0]  ;;  %v613_v20 = vld [vmem:[%s1100_s0 + $0x40] sm:$0xf]  ;;  %v716_v21 = vld [vmem:[%s1100_s0 + $0x44] sm:$0xf0]  ;;  %v582_v24 = vor.u32 %v708_v17, %v581_v16 }
   0x9   :  { %v715_v22 = vld [vmem:[%s1100_s0 + $0x44] sm:$0xf]  ;;  %v615_v23 = vld [vmem:[%s1100_s0 + $0x48] sm:$0xf0]  ;;  %v586_v25 = vor.u32 %v707_v18, %v583_v19  ;;  %v614_v26 = vor.u32 %v716_v21, %v613_v20  ;;  %v709_v30 = vld [vmem:[%s1100_s0 + $0x14] sm:$0xf] }
   0xa   :  { %243 = vmatpush.bf16.msra.mxu0 %v728_v4  ;;  %741 = vmatpush.bf16.msra.mxu2 %v728_v4  ;;  %v618_v27 = vor.u32 %v715_v22, %v615_v23  ;;  %v591_v31 = vld [vmem:[%s1100_s0 + $0x18] sm:$0xf0]  ;;  %v621_v32 = vld [vmem:[%s1100_s0 + $0x50] sm:$0xf]  ;;  %v718_v33 = vld [vmem:[%s1100_s0 + $0x54] sm:$0xf0] }
   0xb   :  { %292 = vmatpush.bf16.msra.mxu1 %v736_v5  ;;  %749 = vmatpush.bf16.msra.mxu3 %v736_v5  ;;  %v717_v34 = vld [vmem:[%s1100_s0 + $0x54] sm:$0xf]  ;;  %v623_v35 = vld [vmem:[%s1100_s0 + $0x58] sm:$0xf0]  ;;  %v594_v37 = vor.u32 %v709_v30, %v591_v31  ;;  %v622_v38 = vor.u32 %v718_v33, %v621_v32  ;;  %v597_v40 = vld [vmem:[%s1100_s0 + $0x20] sm:$0xf] }
   0xc   :  { %v626_v39 = vor.u32 %v717_v34, %v623_v35  ;;  %v712_v41 = vld [vmem:[%s1100_s0 + $0x24] sm:$0xf0]  ;;  %v711_v42 = vld [vmem:[%s1100_s0 + $0x24] sm:$0xf]  ;;  %v599_v43 = vld [vmem:[%s1100_s0 + $0x28] sm:$0xf0] }
   0xd   :  { %v629_v44 = vld [vmem:[%s1100_s0 + $0x60] sm:$0xf]  ;;  %v720_v45 = vld [vmem:[%s1100_s0 + $0x64] sm:$0xf0]  ;;  %v719_v46 = vld [vmem:[%s1100_s0 + $0x64] sm:$0xf]  ;;  %v598_v48 = vor.u32 %v712_v41, %v597_v40  ;;  %v602_v49 = vor.u32 %v711_v42, %v599_v43 }
   0xe   :  { %244 = vmatpush.bf16.msra.mxu0 %v727_v6  ;;  %742 = vmatpush.bf16.msra.mxu2 %v727_v6  ;;  %v631_v47 = vld [vmem:[%s1100_s0 + $0x68] sm:$0xf0]  ;;  %v630_v50 = vor.u32 %v720_v45, %v629_v44  ;;  %v605_v52 = vld [vmem:[%s1100_s0 + $0x30] sm:$0xf]  ;;  %v714_v53 = vld [vmem:[%s1100_s0 + $0x34] sm:$0xf0] }
   0xf   :  { %293 = vmatpush.bf16.msra.mxu1 %v735_v7  ;;  %750 = vmatpush.bf16.msra.mxu3 %v735_v7  ;;  %v634_v51 = vor.u32 %v719_v46, %v631_v47  ;;  %v713_v54 = vld [vmem:[%s1100_s0 + $0x34] sm:$0xf]  ;;  %v607_v55 = vld [vmem:[%s1100_s0 + $0x38] sm:$0xf0]  ;;  %v637_v56 = vld [vmem:[%s1100_s0 + $0x70] sm:$0xf]  ;;  %v606_v60 = vor.u32 %v714_v53, %v605_v52 }
  0x10   :  { %v722_v57 = vld [vmem:[%s1100_s0 + $0x74] sm:$0xf0]  ;;  %v721_v58 = vld [vmem:[%s1100_s0 + $0x74] sm:$0xf]  ;;  %v639_v59 = vld [vmem:[%s1100_s0 + $0x78] sm:$0xf0]  ;;  %v610_v61 = vor.u32 %v713_v54, %v607_v55 }
  0x11   :  { %v638_v62 = vor.u32 %v722_v57, %v637_v56  ;;  %v642_v63 = vor.u32 %v721_v58, %v639_v59 }
  0x12   :  { %245 = vmatpush.bf16.msra.mxu0 %v726_v8  ;;  %743 = vmatpush.bf16.msra.mxu2 %v726_v8 }
  0x13   :  { %294 = vmatpush.bf16.msra.mxu1 %v734_v9  ;;  %751 = vmatpush.bf16.msra.mxu3 %v734_v9 }
  0x16   :  { %246 = vmatpush.bf16.msra.mxu0 %v725_v10  ;;  %744 = vmatpush.bf16.msra.mxu2 %v725_v10 }
  0x17   :  { %295 = vmatpush.bf16.msra.mxu1 %v733_v11  ;;  %752 = vmatpush.bf16.msra.mxu3 %v733_v11 }
  0x1a   :  { %247 = vmatpush.bf16.msra.mxu0 %v724_v12  ;;  %745 = vmatpush.bf16.msra.mxu2 %v724_v12 }
  0x1b   :  { %296 = vmatpush.bf16.msra.mxu1 %v732_v13  ;;  %753 = vmatpush.bf16.msra.mxu3 %v732_v13 }
  0x1e   :  { %248 = vmatpush.bf16.msra.mxu0 %v723_v14  ;;  %746 = vmatpush.bf16.msra.mxu2 %v723_v14 }
  0x1f   :  { %297 = vmatpush.bf16.msra.mxu1 %v731_v15  ;;  %754 = vmatpush.bf16.msra.mxu3 %v731_v15 }
  0x21   :  { %249 = vmatmul.bf16.vlgmr.msra.gmra.mxu0 %v582_v24  ;;  %269 = vmatmul.bf16.vlgmr.msra.gmra.mxu2 %v614_v26 }
  0x22   :  { %298 = vmatmul.bf16.vlgmr.msra.gmra.mxu1 %v586_v25  ;;  %318 = vmatmul.bf16.vlgmr.msra.gmra.mxu3 %v618_v27 }
  0x31   :  { %254 = vmatmul.bf16.gmra.mxu0 %v590_v36  ;;  %274 = vmatmul.bf16.gmra.mxu2 %v622_v38 }
  0x32   :  { %303 = vmatmul.bf16.gmra.mxu1 %v594_v37  ;;  %323 = vmatmul.bf16.gmra.mxu3 %v626_v39 }
  0x41   :  { %259 = vmatmul.bf16.gmra.mxu0 %v598_v48  ;;  %279 = vmatmul.bf16.gmra.mxu2 %v630_v50 }
  0x42   :  { %308 = vmatmul.bf16.gmra.mxu1 %v602_v49  ;;  %328 = vmatmul.bf16.gmra.mxu3 %v634_v51 }
  0x51   :  { %264 = vmatmul.bf16.gmra.mxu0 %v606_v60  ;;  %284 = vmatmul.bf16.gmra.mxu2 %v638_v62 }
  0x52   :  { %313 = vmatmul.bf16.gmra.mxu1 %v610_v61  ;;  %333 = vmatmul.bf16.gmra.mxu3 %v642_v63 }
  0x9e   :  { %v250_v0 = vpop.f32.mrf.mxu0 }
  0x9f   :  { %v299_v1 = vpop.f32.mrf.mxu1 }
  0xa0   :  { %v928_v23 = vadd.f32 %v299_v1, %v250_v0 }
  0xa2   :  { %v378_v27 = vmul.f32 %v928_v23, %v928_v23 }
  0xa4   :  { %v270_v2 = vpop.f32.mrf.mxu2 }
  0xa5   :  { %v319_v3 = vpop.f32.mrf.mxu3 }
  0xa6   :  { %v252_v4 = vpop.f32.mrf.mxu0  ;;  %v960_v51 = vadd.f32 %v319_v3, %v270_v2 }
  0xa7   :  { %v301_v5 = vpop.f32.mrf.mxu1 }
  0xa8   :  { %v926_v22 = vadd.f32 %v301_v5, %v252_v4  ;;  %v386_v61 = vmul.f32 %v960_v51, %v960_v51 }
  0xaa   :  { %v379_v25 = vmul.f32 %v926_v22, %v926_v22  ;;  %v357_v28 = vadd.f32 %v926_v22, %v928_v23 }
  0xac   :  { %v272_v6 = vpop.f32.mrf.mxu2  ;;  %v394_v35 = vadd.f32 %v379_v25, %v378_v27 }
  0xad   :  { %v321_v7 = vpop.f32.mrf.mxu3 }
  0xae   :  { %v255_v8 = vpop.f32.mrf.mxu0  ;;  %v965_v57 = vadd.f32 %v321_v7, %v272_v6 }
  0xaf   :  { %v304_v9 = vpop.f32.mrf.mxu1 }
  0xb0   :  { %v930_v24 = vadd.f32 %v304_v9, %v255_v8  ;;  %v387_v1 = vmul.f32 %v965_v57, %v965_v57 }
  0xb2   :  { %v380_v29 = vmul.f32 %v930_v24, %v930_v24  ;;  %v358_v36 = vadd.f32 %v357_v28, %v930_v24 }
  0xb4   :  { %v275_v10 = vpop.f32.mrf.mxu2  ;;  %v395_v39 = vadd.f32 %v394_v35, %v380_v29 }
  0xb5   :  { %v324_v11 = vpop.f32.mrf.mxu3 }
  0xb6   :  { %v257_v12 = vpop.f32.mrf.mxu0  ;;  %v972_v62 = vadd.f32 %v324_v11, %v275_v10 }
  0xb7   :  { %v306_v13 = vpop.f32.mrf.mxu1 }
  0xb8   :  { %v934_v26 = vadd.f32 %v306_v13, %v257_v12  ;;  %v388_v5 = vmul.f32 %v972_v62, %v972_v62 }
  0xba   :  { %v381_v37 = vmul.f32 %v934_v26, %v934_v26  ;;  %v359_v40 = vadd.f32 %v358_v36, %v934_v26 }
  0xbc   :  { %v277_v14 = vpop.f32.mrf.mxu2  ;;  %v396_v43 = vadd.f32 %v395_v39, %v381_v37 }
  0xbd   :  { %v326_v15 = vpop.f32.mrf.mxu3 }
  0xbe   :  { %v260_v16 = vpop.f32.mrf.mxu0  ;;  %v977_v2 = vadd.f32 %v326_v15, %v277_v14 }
  0xbf   :  { %v309_v17 = vpop.f32.mrf.mxu1 }
  0xc0   :  { %v942_v30 = vadd.f32 %v309_v17, %v260_v16  ;;  %v389_v9 = vmul.f32 %v977_v2, %v977_v2 }
  0xc2   :  { %v382_v41 = vmul.f32 %v942_v30, %v942_v30  ;;  %v360_v44 = vadd.f32 %v359_v40, %v942_v30 }
  0xc4   :  { %v280_v18 = vpop.f32.mrf.mxu2  ;;  %v397_v46 = vadd.f32 %v396_v43, %v382_v41 }
  0xc5   :  { %v329_v19 = vpop.f32.mrf.mxu3 }
  0xc6   :  { %v262_v20 = vpop.f32.mrf.mxu0  ;;  %v982_v6 = vadd.f32 %v329_v19, %v280_v18 }
  0xc7   :  { %v311_v21 = vpop.f32.mrf.mxu1 }
  0xc8   :  { %v947_v38 = vadd.f32 %v311_v21, %v262_v20  ;;  %v390_v15 = vmul.f32 %v982_v6, %v982_v6 }
  0xca   :  { %v383_v45 = vmul.f32 %v947_v38, %v947_v38  ;;  %v361_v47 = vadd.f32 %v360_v44, %v947_v38 }
  0xcc   :  { %v282_v31 = vpop.f32.mrf.mxu2  ;;  %v398_v52 = vadd.f32 %v397_v46, %v383_v45 }
  0xcd   :  { %v331_v32 = vpop.f32.mrf.mxu3 }
  0xce   :  { %v265_v33 = vpop.f32.mrf.mxu0  ;;  %v987_v10 = vadd.f32 %v331_v32, %v282_v31 }
  0xcf   :  { %v314_v34 = vpop.f32.mrf.mxu1 }
  0xd0   :  { %v952_v42 = vadd.f32 %v314_v34, %v265_v33  ;;  %v391_v19 = vmul.f32 %v987_v10, %v987_v10 }
  0xd2   :  { %v384_v48 = vmul.f32 %v952_v42, %v952_v42  ;;  %v362_v53 = vadd.f32 %v361_v47, %v952_v42 }
  0xd4   :  { %v285_v55 = vpop.f32.mrf.mxu2  ;;  %v399_v58 = vadd.f32 %v398_v52, %v384_v48 }
  0xd5   :  { %v334_v56 = vpop.f32.mrf.mxu3 }
  0xd6   :  { %v267_v49 = vpop.f32.mrf.mxu0  ;;  %v992_v16 = vadd.f32 %v334_v56, %v285_v55 }
  0xd7   :  { %v316_v50 = vpop.f32.mrf.mxu1 }
  0xd8   :  { %v963_v54 = vadd.f32 %v316_v50, %v267_v49  ;;  %v392_v28 = vmul.f32 %v992_v16, %v992_v16 }
  0xda   :  { %v363_v59 = vadd.f32 %v362_v53, %v963_v54  ;;  %v385_v60 = vmul.f32 %v963_v54, %v963_v54 }
  0xdc   :  { %v364_v63 = vadd.f32 %v363_v59, %v960_v51  ;;  %v400_v0 = vadd.f32 %v399_v58, %v385_v60  ;;  %v287_v13 = vpop.f32.mrf.mxu2 }
  0xdd   :  { %v336_v14 = vpop.f32.mrf.mxu3 }
  0xde   :  { %v365_v3 = vadd.f32 %v364_v63, %v965_v57  ;;  %v401_v4 = vadd.f32 %v400_v0, %v386_v61  ;;  %v998_v25 = vadd.f32 %v336_v14, %v287_v13 }
  0xe0   :  { %v366_v7 = vadd.f32 %v365_v3, %v972_v62  ;;  %v402_v8 = vadd.f32 %v401_v4, %v387_v1  ;;  %v393_v33 = vmul.f32 %v998_v25, %v998_v25  ;;  %v441_v3 = vld [vmem:[%s1101_s2] sm:$0x1] }
  0xe2   :  { %v403_v11 = vadd.f32 %v402_v8, %v388_v5  ;;  %v367_v12 = vadd.f32 %v366_v7, %v977_v2  ;;  %v454_v8 = vld [vmem:[%s1102_s3] sm:$0x1] }
  0xe4   :  { %v368_v17 = vadd.f32 %v367_v12, %v982_v6  ;;  %v404_v18 = vadd.f32 %v403_v11, %v389_v9 }
  0xe6   :  { %v369_v20 = vadd.f32 %v368_v17, %v987_v10  ;;  %v405_v21 = vadd.f32 %v404_v18, %v390_v15 }
  0xe8   :  { %v370_v27 = vadd.f32 %v369_v20, %v992_v16  ;;  %v406_v29 = vadd.f32 %v405_v21, %v391_v19 }
  0xea   :  { %v407_v31 = vadd.f32 %v406_v29, %v392_v28  ;;  %v371_v32 = vadd.f32 %v370_v27, %v998_v25 }
  0xec   :  { %v372_v34 = vrot.slane %v371_v32, 4  ;;  %v408_v35 = vadd.f32 %v407_v31, %v393_v33 }
  0xee   :  { %v373_v36 = vadd.f32 %v372_v34, %v371_v32  ;;  %v409_v37 = vrot.slane %v408_v35, 4 }
  0xf0   :  { %v374_v39 = vrot.slane %v373_v36, 2  ;;  %v410_v40 = vadd.f32 %v409_v37, %v408_v35 }
  0xf2   :  { %v375_v41 = vadd.f32 %v374_v39, %v373_v36  ;;  %v411_v43 = vrot.slane %v410_v40, 2 }
  0xf4   :  { %v376_v44 = vrot.slane %v375_v41, 1  ;;  %v412_v45 = vadd.f32 %v411_v43, %v410_v40 }
  0xf6   :  { %v377_v46 = vadd.f32 %v376_v44, %v375_v41  ;;  %v413_v47 = vrot.slane %v412_v45, 1 }
  0xf8   :  { %v414_v48 = vadd.f32 %v413_v47, %v412_v45  ;;  %419 = vst [vmem:[#allocation2] sm:$0x1] %v377_v46 }
  0xfa   :  { %420 = vst [vmem:[#allocation3] sm:$0x1] %v414_v48 }
  0xff   :  { %v434_v49 = vld [vmem:[#allocation2] sm:$0x1] }
 0x100   :  { %v435_v50 = vmul.f32 0.0078125, %v434_v49 }
 0x101   :  { %v436_v52 = vld [vmem:[#allocation3] sm:$0x1] }
 0x102   :  { %v437_v53 = vmul.f32 0.0078125, %v436_v52  ;;  %v438_v55 = vmul.f32 %v435_v50, %v435_v50 }
 0x104   :  { %v439_v56 = vsub.f32 %v437_v53, %v438_v55 }
 0x106   :  { %v440_v58 = vmax.f32 %v439_v56, 0.0 }
 0x108   :  { %v442_v59 = vadd.f32 1e-05, %v440_v58 }
 0x10a   :  { %755 = vrsqrt.f32 %v442_v59  ;;  %vm449_vm1 = vweird.f32 %v442_v59 }
 0x110   :  { %v756_v60 = vpop.eup %755 }
 0x111   :  { %v444_v61 = vmul.f32 %v756_v60, %v442_v59  ;;  %vm450_vm0 = vweird.f32 %v756_v60 }
 0x112   :  { %vm451_vm2 = vmor %vm449_vm1, %vm450_vm0 }
 0x113   :  { %v445_v63 = vmul.f32 %v756_v60, %v444_v61 }
 0x115   :  { %v446_v0 = vmul.f32 0.5, %v445_v63 }
 0x117   :  { %v447_v1 = vsub.f32 1.5, %v446_v0 }
 0x119   :  { %v448_v4 = vmul.f32 %v756_v60, %v447_v1 }
 0x11b   :  { %v452_v5 = vsel %vm451_vm2, %v756_v60, %v448_v4 }
 0x11c   :  { %v453_v7 = vmul.f32 %v452_v5, %v441_v3 }
 0x11e   :  { %v455_v9 = vmul.f32 %v453_v7, %v435_v50  ;;  %v474_v12 = vperm.slane %v453_v7, 0 }
 0x120   :  { %v456_v11 = vsub.f32 %v454_v8, %v455_v9  ;;  %v476_v14 = vmul.f32 %v474_v12, %v928_v23  ;;  %v477_v15 = vmul.f32 %v474_v12, %v926_v22  ;;  %v478_v17 = vmul.f32 %v474_v12, %v930_v24 }
 0x121   :  { %v479_v18 = vmul.f32 %v474_v12, %v934_v26  ;;  %v480_v19 = vmul.f32 %v474_v12, %v942_v30  ;;  %v481_v20 = vmul.f32 %v474_v12, %v947_v38  ;;  %v482_v21 = vmul.f32 %v474_v12, %v952_v42 }
 0x122   :  { %v1012_v13 = vperm.slane %v456_v11, 0  ;;  %v483_v27 = vmul.f32 %v474_v12, %v963_v54  ;;  %v484_v28 = vmul.f32 %v474_v12, %v960_v51  ;;  %v485_v22 = vmul.f32 %v474_v12, %v965_v57 }
 0x123   :  { %v486_v24 = vmul.f32 %v474_v12, %v972_v62  ;;  %v487_v26 = vmul.f32 %v474_v12, %v977_v2  ;;  %v488_v38 = vmul.f32 %v474_v12, %v982_v6  ;;  %v489_v42 = vmul.f32 %v474_v12, %v987_v10 }
 0x124   :  { %v495_v29 = vadd.f32 %v1012_v13, %v476_v14  ;;  %v496_v23 = vadd.f32 %v1012_v13, %v477_v15  ;;  %v497_v30 = vadd.f32 %v1012_v13, %v478_v17  ;;  %v498_v54 = vadd.f32 %v1012_v13, %v479_v18 }
 0x125   :  { %v499_v51 = vadd.f32 %v1012_v13, %v480_v19  ;;  %v490_v31 = vmul.f32 %v474_v12, %v992_v16  ;;  %v491_v32 = vmul.f32 %v474_v12, %v998_v25  ;;  %v500_v57 = vadd.f32 %v1012_v13, %v481_v20 }
 0x126   :  { %v501_v62 = vadd.f32 %v1012_v13, %v482_v21  ;;  %v502_v2 = vadd.f32 %v1012_v13, %v483_v27  ;;  %v503_v33 = vadd.f32 %v1012_v13, %v484_v28  ;;  %vm511_vm3 = vcmp.ge.f32.partialorder %v495_v29, 0.0 }
 0x127   :  { %vm512_vm4 = vcmp.ge.f32.partialorder %v496_v23, 0.0  ;;  %v504_v6 = vadd.f32 %v1012_v13, %v485_v22  ;;  %v527_v10 = vmul.f32 0.2, %v495_v29  ;;  %v528_v34 = vmul.f32 0.2, %v496_v23 }
 0x128   :  { %v529_v35 = vmul.f32 0.2, %v497_v30  ;;  %v505_v36 = vadd.f32 %v1012_v13, %v486_v24  ;;  %vm513_vm5 = vcmp.ge.f32.partialorder %v497_v30, 0.0  ;;  %v530_v16 = vmul.f32 0.2, %v498_v54 }
 0x129   :  { %v531_v25 = vmul.f32 0.2, %v499_v51  ;;  %vm514_vm6 = vcmp.ge.f32.partialorder %v498_v54, 0.0  ;;  %vm515_vm7 = vcmp.ge.f32.partialorder %v499_v51, 0.0  ;;  %v532_v37 = vmul.f32 0.2, %v500_v57 }
 0x12a   :  { %v543_v39 = vsel %vm511_vm3, %v495_v29, %v527_v10  ;;  %v506_v40 = vadd.f32 %v1012_v13, %v487_v26  ;;  %vm516_vm8 = vcmp.ge.f32.partialorder %v500_v57, 0.0  ;;  %v533_v41 = vmul.f32 0.2, %v501_v62 }
 0x12b   :  { %v544_v43 = vsel %vm512_vm4, %v496_v23, %v528_v34  ;;  %559 = vst [vmem:[%s1103_s4] sm:$0xff] %v543_v39  ;;  %v507_v44 = vadd.f32 %v1012_v13, %v488_v38  ;;  %vm517_vm9 = vcmp.ge.f32.partialorder %v501_v62, 0.0  ;;  %v534_v45 = vmul.f32 0.2, %v502_v2 }
 0x12c   :  { %v545_v46 = vsel %vm513_vm5, %v497_v30, %v529_v35  ;;  %vm518_vm10 = vcmp.ge.f32.partialorder %v502_v2, 0.0  ;;  %v535_v47 = vmul.f32 0.2, %v503_v33  ;;  %v546_v48 = vsel %vm514_vm6, %v498_v54, %v530_v16  ;;  %560 = vst [vmem:[%s1103_s4 + $0x8] sm:$0xff] %v544_v43 }
 0x12d   :  { %v547_v49 = vsel %vm515_vm7, %v499_v51, %v531_v25  ;;  %v508_v50 = vadd.f32 %v1012_v13, %v489_v42  ;;  %vm519_vm11 = vcmp.ge.f32.partialorder %v503_v33, 0.0  ;;  %v536_v52 = vmul.f32 0.2, %v504_v6  ;;  %561 = vst [vmem:[%s1103_s4 + $0x10] sm:$0xff] %v545_v46 }
 0x12e   :  { %v548_v53 = vsel %vm516_vm8, %v500_v57, %v532_v37  ;;  %v509_v55 = vadd.f32 %v1012_v13, %v490_v31  ;;  %vm520_vm12 = vcmp.ge.f32.partialorder %v504_v6, 0.0  ;;  %v537_v56 = vmul.f32 0.2, %v505_v36  ;;  %562 = vst [vmem:[%s1103_s4 + $0x18] sm:$0xff] %v546_v48 }
 0x12f   :  { %v549_v58 = vsel %vm517_vm9, %v501_v62, %v533_v41  ;;  %v510_v59 = vadd.f32 %v1012_v13, %v491_v32  ;;  %vm521_vm13 = vcmp.ge.f32.partialorder %v505_v36, 0.0  ;;  %v538_v60 = vmul.f32 0.2, %v506_v40  ;;  %563 = vst [vmem:[%s1103_s4 + $0x20] sm:$0xff] %v547_v49 }
 0x130   :  { %v550_v61 = vsel %vm518_vm10, %v502_v2, %v534_v45  ;;  %vm522_vm14 = vcmp.ge.f32.partialorder %v506_v40, 0.0  ;;  %v539_v63 = vmul.f32 0.2, %v507_v44  ;;  %v551_v0 = vsel %vm519_vm11, %v503_v33, %v535_v47  ;;  %564 = vst [vmem:[%s1103_s4 + $0x28] sm:$0xff] %v548_v53 }
 0x131   :  { %vm523_vm15 = vcmp.ge.f32.partialorder %v507_v44, 0.0  ;;  %v540_v1 = vmul.f32 0.2, %v508_v50  ;;  %v552_v3 = vsel %vm520_vm12, %v504_v6, %v536_v52  ;;  %565 = vst [vmem:[%s1103_s4 + $0x30] sm:$0xff] %v549_v58  ;;  %vm524_vm0 = vcmp.ge.f32.partialorder %v508_v50, 0.0 }
 0x132   :  { %v541_v4 = vmul.f32 0.2, %v509_v55  ;;  %v553_v5 = vsel %vm521_vm13, %v505_v36, %v537_v56  ;;  %566 = vst [vmem:[%s1103_s4 + $0x38] sm:$0xff] %v550_v61  ;;  %vm525_vm1 = vcmp.ge.f32.partialorder %v509_v55, 0.0  ;;  %v542_v7 = vmul.f32 0.2, %v510_v59 }
 0x133   :  { %v554_v8 = vsel %vm522_vm14, %v506_v40, %v538_v60  ;;  %567 = vst [vmem:[%s1103_s4 + $0x40] sm:$0xff] %v551_v0  ;;  %vm526_vm2 = vcmp.ge.f32.partialorder %v510_v59, 0.0  ;;  %v555_v9 = vsel %vm523_vm15, %v507_v44, %v539_v63  ;;  %v556_v11 = vsel %vm524_vm0, %v508_v50, %v540_v1 }
 0x134   :  { %568 = vst [vmem:[%s1103_s4 + $0x48] sm:$0xff] %v552_v3  ;;  %v557_v12 = vsel %vm525_vm1, %v509_v55, %v541_v4  ;;  %v558_v13 = vsel %vm526_vm2, %v510_v59, %v542_v7 }
 0x135   :  { %569 = vst [vmem:[%s1103_s4 + $0x50] sm:$0xff] %v553_v5 }
 0x136   :  { %570 = vst [vmem:[%s1103_s4 + $0x58] sm:$0xff] %v554_v8 }
 0x137   :  { %571 = vst [vmem:[%s1103_s4 + $0x60] sm:$0xff] %v555_v9 }
 0x138   :  { %572 = vst [vmem:[%s1103_s4 + $0x68] sm:$0xff] %v556_v11 }
 0x139   :  { %573 = vst [vmem:[%s1103_s4 + $0x70] sm:$0xff] %v557_v12 }
 0x13a   :  { %574 = vst [vmem:[%s1103_s4 + $0x78] sm:$0xff] %v558_v13 }

// kernel: critic_forward.7
= control target key start
LH: loop header
LB: loop body
LE: loop exit
PB: predicated region body
PF: predicated region fallthrough
CT: control target
= control target key end

     0   :  { %s894_s1 = inlined_call_operand.vmem [shape: bf16[512,128], index: 1, kind: input, shape index: {}]   ;;  %s895_s0 = inlined_call_operand.vmem [shape: bf16[32,512], index: 0, kind: input, shape index: {}]   ;;  %s896_s2 = inlined_call_operand.vmem [shape: f32[1,128], index: 2, kind: input, shape index: {}]   ;;  %s897_s3 = inlined_call_operand.vmem [shape: f32[1,128], index: 3, kind: input, shape index: {}]   ;;  %s898_s4 = inlined_call_operand.vmem [shape: f32[32,128], index: 4, kind: output, shape index: {}]  }
   0x1   :  { %v680_v0 = vld [vmem:[%s894_s1 + $0x38] sm:$0xff]  ;;  %v679_v4 = vld [vmem:[%s894_s1 + $0x30] sm:$0xff]  ;;  %v678_v8 = vld [vmem:[%s894_s1 + $0x28] sm:$0xff] }
   0x2   :  { %v688_v1 = vld [vmem:[%s894_s1 + $0x78] sm:$0xff]  ;;  %321 = vmatpush.bf16.msra.mxu0 %v680_v0  ;;  %v687_v5 = vld [vmem:[%s894_s1 + $0x70] sm:$0xff]  ;;  %v686_v9 = vld [vmem:[%s894_s1 + $0x68] sm:$0xff] }
   0x3   :  { %v696_v2 = vld [vmem:[%s894_s1 + $0xb8] sm:$0xff]  ;;  %340 = vmatpush.bf16.msra.mxu1 %v688_v1  ;;  %v695_v6 = vld [vmem:[%s894_s1 + $0xb0] sm:$0xff]  ;;  %v694_v10 = vld [vmem:[%s894_s1 + $0xa8] sm:$0xff] }
   0x4   :  { %v704_v3 = vld [vmem:[%s894_s1 + $0xf8] sm:$0xff]  ;;  %359 = vmatpush.bf16.msra.mxu2 %v696_v2  ;;  %v703_v7 = vld [vmem:[%s894_s1 + $0xf0] sm:$0xff]  ;;  %v702_v11 = vld [vmem:[%s894_s1 + $0xe8] sm:$0xff] }
   0x5   :  { %378 = vmatpush.bf16.msra.mxu3 %v704_v3  ;;  %v677_v12 = vld [vmem:[%s894_s1 + $0x20] sm:$0xff]  ;;  %v676_v16 = vld [vmem:[%s894_s1 + $0x18] sm:$0xff]  ;;  %v675_v20 = vld [vmem:[%s894_s1 + $0x10] sm:$0xff] }
   0x6   :  { %322 = vmatpush.bf16.msra.mxu0 %v679_v4  ;;  %v685_v13 = vld [vmem:[%s894_s1 + $0x60] sm:$0xff]  ;;  %v684_v17 = vld [vmem:[%s894_s1 + $0x58] sm:$0xff]  ;;  %v683_v21 = vld [vmem:[%s894_s1 + $0x50] sm:$0xff] }
   0x7   :  { %341 = vmatpush.bf16.msra.mxu1 %v687_v5  ;;  %v693_v14 = vld [vmem:[%s894_s1 + $0xa0] sm:$0xff]  ;;  %v692_v18 = vld [vmem:[%s894_s1 + $0x98] sm:$0xff]  ;;  %v691_v22 = vld [vmem:[%s894_s1 + $0x90] sm:$0xff] }
   0x8   :  { %360 = vmatpush.bf16.msra.mxu2 %v695_v6  ;;  %v701_v15 = vld [vmem:[%s894_s1 + $0xe0] sm:$0xff]  ;;  %v700_v19 = vld [vmem:[%s894_s1 + $0xd8] sm:$0xff]  ;;  %v699_v23 = vld [vmem:[%s894_s1 + $0xd0] sm:$0xff] }
   0x9   :  { %379 = vmatpush.bf16.msra.mxu3 %v703_v7  ;;  %v674_v24 = vld [vmem:[%s894_s1 + $0x8] sm:$0xff]  ;;  %v673_v28 = vld [vmem:[%s894_s1] sm:$0xff]  ;;  %v667_v33 = vld [vmem:[%s895_s0 + $0xc] sm:$0xf0] }
   0xa   :  { %323 = vmatpush.bf16.msra.mxu0 %v678_v8  ;;  %v682_v25 = vld [vmem:[%s894_s1 + $0x48] sm:$0xff]  ;;  %v681_v29 = vld [vmem:[%s894_s1 + $0x40] sm:$0xff]  ;;  %v509_v35 = vld [vmem:[%s895_s0 + $0x10] sm:$0xf0] }
   0xb   :  { %342 = vmatpush.bf16.msra.mxu1 %v686_v9  ;;  %v690_v26 = vld [vmem:[%s894_s1 + $0x88] sm:$0xff]  ;;  %v689_v30 = vld [vmem:[%s894_s1 + $0x80] sm:$0xff]  ;;  %v668_v37 = vld [vmem:[%s895_s0 + $0x14] sm:$0xf0] }
   0xc   :  { %361 = vmatpush.bf16.msra.mxu2 %v694_v10  ;;  %v698_v27 = vld [vmem:[%s894_s1 + $0xc8] sm:$0xff]  ;;  %v697_v31 = vld [vmem:[%s894_s1 + $0xc0] sm:$0xff]  ;;  %v517_v39 = vld [vmem:[%s895_s0 + $0x18] sm:$0xf0] }
   0xd   :  { %380 = vmatpush.bf16.msra.mxu3 %v702_v11  ;;  %v507_v32 = vld [vmem:[%s895_s0] sm:$0xf]  ;;  %v665_v34 = vld [vmem:[%s895_s0 + $0x4] sm:$0xf]  ;;  %v515_v36 = vld [vmem:[%s895_s0 + $0x8] sm:$0xf] }
   0xe   :  { %324 = vmatpush.bf16.msra.mxu0 %v677_v12  ;;  %v666_v38 = vld [vmem:[%s895_s0 + $0xc] sm:$0xf]  ;;  %v508_v40 = vor.u32 %v667_v33, %v507_v32  ;;  %v512_v41 = vor.u32 %v665_v34, %v509_v35  ;;  %v516_v42 = vor.u32 %v668_v37, %v515_v36  ;;  %v523_v44 = vld [vmem:[%s895_s0 + $0x20] sm:$0xf]  ;;  %v671_v45 = vld [vmem:[%s895_s0 + $0x2c] sm:$0xf0] }
   0xf   :  { %343 = vmatpush.bf16.msra.mxu1 %v685_v13  ;;  %v520_v43 = vor.u32 %v666_v38, %v517_v39  ;;  %v669_v46 = vld [vmem:[%s895_s0 + $0x24] sm:$0xf]  ;;  %v525_v47 = vld [vmem:[%s895_s0 + $0x30] sm:$0xf0]  ;;  %v531_v48 = vld [vmem:[%s895_s0 + $0x28] sm:$0xf]  ;;  %v524_v52 = vor.u32 %v671_v45, %v523_v44 }
  0x10   :  { %362 = vmatpush.bf16.msra.mxu2 %v693_v14  ;;  %v672_v49 = vld [vmem:[%s895_s0 + $0x34] sm:$0xf0]  ;;  %v670_v50 = vld [vmem:[%s895_s0 + $0x2c] sm:$0xf]  ;;  %v533_v51 = vld [vmem:[%s895_s0 + $0x38] sm:$0xf0]  ;;  %v528_v53 = vor.u32 %v669_v46, %v525_v47 }
  0x11   :  { %381 = vmatpush.bf16.msra.mxu3 %v701_v15  ;;  %v532_v54 = vor.u32 %v672_v49, %v531_v48  ;;  %v536_v55 = vor.u32 %v670_v50, %v533_v51 }
  0x12   :  { %325 = vmatpush.bf16.msra.mxu0 %v676_v16 }
  0x13   :  { %344 = vmatpush.bf16.msra.mxu1 %v684_v17 }
  0x14   :  { %363 = vmatpush.bf16.msra.mxu2 %v692_v18 }
  0x15   :  { %382 = vmatpush.bf16.msra.mxu3 %v700_v19 }
  0x16   :  { %326 = vmatpush.bf16.msra.mxu0 %v675_v20 }
  0x17   :  { %345 = vmatpush.bf16.msra.mxu1 %v683_v21 }
  0x18   :  { %364 = vmatpush.bf16.msra.mxu2 %v691_v22 }
  0x19   :  { %383 = vmatpush.bf16.msra.mxu3 %v699_v23 }
  0x1a   :  { %327 = vmatpush.bf16.msra.mxu0 %v674_v24 }
  0x1b   :  { %346 = vmatpush.bf16.msra.mxu1 %v682_v25 }
  0x1c   :  { %365 = vmatpush.bf16.msra.mxu2 %v690_v26 }
  0x1d   :  { %384 = vmatpush.bf16.msra.mxu3 %v698_v27 }
  0x1e   :  { %328 = vmatpush.bf16.msra.mxu0 %v673_v28 }
  0x1f   :  { %347 = vmatpush.bf16.msra.mxu1 %v681_v29 }
  0x20   :  { %366 = vmatpush.bf16.msra.mxu2 %v689_v30 }
  0x21   :  { %385 = vmatpush.bf16.msra.mxu3 %v697_v31  ;;  %329 = vmatmul.bf16.vlgmr.msra.gmra.mxu0 %v508_v40 }
  0x22   :  { %348 = vmatmul.bf16.vlgmr.msra.gmra.mxu1 %v512_v41 }
  0x23   :  { %367 = vmatmul.bf16.vlgmr.msra.gmra.mxu2 %v516_v42 }
  0x24   :  { %386 = vmatmul.bf16.vlgmr.msra.gmra.mxu3 %v520_v43 }
  0x31   :  { %334 = vmatmul.bf16.gmra.mxu0 %v524_v52 }
  0x32   :  { %353 = vmatmul.bf16.gmra.mxu1 %v528_v53 }
  0x33   :  { %372 = vmatmul.bf16.gmra.mxu2 %v532_v54 }
  0x34   :  { %391 = vmatmul.bf16.gmra.mxu3 %v536_v55  ;;  %v451_v55 = vld [vmem:[%s896_s2] sm:$0x1] }
  0x9e   :  { %v330_v56 = vpop.f32.mrf.mxu0 }
  0x9f   :  { %v349_v57 = vpop.f32.mrf.mxu1 }
  0xa0   :  { %v350_v2 = vadd.f32 %v349_v57, %v330_v56 }
  0xa6   :  { %v368_v58 = vpop.f32.mrf.mxu2  ;;  %v332_v60 = vpop.f32.mrf.mxu0 }
  0xa7   :  { %v387_v59 = vpop.f32.mrf.mxu3  ;;  %v351_v61 = vpop.f32.mrf.mxu1  ;;  %v369_v8 = vadd.f32 %v368_v58, %v350_v2 }
  0xa8   :  { %v352_v3 = vadd.f32 %v351_v61, %v332_v60 }
  0xa9   :  { %v388_v13 = vadd.f32 %v387_v59, %v369_v8  ;;  %v464_v59 = vld [vmem:[%s897_s3] sm:$0x1] }
  0xab   :  { %v412_v18 = vmul.f32 %v388_v13, %v388_v13 }
  0xae   :  { %v370_v62 = vpop.f32.mrf.mxu2  ;;  %v335_v0 = vpop.f32.mrf.mxu0 }
  0xaf   :  { %v389_v63 = vpop.f32.mrf.mxu3  ;;  %v354_v1 = vpop.f32.mrf.mxu1  ;;  %v371_v5 = vadd.f32 %v370_v62, %v352_v3 }
  0xb0   :  { %v355_v4 = vadd.f32 %v354_v1, %v335_v0 }
  0xb1   :  { %v390_v10 = vadd.f32 %v389_v63, %v371_v5 }
  0xb3   :  { %v413_v15 = vmul.f32 %v390_v10, %v390_v10  ;;  %v403_v19 = vadd.f32 %v390_v10, %v388_v13 }
  0xb5   :  { %v416_v23 = vadd.f32 %v413_v15, %v412_v18 }
  0xb6   :  { %v373_v6 = vpop.f32.mrf.mxu2  ;;  %v337_v11 = vpop.f32.mrf.mxu0 }
  0xb7   :  { %v392_v7 = vpop.f32.mrf.mxu3  ;;  %v374_v9 = vadd.f32 %v373_v6, %v355_v4  ;;  %v356_v12 = vpop.f32.mrf.mxu1 }
  0xb8   :  { %v357_v16 = vadd.f32 %v356_v12, %v337_v11 }
  0xb9   :  { %v393_v14 = vadd.f32 %v392_v7, %v374_v9 }
  0xbb   :  { %v414_v20 = vmul.f32 %v393_v14, %v393_v14  ;;  %v404_v24 = vadd.f32 %v403_v19, %v393_v14 }
  0xbd   :  { %v417_v26 = vadd.f32 %v416_v23, %v414_v20 }
  0xbe   :  { %v375_v17 = vpop.f32.mrf.mxu2 }
  0xbf   :  { %v376_v21 = vadd.f32 %v375_v17, %v357_v16  ;;  %v394_v22 = vpop.f32.mrf.mxu3 }
  0xc1   :  { %v395_v25 = vadd.f32 %v394_v22, %v376_v21 }
  0xc3   :  { %v405_v27 = vadd.f32 %v404_v24, %v395_v25  ;;  %v415_v28 = vmul.f32 %v395_v25, %v395_v25 }
  0xc5   :  { %v406_v29 = vrot.slane %v405_v27, 4  ;;  %v418_v30 = vadd.f32 %v417_v26, %v415_v28 }
  0xc7   :  { %v407_v31 = vadd.f32 %v406_v29, %v405_v27  ;;  %v419_v32 = vrot.slane %v418_v30, 4 }
  0xc9   :  { %v408_v33 = vrot.slane %v407_v31, 2  ;;  %v420_v34 = vadd.f32 %v419_v32, %v418_v30 }
  0xcb   :  { %v409_v35 = vadd.f32 %v408_v33, %v407_v31  ;;  %v421_v36 = vrot.slane %v420_v34, 2 }
  0xcd   :  { %v410_v37 = vrot.slane %v409_v35, 1  ;;  %v422_v38 = vadd.f32 %v421_v36, %v420_v34 }
  0xcf   :  { %v411_v39 = vadd.f32 %v410_v37, %v409_v35  ;;  %v423_v40 = vrot.slane %v422_v38, 1 }
  0xd1   :  { %v424_v41 = vadd.f32 %v423_v40, %v422_v38  ;;  %429 = vst [vmem:[#allocation2] sm:$0x1] %v411_v39 }
  0xd3   :  { %430 = vst [vmem:[#allocation3] sm:$0x1] %v424_v41 }
  0xd8   :  { %v444_v42 = vld [vmem:[#allocation2] sm:$0x1] }
  0xd9   :  { %v445_v43 = vmul.f32 0.03125, %v444_v42 }
  0xda   :  { %v446_v44 = vld [vmem:[#allocation3] sm:$0x1] }
  0xdb   :  { %v447_v45 = vmul.f32 0.03125, %v446_v44  ;;  %v448_v46 = vmul.f32 %v445_v43, %v445_v43 }
  0xdd   :  { %v449_v47 = vsub.f32 %v447_v45, %v448_v46 }
  0xdf   :  { %v450_v48 = vmax.f32 %v449_v47, 0.0 }
  0xe1   :  { %v452_v49 = vadd.f32 1e-05, %v450_v48 }
  0xe3   :  { %705 = vrsqrt.f32 %v452_v49  ;;  %vm459_vm1 = vweird.f32 %v452_v49 }
  0xe9   :  { %v706_v50 = vpop.eup %705 }
  0xea   :  { %v454_v51 = vmul.f32 %v706_v50, %v452_v49  ;;  %vm460_vm0 = vweird.f32 %v706_v50 }
  0xeb   :  { %vm461_vm2 = vmor %vm459_vm1, %vm460_vm0 }
  0xec   :  { %v455_v52 = vmul.f32 %v706_v50, %v454_v51 }
  0xee   :  { %v456_v53 = vmul.f32 0.5, %v455_v52 }
  0xf0   :  { %v457_v54 = vsub.f32 1.5, %v456_v53 }
  0xf2   :  { %v458_v56 = vmul.f32 %v706_v50, %v457_v54 }
  0xf4   :  { %v462_v57 = vsel %vm461_vm2, %v706_v50, %v458_v56 }
  0xf5   :  { %v463_v58 = vmul.f32 %v462_v57, %v451_v55 }
  0xf7   :  { %v465_v60 = vmul.f32 %v463_v58, %v445_v43  ;;  %v472_v61 = vperm.slane %v463_v58, 0 }
  0xf9   :  { %v466_v62 = vsub.f32 %v464_v59, %v465_v60  ;;  %v474_v63 = vmul.f32 %v472_v61, %v388_v13  ;;  %v475_v0 = vmul.f32 %v472_v61, %v390_v10  ;;  %v476_v1 = vmul.f32 %v472_v61, %v393_v14 }
  0xfa   :  { %v477_v2 = vmul.f32 %v472_v61, %v395_v25 }
  0xfb   :  { %v479_v3 = vperm.slane %v466_v62, 0 }
  0xfd   :  { %v481_v4 = vadd.f32 %v479_v3, %v474_v63  ;;  %v482_v5 = vadd.f32 %v479_v3, %v475_v0  ;;  %v483_v6 = vadd.f32 %v479_v3, %v476_v1  ;;  %v484_v7 = vadd.f32 %v479_v3, %v477_v2 }
  0xff   :  { %vm485_vm3 = vcmp.ge.f32.partialorder %v481_v4, 0.0  ;;  %vm486_vm4 = vcmp.ge.f32.partialorder %v482_v5, 0.0  ;;  %vm487_vm5 = vcmp.ge.f32.partialorder %v483_v6, 0.0  ;;  %vm488_vm6 = vcmp.ge.f32.partialorder %v484_v7, 0.0 }
 0x100   :  { %v489_v8 = vmul.f32 0.2, %v481_v4  ;;  %v490_v9 = vmul.f32 0.2, %v482_v5  ;;  %v491_v11 = vmul.f32 0.2, %v483_v6 }
 0x101   :  { %v492_v12 = vmul.f32 0.2, %v484_v7 }
 0x102   :  { %v493_v15 = vsel %vm485_vm3, %v481_v4, %v489_v8  ;;  %v494_v16 = vsel %vm486_vm4, %v482_v5, %v490_v9  ;;  %v495_v17 = vsel %vm487_vm5, %v483_v6, %v491_v11 }
 0x103   :  { %v496_v13 = vsel %vm488_vm6, %v484_v7, %v492_v12  ;;  %497 = vst [vmem:[%s898_s4] sm:$0xff] %v493_v15 }
 0x104   :  { %498 = vst [vmem:[%s898_s4 + $0x8] sm:$0xff] %v494_v16 }
 0x105   :  { %499 = vst [vmem:[%s898_s4 + $0x10] sm:$0xff] %v495_v17 }
 0x106   :  { %500 = vst [vmem:[%s898_s4 + $0x18] sm:$0xff] %v496_v13 }

</bundles_post_ra>
